<compile_context>
chip_gen: v7x
topology: tpu7x:2x2x1
jax: 0.10.0
libtpu: 0.0.40
codegen_flags: <defaults>
</compile_context>

<pallas_src>
import functools

import numpy as np
import jax
import jax.numpy as jnp
from jax.experimental import pallas as pl
from jax.experimental.pallas import tpu as pltpu

GROUPS = 2
_EPS = 1e-5

# MXU operand dtype (see header note).  bf16 on v6e/v7x, f32 here for accuracy.
_MM_DTYPE = jnp.float32

_TILE_BYTES = 4 * 1024 * 1024    # target bytes for one output row tile (MB-scale tiles)
_CHUNK_ROWS = 256                # max flattened rows per MXU chunk (bounds vreg pressure)
_LEFT_HALO = 8                   # sublane-aligned left halo in the padded VMEM scratch


# ------------------------------ small helpers --------------------------------

@functools.lru_cache(maxsize=None)
def _vmem_limit_bytes():
    """Generation-aware scoped-VMEM limit (v7x: 64 MiB/TC, v5e/v6e: 128 MiB)."""
    cap = 128 * 1024 * 1024
    try:
        cap = int(getattr(pltpu.get_tpu_info(), "vmem_capacity_bytes", cap))
    except Exception:
        pass
    return int(min(max(cap * 3 // 4, 32 * 1024 * 1024), 100 * 1024 * 1024))


def _pick_row_tile(ho, wo, c):
    """Largest row tile (divisor of ho; whole-sample or multiple of 8) under the byte cap."""
    cap = max(1, _TILE_BYTES // max(1, wo * c * 4))
    if ho <= cap:
        return ho
    for t in range(min(ho, cap), 7, -1):
        if ho % t == 0 and t % 8 == 0:
            return t
    return ho   # no clean divisor under the cap -> whole-sample rows (still correct)


def _pick_chunk_rows(th, wo):
    cap = max(1, _CHUNK_ROWS // max(1, wo))
    for r in range(min(th, cap), 0, -1):
        if th % r == 0:
            return r
    return 1


def _elu(x):
    return jnp.where(x > 0, x, jnp.exp(jnp.minimum(x, 0.0)) - 1.0)


# ------------------------------ Pallas kernels -------------------------------

def _conv_kernel(*refs, taps, th, rc, wo, cin, cout, row_halo, left_halo,
                 fuse_bn_elu):
    """Grouped 3x3 conv over one output row tile.

    The 9 taps are folded into a single K = 9*Cin MXU contraction per row
    chunk (<= _CHUNK_ROWS flattened rows -> no vreg spills).  For stride-1
    layers the raw previous-layer output is BN-scaled + ELU'd on the fly and
    written into a zero-halo VMEM scratch (fused prologue: no standalone
    BN/ELU pass, no host-side jnp.pad).  Per-tile channel sums / sums of
    squares are emitted so the next BN never re-reads this output from HBM.
    """
    if fuse_bn_elu:
        (x_ref, w_ref, b_ref, scale_ref, shift_ref,
         o_ref, sum_ref, ssq_ref, xpad_ref) = refs
    else:
        (x_ref, w_ref, b_ref, o_ref, sum_ref, ssq_ref) = refs
        xpad_ref = None

    t = pl.program_id(1)

    if fuse_bn_elu:
        h_in, w_in = x_ref.shape[1], x_ref.shape[2]

        @pl.when(t == 0)                     # sample changed -> rebuild padded scratch
        def _():
            xpad_ref[...] = jnp.zeros_like(xpad_ref)
            rb = max(1, _CHUNK_ROWS // max(1, w_in))
            for r in range(0, h_in, rb):     # static row blocks (bounds vreg pressure)
                hh = min(rb, h_in - r)
                xin = x_ref[0, r:r + hh, :, :]
                act = _elu(xin * scale_ref[...] + shift_ref[...])   # fused BN + ELU
                xpad_ref[row_halo + r:row_halo + r + hh,
                         left_halo:left_halo + w_in, :] = act

    def read_tap(r0, ro, co):
        if fuse_bn_elu:
            return xpad_ref[pl.ds(r0 + ro, rc), pl.ds(co, wo), :]
        return x_ref[0, pl.ds(r0 + ro, rc), pl.ds(co, wo), :]

    row_base = pl.multiple_of(t * th, 8) if th % 8 == 0 else t * th
    w_mat = w_ref[...].astype(_MM_DTYPE)     # (9*cin, cout), VMEM-resident
    bias = b_ref[...]                        # (1, cout)
    nchunks = th // rc

    def chunk(c_, carry):
        s_acc, q_acc = carry
        r0 = row_base + c_ * rc
        pieces = [read_tap(r0, ro, co) for (ro, co) in taps]        # 9 x (rc, wo, cin)
        a = jnp.concatenate(pieces, axis=-1)                        # (rc, wo, 9*cin)
        a = a.reshape(rc * wo, 9 * cin).astype(_MM_DTYPE)
        y = jnp.dot(a, w_mat, preferred_element_type=jnp.float32) + bias
        o_ref[0, pl.ds(c_ * rc, rc), :, :] = (
            y.reshape(rc, wo, cout).astype(o_ref.dtype))
        return (s_acc + jnp.sum(y, axis=0, keepdims=True),
                q_acc + jnp.sum(y * y, axis=0, keepdims=True))

    init = (jnp.zeros((1, cout), jnp.float32), jnp.zeros((1, cout), jnp.float32))
    if nchunks == 1:
        s_acc, q_acc = chunk(0, init)
    else:
        s_acc, q_acc = jax.lax.fori_loop(0, nchunks, chunk, init,
                                         unroll=nchunks <= 8)

    # Broadcast the tile partials to 8 rows so the stats block satisfies the
    # (8, lane) tiling rule; the host-side reduction divides by 8.
    sum_ref[...] = jnp.broadcast_to(s_acc.reshape(1, 1, 1, cout), sum_ref.shape)
    ssq_ref[...] = jnp.broadcast_to(q_acc.reshape(1, 1, 1, cout), ssq_ref.shape)


def _bn_add_elu_kernel(x_ref, res_ref, scale_ref, shift_ref, o_ref):
    """ELU(x*scale + shift + residual) on lane-dense (1, th, Wo*C) blocks."""
    o_ref[...] = _elu(x_ref[...] * scale_ref[...] + shift_ref[...] + res_ref[...])


def _bn_self_add_elu_kernel(x_ref, scale_ref, shift_ref, o_ref):
    """layer == 0 path: ELU(x*scale + shift + x), reading x only once."""
    x = x_ref[...]
    o_ref[...] = _elu(x * scale_ref[...] + shift_ref[...] + x)


# ---------------------------- host-side wrappers ------------------------------

def _conv_call(x, w_folded, bias2d, scale2d, shift2d, *, taps, ho, wo,
               scratch_shape=None, row_halo=0, left_halo=_LEFT_HALO):
    n, hx, wx, cin = x.shape
    cout = w_folded.shape[-1]
    th = _pick_row_tile(ho, wo, cout)
    tt = ho // th
    rc = _pick_chunk_rows(th, wo)
    fuse = scale2d is not None

    kernel = functools.partial(
        _conv_kernel, taps=taps, th=th, rc=rc, wo=wo, cin=cin, cout=cout,
        row_halo=row_halo, left_halo=left_halo, fuse_bn_elu=fuse)

    in_specs = [
        # Whole sample: index ignores the row-tile axis -> fetched once per sample
        # and stays resident across row tiles (no refetch for a repeated index).
        pl.BlockSpec((1, hx, wx, cin), lambda nn, t: (nn, 0, 0, 0)),
        # Weights / bias ignore the grid entirely -> resident in VMEM.
        pl.BlockSpec((9 * cin, cout), lambda nn, t: (0, 0)),
        pl.BlockSpec((1, cout), lambda nn, t: (0, 0)),
    ]
    args = [x, w_folded, bias2d]
    if fuse:
        in_specs += [pl.BlockSpec((1, cin), lambda nn, t: (0, 0)),
                     pl.BlockSpec((1, cin), lambda nn, t: (0, 0))]
        args += [scale2d, shift2d]

    out_shape = (jax.ShapeDtypeStruct((n, ho, wo, cout), jnp.float32),
                 jax.ShapeDtypeStruct((n, tt, 8, cout), jnp.float32),
                 jax.ShapeDtypeStruct((n, tt, 8, cout), jnp.float32))
    out_specs = (pl.BlockSpec((1, th, wo, cout), lambda nn, t: (nn, t, 0, 0)),
                 pl.BlockSpec((1, 1, 8, cout), lambda nn, t: (nn, t, 0, 0)),
                 pl.BlockSpec((1, 1, 8, cout), lambda nn, t: (nn, t, 0, 0)))
    scratch_shapes = [pltpu.VMEM(scratch_shape, jnp.float32)] if fuse else []

    # TODO(synk): for samples too large to keep resident in VMEM, switch the input
    # to a manually DMA'd halo'd row window (memory_space=pl.ANY + make_async_copy).
    return pl.pallas_call(
        kernel,
        grid=(n, tt),
        in_specs=in_specs,
        out_specs=out_specs,
        out_shape=out_shape,
        scratch_shapes=scratch_shapes,
        compiler_params=pltpu.CompilerParams(
            # Batch axis parallel (feeds both v7x TensorCores when N >= 2); the
            # row-tile axis is "arbitrary" because the padded scratch is carried
            # across it (filled once per sample at t == 0).
            dimension_semantics=("parallel", "arbitrary"),
            vmem_limit_bytes=_vmem_limit_bytes()),
    )(*args)


def conv_down(x_nhwc, w_folded, bias2d):
    """Grouped 3x3 stride-2 'down' conv (padding=1) + per-tile BN stat partials."""
    n, h, w, cin = x_nhwc.shape
    ho = (h - 1) // 2 + 1
    wo = (w - 1) // 2 + 1
    # Host-side zero pad + space-to-depth phase split turns the stride-2 conv into
    # stride-1 taps over 4 phase planes (phases partition the input -> 1x read).
    # TODO(synk): fold this prep (and the NCHW<->NHWC transposes) into the kernel /
    # model boundary to save the extra HBM passes on the module input.
    xp = jnp.pad(x_nhwc, ((0, 0), (1, 1), (1, 1), (0, 0)))
    hp, wp = h + 2, w + 2
    hq, wq = (hp + 1) // 2, (wp + 1) // 2
    xp = jnp.pad(xp, ((0, 0), (0, 2 * hq - hp), (0, 2 * wq - wp), (0, 0)))
    x6 = xp.reshape(n, hq, 2, wq, 2, cin)
    xprep = jnp.transpose(x6, (0, 2, 4, 1, 3, 5)).reshape(n, 4 * hq, wq, cin)
    taps = tuple(((2 * (kh % 2) + (kw % 2)) * hq + kh // 2, kw // 2)
                 for kh in range(3) for kw in range(3))
    return _conv_call(xprep, w_folded, bias2d, None, None,
                      taps=taps, ho=ho, wo=wo)


def conv_inner(h4, w_folded, bias2d, scale, shift, *, dilation):
    """Grouped 3x3 stride-1 conv with the ELU(BN(.)) prologue fused in-kernel."""
    n, ho, wo, c = h4.shape
    left = ((dilation + 7) // 8) * 8            # sublane-aligned left halo >= dilation
    taps = tuple((kh * dilation, left + (kw - 1) * dilation)
                 for kh in range(3) for kw in range(3))
    scratch_shape = (ho + 2 * dilation, wo + dilation + left, c)
    return _conv_call(h4, w_folded, bias2d,
                      scale.reshape(1, c), shift.reshape(1, c),
                      taps=taps, ho=ho, wo=wo,
                      scratch_shape=scratch_shape, row_halo=dilation,
                      left_halo=left)


def bn_add_elu(x_ld, res_ld, scale, shift, *, self_residual):
    """Final fused BatchNorm + residual add + ELU on lane-dense (N, H, W*C) views."""
    n, ho, wc = x_ld.shape
    c = scale.shape[0]
    wo = wc // c
    th = _pick_row_tile(ho, wo, c)
    # Pre-tile scale/shift to the lane-dense width -> every VPU op is 128-lane dense.
    scale_t = jnp.tile(scale, wo).reshape(1, wc)
    shift_t = jnp.tile(shift, wo).reshape(1, wc)
    blk = pl.BlockSpec((1, th, wc), lambda nn, t: (nn, t, 0))
    vec = pl.BlockSpec((1, wc), lambda nn, t: (0, 0))
    if self_residual:
        kernel, in_specs, args = (_bn_self_add_elu_kernel, [blk, vec, vec],
                                  (x_ld, scale_t, shift_t))
    else:
        kernel, in_specs, args = (_bn_add_elu_kernel, [blk, blk, vec, vec],
                                  (x_ld, res_ld, scale_t, shift_t))
    return pl.pallas_call(
        kernel,
        out_shape=jax.ShapeDtypeStruct(x_ld.shape, x_ld.dtype),
        grid=(n, ho // th),
        in_specs=in_specs,
        out_specs=blk,
        compiler_params=pltpu.CompilerParams(
            dimension_semantics=("parallel", "parallel"),
            vmem_limit_bytes=_vmem_limit_bytes()),
    )(*args)


def _scale_shift_from_stats(sums, ssqs, gamma, beta, count):
    """Training-mode (biased) BatchNorm folded into y = x*scale + shift (tiny XLA op)."""
    s = jnp.sum(sums, axis=(0, 1, 2)) / 8.0      # tile partials were broadcast to 8 rows
    q = jnp.sum(ssqs, axis=(0, 1, 2)) / 8.0
    mean = s / count
    var = jnp.maximum(q / count - mean * mean, 0.0)
    scale = gamma * jax.lax.rsqrt(var + _EPS)
    shift = beta - mean * scale
    return scale, shift


def down_transition_forward(x_nchw, packed, *, layer, dilation):
    """Pallas implementation of DownTransition.forward (NCHW in / NCHW out)."""
    n = x_nchw.shape[0]
    # TODO(synk): keep the surrounding network in NHWC and hoist these boundary
    # transposes out of the module (each is a full HBM read+write pass in XLA).
    x = jnp.transpose(x_nchw, (0, 2, 3, 1))

    out1, s, q = conv_down(x, packed['down_w'], packed['down_b'])
    _, ho, wo, c = out1.shape
    count = n * ho * wo
    scale, shift = _scale_shift_from_stats(s, q, packed['bn_gamma'],
                                           packed['bn_beta'], count)

    out1_ld = out1.reshape(n, ho, wo * c)        # zero-copy lane-dense view
    if layer == 0:
        out_ld = bn_add_elu(out1_ld, None, scale, shift, self_residual=True)
        return jnp.transpose(out_ld.reshape(n, ho, wo, c), (0, 3, 1, 2))

    h = out1
    for i in range(layer):
        # Each inner layer is one kernel: ELU(BN(prev)) prologue + conv + stat partials.
        h, s, q = conv_inner(h, packed[f'c{i}_w'], packed[f'c{i}_b'],
                             scale, shift, dilation=dilation)
        scale, shift = _scale_shift_from_stats(s, q, packed[f'c{i}_gamma'],
                                               packed[f'c{i}_beta'], count)

    out_ld = bn_add_elu(h.reshape(n, ho, wo * c), out1_ld, scale, shift,
                        self_residual=False)
    return jnp.transpose(out_ld.reshape(n, ho, wo, c), (0, 3, 1, 2))


# --------------------------- parameter preparation ----------------------------

def _pack_conv_weight(w):
    """(Cout, Cin/groups, 3, 3) grouped OIHW weight -> (9*Cin, Cout) block-diagonal,
    row-ordered (tap, cin) to match the in-kernel 9-tap concat."""
    cout, cin_g, _, _ = w.shape
    cin = cin_g * GROUPS
    cout_g = cout // GROUPS
    wt = jnp.transpose(w, (2, 3, 1, 0)).reshape(9, cin_g, cout)
    packed = jnp.zeros((9, cin, cout), w.dtype)
    for g in range(GROUPS):
        packed = packed.at[:, g * cin_g:(g + 1) * cin_g,
                           g * cout_g:(g + 1) * cout_g].set(
            wt[:, :, g * cout_g:(g + 1) * cout_g])
    return packed.reshape(9 * cin, cout)


def pack_params(params, layer):
    """Weight repacking hoisted out of the jitted forward (done once)."""
    packed = {
        'down_w': _pack_conv_weight(params['down_w']),
        'down_b': params['down_b'].reshape(1, -1),
        'bn_gamma': params['bn_gamma'],
        'bn_beta': params['bn_beta'],
    }
    for i in range(layer):
        packed[f'c{i}_w'] = _pack_conv_weight(params[f'c{i}_w'])
        packed[f'c{i}_b'] = params[f'c{i}_b'].reshape(1, -1)
        packed[f'c{i}_gamma'] = params[f'c{i}_gamma']
        packed[f'c{i}_beta'] = params[f'c{i}_beta']
    return packed


def init_params(key, inchan, outchan, layer):
    keys = jax.random.split(key, 2 + 2 * layer)
    it = iter(keys)
    params = {
        'down_w': 0.1 * jax.random.normal(next(it), (outchan, inchan // GROUPS, 3, 3),
                                          jnp.float32),
        'down_b': 0.1 * jax.random.normal(next(it), (outchan,), jnp.float32),
        'bn_gamma': jnp.ones((outchan,), jnp.float32),   # PyTorch BN default init
        'bn_beta': jnp.zeros((outchan,), jnp.float32),
    }
    for i in range(layer):
        params[f'c{i}_w'] = 0.1 * jax.random.normal(
            next(it), (outchan, outchan // GROUPS, 3, 3), jnp.float32)
        params[f'c{i}_b'] = 0.1 * jax.random.normal(next(it), (outchan,), jnp.float32)
        params[f'c{i}_gamma'] = jnp.ones((outchan,), jnp.float32)
        params[f'c{i}_beta'] = jnp.zeros((outchan,), jnp.float32)
    return params


# ----------------------------- pure-JAX reference -----------------------------

def _ref_forward(x, params, *, layer, dilation):
    def conv(x, w, b, stride, pad, dil):
        y = jax.lax.conv_general_dilated(
            x, w, (stride, stride), [(pad, pad), (pad, pad)],
            rhs_dilation=(dil, dil),
            dimension_numbers=('NCHW', 'OIHW', 'NCHW'),
            feature_group_count=GROUPS)
        return y + b[None, :, None, None]

    def bn(x, g_, b_):
        mean = x.mean(axis=(0, 2, 3), keepdims=True)
        var = ((x - mean) ** 2).mean(axis=(0, 2, 3), keepdims=True)
        return ((x - mean) * jax.lax.rsqrt(var + _EPS) * g_[None, :, None, None]
                + b_[None, :, None, None])

    def e(x):
        return jnp.where(x > 0, x, jnp.exp(jnp.minimum(x, 0.0)) - 1.0)

    out1 = conv(x, params['down_w'], params['down_b'], 2, 1, 1)
    h = bn(out1, params['bn_gamma'], params['bn_beta'])
    for i in range(layer):
        h = e(h)
        h = conv(h, params[f'c{i}_w'], params[f'c{i}_b'], 1, dilation, dilation)
        h = bn(h, params[f'c{i}_gamma'], params[f'c{i}_beta'])
    return e(out1 + h)


# ----------------------------------- main -------------------------------------

if __name__ == "__main__":
    inchan, outchan, layer, dilation = 4, 8, 2, 1
    N, H, W = 2, 16, 16

    key = jax.random.PRNGKey(0)
    kx, kp = jax.random.split(key)
    x = jax.random.normal(kx, (N, inchan, H, W), jnp.float32)
    params = init_params(kp, inchan, outchan, layer)
    packed = pack_params(params, layer)      # weight repacking hoisted (done once)

    fwd = jax.jit(functools.partial(down_transition_forward,
                                    layer=layer, dilation=dilation))
    out = fwd(x, packed)
    jax.block_until_ready(out)

    assert out.shape == (N, outchan, H // 2, W // 2), out.shape

    ref = _ref_forward(x, params, layer=layer, dilation=dilation)
    np.testing.assert_allclose(np.asarray(out), np.asarray(ref),
                               rtol=1e-2, atol=1e-2)
    assert np.all(np.isfinite(np.asarray(out)))

    print("KERNEL_OK")
</pallas_src>

<mosaic_0001>
module attributes {stable_mosaic.version = 11 : i64} {
  func.func @_conv_kernel(%arg0: i32, %arg1: i32, %arg2: memref<1x36x9x4xf32, #tpu.memory_space<vmem>>, %arg3: memref<36x8xf32, #tpu.memory_space<vmem>>, %arg4: memref<1x8xf32, #tpu.memory_space<vmem>>, %arg5: memref<1x8x8x8xf32, #tpu.memory_space<vmem>>, %arg6: memref<1x1x8x8xf32, #tpu.memory_space<vmem>>, %arg7: memref<1x1x8x8xf32, #tpu.memory_space<vmem>>) attributes {dimension_semantics = [#tpu.dimension_semantics<parallel>, #tpu.dimension_semantics<arbitrary>], iteration_bounds = array<i64: 2, 1>, scalar_prefetch = 0 : i64, scratch_operands = 0 : i64, tpu.core_type = #tpu.core_type<tc>, window_params = [{transform_indices = @transform_0, window_bounds = array<i64: 1, 36, 9, 4>}, {pipeline_mode = #tpu.pipeline_mode<synchronous>, transform_indices = @transform_1, window_bounds = array<i64: 36, 8>}, {pipeline_mode = #tpu.pipeline_mode<synchronous>, transform_indices = @transform_2, window_bounds = array<i64: 1, 8>}, {transform_indices = @transform_3, window_bounds = array<i64: 1, 8, 8, 8>}, {transform_indices = @transform_4, window_bounds = array<i64: 1, 1, 8, 8>}, {transform_indices = @transform_5, window_bounds = array<i64: 1, 1, 8, 8>}]} {
    %c8_i32 = arith.constant 8 : i32
    %0 = arith.muli %arg1, %c8_i32 : i32
    %1 = tpu.assume_multiple %0, 8 : i32
    %c0 = arith.constant 0 : index
    %c0_0 = arith.constant 0 : index
    %2 = vector.load %arg3[%c0, %c0_0] : memref<36x8xf32, #tpu.memory_space<vmem>>, vector<36x8xf32>
    %c0_1 = arith.constant 0 : index
    %c0_2 = arith.constant 0 : index
    %3 = vector.load %arg4[%c0_1, %c0_2] : memref<1x8xf32, #tpu.memory_space<vmem>>, vector<1x8xf32>
    %cst = arith.constant 0.000000e+00 : f32
    %4 = vector.broadcast %cst : f32 to vector<1x8xf32>
    %cst_3 = arith.constant 0.000000e+00 : f32
    %5 = vector.broadcast %cst_3 : f32 to vector<1x8xf32>
    %c0_i32 = arith.constant 0 : i32
    %6 = arith.addi %1, %c0_i32 : i32
    %c0_i32_4 = arith.constant 0 : i32
    %7 = arith.addi %6, %c0_i32_4 : i32
    %c0_5 = arith.constant 0 : index
    %8 = arith.index_cast %7 : i32 to index
    %c0_6 = arith.constant 0 : index
    %c0_7 = arith.constant 0 : index
    %9 = vector.load %arg2[%c0_5, %8, %c0_6, %c0_7] : memref<1x36x9x4xf32, #tpu.memory_space<vmem>>, vector<1x8x8x4xf32>
    %10 = vector.shape_cast %9 : vector<1x8x8x4xf32> to vector<8x8x4xf32>
    %c9_i32 = arith.constant 9 : i32
    %11 = arith.addi %6, %c9_i32 : i32
    %c0_8 = arith.constant 0 : index
    %12 = arith.index_cast %11 : i32 to index
    %c0_9 = arith.constant 0 : index
    %c0_10 = arith.constant 0 : index
    %13 = vector.load %arg2[%c0_8, %12, %c0_9, %c0_10] : memref<1x36x9x4xf32, #tpu.memory_space<vmem>>, vector<1x8x8x4xf32>
    %14 = vector.shape_cast %13 : vector<1x8x8x4xf32> to vector<8x8x4xf32>
    %c0_i32_11 = arith.constant 0 : i32
    %15 = arith.addi %6, %c0_i32_11 : i32
    %c0_12 = arith.constant 0 : index
    %16 = arith.index_cast %15 : i32 to index
    %c1 = arith.constant 1 : index
    %c0_13 = arith.constant 0 : index
    %17 = vector.load %arg2[%c0_12, %16, %c1, %c0_13] : memref<1x36x9x4xf32, #tpu.memory_space<vmem>>, vector<1x8x8x4xf32>
    %18 = vector.shape_cast %17 : vector<1x8x8x4xf32> to vector<8x8x4xf32>
    %c18_i32 = arith.constant 18 : i32
    %19 = arith.addi %6, %c18_i32 : i32
    %c0_14 = arith.constant 0 : index
    %20 = arith.index_cast %19 : i32 to index
    %c0_15 = arith.constant 0 : index
    %c0_16 = arith.constant 0 : index
    %21 = vector.load %arg2[%c0_14, %20, %c0_15, %c0_16] : memref<1x36x9x4xf32, #tpu.memory_space<vmem>>, vector<1x8x8x4xf32>
    %22 = vector.shape_cast %21 : vector<1x8x8x4xf32> to vector<8x8x4xf32>
    %c27_i32 = arith.constant 27 : i32
    %23 = arith.addi %6, %c27_i32 : i32
    %c0_17 = arith.constant 0 : index
    %24 = arith.index_cast %23 : i32 to index
    %c0_18 = arith.constant 0 : index
    %c0_19 = arith.constant 0 : index
    %25 = vector.load %arg2[%c0_17, %24, %c0_18, %c0_19] : memref<1x36x9x4xf32, #tpu.memory_space<vmem>>, vector<1x8x8x4xf32>
    %26 = vector.shape_cast %25 : vector<1x8x8x4xf32> to vector<8x8x4xf32>
    %c18_i32_20 = arith.constant 18 : i32
    %27 = arith.addi %6, %c18_i32_20 : i32
    %c0_21 = arith.constant 0 : index
    %28 = arith.index_cast %27 : i32 to index
    %c1_22 = arith.constant 1 : index
    %c0_23 = arith.constant 0 : index
    %29 = vector.load %arg2[%c0_21, %28, %c1_22, %c0_23] : memref<1x36x9x4xf32, #tpu.memory_space<vmem>>, vector<1x8x8x4xf32>
    %30 = vector.shape_cast %29 : vector<1x8x8x4xf32> to vector<8x8x4xf32>
    %c1_i32 = arith.constant 1 : i32
    %31 = arith.addi %6, %c1_i32 : i32
    %c0_24 = arith.constant 0 : index
    %32 = arith.index_cast %31 : i32 to index
    %c0_25 = arith.constant 0 : index
    %c0_26 = arith.constant 0 : index
    %33 = vector.load %arg2[%c0_24, %32, %c0_25, %c0_26] : memref<1x36x9x4xf32, #tpu.memory_space<vmem>>, vector<1x8x8x4xf32>
    %34 = vector.shape_cast %33 : vector<1x8x8x4xf32> to vector<8x8x4xf32>
    %c10_i32 = arith.constant 10 : i32
    %35 = arith.addi %6, %c10_i32 : i32
    %c0_27 = arith.constant 0 : index
    %36 = arith.index_cast %35 : i32 to index
    %c0_28 = arith.constant 0 : index
    %c0_29 = arith.constant 0 : index
    %37 = vector.load %arg2[%c0_27, %36, %c0_28, %c0_29] : memref<1x36x9x4xf32, #tpu.memory_space<vmem>>, vector<1x8x8x4xf32>
    %38 = vector.shape_cast %37 : vector<1x8x8x4xf32> to vector<8x8x4xf32>
    %c1_i32_30 = arith.constant 1 : i32
    %39 = arith.addi %6, %c1_i32_30 : i32
    %c0_31 = arith.constant 0 : index
    %40 = arith.index_cast %39 : i32 to index
    %c1_32 = arith.constant 1 : index
    %c0_33 = arith.constant 0 : index
    %41 = vector.load %arg2[%c0_31, %40, %c1_32, %c0_33] : memref<1x36x9x4xf32, #tpu.memory_space<vmem>>, vector<1x8x8x4xf32>
    %42 = vector.shape_cast %41 : vector<1x8x8x4xf32> to vector<8x8x4xf32>
    %43 = tpu.concatenate %10, %14, %18, %22, %26, %30, %34, %38, %42 in 2 : vector<8x8x4xf32>, vector<8x8x4xf32>, vector<8x8x4xf32>, vector<8x8x4xf32>, vector<8x8x4xf32>, vector<8x8x4xf32>, vector<8x8x4xf32>, vector<8x8x4xf32>, vector<8x8x4xf32> -> vector<8x8x36xf32>
    %44 = vector.shape_cast %43 : vector<8x8x36xf32> to vector<64x36xf32>
    %cst_34 = arith.constant dense<0.000000e+00> : vector<64x8xf32>
    %45 = tpu.matmul %44, %2, %cst_34 {dimension_numbers = #tpu.dot_dimension_numbers<[1], [0], [0], [1], [0, 0, 1, 1], [], []>} : vector<64x36xf32>, vector<36x8xf32>, vector<64x8xf32> -> vector<64x8xf32>
    %46 = vector.broadcast %3 : vector<1x8xf32> to vector<64x8xf32>
    %47 = arith.addf %45, %46 : vector<64x8xf32>
    %48 = vector.shape_cast %47 : vector<64x8xf32> to vector<8x8x8xf32>
    %c0_35 = arith.constant 0 : index
    %c0_36 = arith.constant 0 : index
    %c0_37 = arith.constant 0 : index
    %c0_38 = arith.constant 0 : index
    %49 = vector.load %arg5[%c0_35, %c0_36, %c0_37, %c0_38] : memref<1x8x8x8xf32, #tpu.memory_space<vmem>>, vector<1x8x8x8xf32>
    %50 = vector.shape_cast %49 : vector<1x8x8x8xf32> to vector<8x8x8xf32>
    %51 = vector.shape_cast %48 : vector<8x8x8xf32> to vector<1x8x8x8xf32>
    tpu.vector_store %arg5[%c0_35, %c0_36, %c0_37, %c0_38], %51 {strides = array<i32>} : memref<1x8x8x8xf32, #tpu.memory_space<vmem>>, vector<1x8x8x8xf32>,
    %cst_39 = arith.constant dense<0.000000e+00> : vector<8xf32>
    %52 = vector.multi_reduction <add>, %47, %cst_39 [0] : vector<64x8xf32> to vector<8xf32>
    %53 = vector.shape_cast %52 : vector<8xf32> to vector<1x8xf32>
    %54 = arith.addf %4, %53 : vector<1x8xf32>
    %55 = arith.mulf %47, %47 : vector<64x8xf32>
    %cst_40 = arith.constant dense<0.000000e+00> : vector<8xf32>
    %56 = vector.multi_reduction <add>, %55, %cst_40 [0] : vector<64x8xf32> to vector<8xf32>
    %57 = vector.shape_cast %56 : vector<8xf32> to vector<1x8xf32>
    %58 = arith.addf %5, %57 : vector<1x8xf32>
    %59 = vector.shape_cast %54 : vector<1x8xf32> to vector<1x1x1x8xf32>
    %60 = vector.shape_cast %59 : vector<1x1x1x8xf32> to vector<1x1x1x8xf32>
    %61 = vector.broadcast %60 : vector<1x1x1x8xf32> to vector<1x1x8x8xf32>
    %c0_41 = arith.constant 0 : index
    %c0_42 = arith.constant 0 : index
    %c0_43 = arith.constant 0 : index
    %c0_44 = arith.constant 0 : index
    %62 = vector.load %arg6[%c0_41, %c0_42, %c0_43, %c0_44] : memref<1x1x8x8xf32, #tpu.memory_space<vmem>>, vector<1x1x8x8xf32>
    tpu.vector_store %arg6[%c0_41, %c0_42, %c0_43, %c0_44], %61 {strides = array<i32>} : memref<1x1x8x8xf32, #tpu.memory_space<vmem>>, vector<1x1x8x8xf32>,
    %63 = vector.shape_cast %58 : vector<1x8xf32> to vector<1x1x1x8xf32>
    %64 = vector.shape_cast %63 : vector<1x1x1x8xf32> to vector<1x1x1x8xf32>
    %65 = vector.broadcast %64 : vector<1x1x1x8xf32> to vector<1x1x8x8xf32>
    %c0_45 = arith.constant 0 : index
    %c0_46 = arith.constant 0 : index
    %c0_47 = arith.constant 0 : index
    %c0_48 = arith.constant 0 : index
    %66 = vector.load %arg7[%c0_45, %c0_46, %c0_47, %c0_48] : memref<1x1x8x8xf32, #tpu.memory_space<vmem>>, vector<1x1x8x8xf32>
    tpu.vector_store %arg7[%c0_45, %c0_46, %c0_47, %c0_48], %65 {strides = array<i32>} : memref<1x1x8x8xf32, #tpu.memory_space<vmem>>, vector<1x1x8x8xf32>,
    return
  }
  func.func @transform_0(%arg0: i32, %arg1: i32) -> (i32, i32, i32, i32) {
    %c0_i32 = arith.constant 0 : i32
    %c0_i32_0 = arith.constant 0 : i32
    %c0_i32_1 = arith.constant 0 : i32
    %c0_i32_2 = arith.constant 0 : i32
    return %arg0, %c0_i32, %c0_i32_0, %c0_i32_1 : i32, i32, i32, i32
  }
  func.func @transform_1(%arg0: i32, %arg1: i32) -> (i32, i32) {
    %c0_i32 = arith.constant 0 : i32
    %c0_i32_0 = arith.constant 0 : i32
    %c0_i32_1 = arith.constant 0 : i32
    return %c0_i32, %c0_i32_0 : i32, i32
  }
  func.func @transform_2(%arg0: i32, %arg1: i32) -> (i32, i32) {
    %c0_i32 = arith.constant 0 : i32
    %c0_i32_0 = arith.constant 0 : i32
    %c0_i32_1 = arith.constant 0 : i32
    return %c0_i32, %c0_i32_0 : i32, i32
  }
  func.func @transform_3(%arg0: i32, %arg1: i32) -> (i32, i32, i32, i32) {
    %c0_i32 = arith.constant 0 : i32
    %c0_i32_0 = arith.constant 0 : i32
    %c0_i32_1 = arith.constant 0 : i32
    return %arg0, %arg1, %c0_i32, %c0_i32_0 : i32, i32, i32, i32
  }
  func.func @transform_4(%arg0: i32, %arg1: i32) -> (i32, i32, i32, i32) {
    %c0_i32 = arith.constant 0 : i32
    %c0_i32_0 = arith.constant 0 : i32
    %c0_i32_1 = arith.constant 0 : i32
    return %arg0, %arg1, %c0_i32, %c0_i32_0 : i32, i32, i32, i32
  }
  func.func @transform_5(%arg0: i32, %arg1: i32) -> (i32, i32, i32, i32) {
    %c0_i32 = arith.constant 0 : i32
    %c0_i32_0 = arith.constant 0 : i32
    %c0_i32_1 = arith.constant 0 : i32
    return %arg0, %arg1, %c0_i32, %c0_i32_0 : i32, i32, i32, i32
  }
}

module attributes {stable_mosaic.version = 11 : i64} {
  func.func @_conv_kernel(%arg0: i32, %arg1: i32, %arg2: memref<1x8x8x8xf32, #tpu.memory_space<vmem>>, %arg3: memref<72x8xf32, #tpu.memory_space<vmem>>, %arg4: memref<1x8xf32, #tpu.memory_space<vmem>>, %arg5: memref<1x8xf32, #tpu.memory_space<vmem>>, %arg6: memref<1x8xf32, #tpu.memory_space<vmem>>, %arg7: memref<1x8x8x8xf32, #tpu.memory_space<vmem>>, %arg8: memref<1x1x8x8xf32, #tpu.memory_space<vmem>>, %arg9: memref<1x1x8x8xf32, #tpu.memory_space<vmem>>, %arg10: memref<10x17x8xf32, #tpu.memory_space<vmem>>) attributes {dimension_semantics = [#tpu.dimension_semantics<parallel>, #tpu.dimension_semantics<arbitrary>], iteration_bounds = array<i64: 2, 1>, scalar_prefetch = 0 : i64, scratch_operands = 1 : i64, tpu.core_type = #tpu.core_type<tc>, window_params = [{transform_indices = @transform_0, window_bounds = array<i64: 1, 8, 8, 8>}, {pipeline_mode = #tpu.pipeline_mode<synchronous>, transform_indices = @transform_1, window_bounds = array<i64: 72, 8>}, {pipeline_mode = #tpu.pipeline_mode<synchronous>, transform_indices = @transform_2, window_bounds = array<i64: 1, 8>}, {pipeline_mode = #tpu.pipeline_mode<synchronous>, transform_indices = @transform_3, window_bounds = array<i64: 1, 8>}, {pipeline_mode = #tpu.pipeline_mode<synchronous>, transform_indices = @transform_4, window_bounds = array<i64: 1, 8>}, {transform_indices = @transform_5, window_bounds = array<i64: 1, 8, 8, 8>}, {transform_indices = @transform_6, window_bounds = array<i64: 1, 1, 8, 8>}, {transform_indices = @transform_7, window_bounds = array<i64: 1, 1, 8, 8>}]} {
    %c0_i32 = arith.constant 0 : i32
    %0 = arith.cmpi eq, %arg1, %c0_i32 : i32
    %1 = arith.extui %0 : i1 to i32
    %c0_i32_0 = arith.constant 0 : i32
    %2 = arith.cmpi ne, %1, %c0_i32_0 : i32
    scf.if %2 {
      %cst_43 = arith.constant 0.000000e+00 : f32
      %61 = vector.broadcast %cst_43 : f32 to vector<10x17x8xf32>
      %c0_44 = arith.constant 0 : index
      %c0_45 = arith.constant 0 : index
      %c0_46 = arith.constant 0 : index
      %62 = vector.load %arg10[%c0_44, %c0_45, %c0_46] : memref<10x17x8xf32, #tpu.memory_space<vmem>>, vector<10x17x8xf32>
      tpu.vector_store %arg10[%c0_44, %c0_45, %c0_46], %61 {strides = array<i32>} : memref<10x17x8xf32, #tpu.memory_space<vmem>>, vector<10x17x8xf32>,
      %c0_47 = arith.constant 0 : index
      %c0_48 = arith.constant 0 : index
      %c0_49 = arith.constant 0 : index
      %c0_50 = arith.constant 0 : index
      %63 = vector.load %arg2[%c0_47, %c0_48, %c0_49, %c0_50] : memref<1x8x8x8xf32, #tpu.memory_space<vmem>>, vector<1x8x8x8xf32>
      %64 = vector.shape_cast %63 : vector<1x8x8x8xf32> to vector<8x8x8xf32>
      %c0_51 = arith.constant 0 : index
      %c0_52 = arith.constant 0 : index
      %65 = vector.load %arg5[%c0_51, %c0_52] : memref<1x8xf32, #tpu.memory_space<vmem>>, vector<1x8xf32>
      %66 = vector.shape_cast %65 : vector<1x8xf32> to vector<1x1x8xf32>
      %67 = vector.broadcast %66 : vector<1x1x8xf32> to vector<8x8x8xf32>
      %68 = arith.mulf %64, %67 : vector<8x8x8xf32>
      %c0_53 = arith.constant 0 : index
      %c0_54 = arith.constant 0 : index
      %69 = vector.load %arg6[%c0_53, %c0_54] : memref<1x8xf32, #tpu.memory_space<vmem>>, vector<1x8xf32>
      %70 = vector.shape_cast %69 : vector<1x8xf32> to vector<1x1x8xf32>
      %71 = vector.broadcast %70 : vector<1x1x8xf32> to vector<8x8x8xf32>
      %72 = arith.addf %68, %71 : vector<8x8x8xf32>
      %cst_55 = arith.constant 0.000000e+00 : f32
      %73 = vector.broadcast %cst_55 : f32 to vector<8x8x8xf32>
      %74 = arith.cmpf ogt, %72, %73 : vector<8x8x8xf32>
      %cst_56 = arith.constant 0.000000e+00 : f32
      %75 = vector.broadcast %cst_56 : f32 to vector<8x8x8xf32>
      %76 = arith.minimumf %72, %75 : vector<8x8x8xf32>
      %77 = math.exp %76 : vector<8x8x8xf32>
      %cst_57 = arith.constant 1.000000e+00 : f32
      %78 = vector.broadcast %cst_57 : f32 to vector<8x8x8xf32>
      %79 = arith.subf %77, %78 : vector<8x8x8xf32>
      %80 = arith.select %74, %72, %79 : vector<8x8x8xi1>, vector<8x8x8xf32>
      %c1 = arith.constant 1 : index
      %c8_58 = arith.constant 8 : index
      %c0_59 = arith.constant 0 : index
      %81 = vector.load %arg10[%c1, %c8_58, %c0_59] : memref<10x17x8xf32, #tpu.memory_space<vmem>>, vector<8x8x8xf32>
      tpu.vector_store %arg10[%c1, %c8_58, %c0_59], %80 {strides = array<i32>} : memref<10x17x8xf32, #tpu.memory_space<vmem>>, vector<8x8x8xf32>,
    } else {
    }
    %c8_i32 = arith.constant 8 : i32
    %3 = arith.muli %arg1, %c8_i32 : i32
    %4 = tpu.assume_multiple %3, 8 : i32
    %c0 = arith.constant 0 : index
    %c0_1 = arith.constant 0 : index
    %5 = vector.load %arg3[%c0, %c0_1] : memref<72x8xf32, #tpu.memory_space<vmem>>, vector<72x8xf32>
    %c0_2 = arith.constant 0 : index
    %c0_3 = arith.constant 0 : index
    %6 = vector.load %arg4[%c0_2, %c0_3] : memref<1x8xf32, #tpu.memory_space<vmem>>, vector<1x8xf32>
    %cst = arith.constant 0.000000e+00 : f32
    %7 = vector.broadcast %cst : f32 to vector<1x8xf32>
    %cst_4 = arith.constant 0.000000e+00 : f32
    %8 = vector.broadcast %cst_4 : f32 to vector<1x8xf32>
    %c0_i32_5 = arith.constant 0 : i32
    %9 = arith.addi %4, %c0_i32_5 : i32
    %c0_i32_6 = arith.constant 0 : i32
    %10 = arith.addi %9, %c0_i32_6 : i32
    %11 = arith.index_cast %10 : i32 to index
    %c7 = arith.constant 7 : index
    %c0_7 = arith.constant 0 : index
    %12 = vector.load %arg10[%11, %c7, %c0_7] : memref<10x17x8xf32, #tpu.memory_space<vmem>>, vector<8x8x8xf32>
    %c0_i32_8 = arith.constant 0 : i32
    %13 = arith.addi %9, %c0_i32_8 : i32
    %14 = arith.index_cast %13 : i32 to index
    %c8 = arith.constant 8 : index
    %c0_9 = arith.constant 0 : index
    %15 = vector.load %arg10[%14, %c8, %c0_9] : memref<10x17x8xf32, #tpu.memory_space<vmem>>, vector<8x8x8xf32>
    %c0_i32_10 = arith.constant 0 : i32
    %16 = arith.addi %9, %c0_i32_10 : i32
    %17 = arith.index_cast %16 : i32 to index
    %c9 = arith.constant 9 : index
    %c0_11 = arith.constant 0 : index
    %18 = vector.load %arg10[%17, %c9, %c0_11] : memref<10x17x8xf32, #tpu.memory_space<vmem>>, vector<8x8x8xf32>
    %c1_i32 = arith.constant 1 : i32
    %19 = arith.addi %9, %c1_i32 : i32
    %20 = arith.index_cast %19 : i32 to index
    %c7_12 = arith.constant 7 : index
    %c0_13 = arith.constant 0 : index
    %21 = vector.load %arg10[%20, %c7_12, %c0_13] : memref<10x17x8xf32, #tpu.memory_space<vmem>>, vector<8x8x8xf32>
    %c1_i32_14 = arith.constant 1 : i32
    %22 = arith.addi %9, %c1_i32_14 : i32
    %23 = arith.index_cast %22 : i32 to index
    %c8_15 = arith.constant 8 : index
    %c0_16 = arith.constant 0 : index
    %24 = vector.load %arg10[%23, %c8_15, %c0_16] : memref<10x17x8xf32, #tpu.memory_space<vmem>>, vector<8x8x8xf32>
    %c1_i32_17 = arith.constant 1 : i32
    %25 = arith.addi %9, %c1_i32_17 : i32
    %26 = arith.index_cast %25 : i32 to index
    %c9_18 = arith.constant 9 : index
    %c0_19 = arith.constant 0 : index
    %27 = vector.load %arg10[%26, %c9_18, %c0_19] : memref<10x17x8xf32, #tpu.memory_space<vmem>>, vector<8x8x8xf32>
    %c2_i32 = arith.constant 2 : i32
    %28 = arith.addi %9, %c2_i32 : i32
    %29 = arith.index_cast %28 : i32 to index
    %c7_20 = arith.constant 7 : index
    %c0_21 = arith.constant 0 : index
    %30 = vector.load %arg10[%29, %c7_20, %c0_21] : memref<10x17x8xf32, #tpu.memory_space<vmem>>, vector<8x8x8xf32>
    %c2_i32_22 = arith.constant 2 : i32
    %31 = arith.addi %9, %c2_i32_22 : i32
    %32 = arith.index_cast %31 : i32 to index
    %c8_23 = arith.constant 8 : index
    %c0_24 = arith.constant 0 : index
    %33 = vector.load %arg10[%32, %c8_23, %c0_24] : memref<10x17x8xf32, #tpu.memory_space<vmem>>, vector<8x8x8xf32>
    %c2_i32_25 = arith.constant 2 : i32
    %34 = arith.addi %9, %c2_i32_25 : i32
    %35 = arith.index_cast %34 : i32 to index
    %c9_26 = arith.constant 9 : index
    %c0_27 = arith.constant 0 : index
    %36 = vector.load %arg10[%35, %c9_26, %c0_27] : memref<10x17x8xf32, #tpu.memory_space<vmem>>, vector<8x8x8xf32>
    %37 = tpu.concatenate %12, %15, %18, %21, %24, %27, %30, %33, %36 in 2 : vector<8x8x8xf32>, vector<8x8x8xf32>, vector<8x8x8xf32>, vector<8x8x8xf32>, vector<8x8x8xf32>, vector<8x8x8xf32>, vector<8x8x8xf32>, vector<8x8x8xf32>, vector<8x8x8xf32> -> vector<8x8x72xf32>
    %38 = vector.shape_cast %37 : vector<8x8x72xf32> to vector<64x72xf32>
    %cst_28 = arith.constant dense<0.000000e+00> : vector<64x8xf32>
    %39 = tpu.matmul %38, %5, %cst_28 {dimension_numbers = #tpu.dot_dimension_numbers<[1], [0], [0], [1], [0, 0, 1, 1], [], []>} : vector<64x72xf32>, vector<72x8xf32>, vector<64x8xf32> -> vector<64x8xf32>
    %40 = vector.broadcast %6 : vector<1x8xf32> to vector<64x8xf32>
    %41 = arith.addf %39, %40 : vector<64x8xf32>
    %42 = vector.shape_cast %41 : vector<64x8xf32> to vector<8x8x8xf32>
    %c0_29 = arith.constant 0 : index
    %c0_30 = arith.constant 0 : index
    %c0_31 = arith.constant 0 : index
    %c0_32 = arith.constant 0 : index
    %43 = vector.load %arg7[%c0_29, %c0_30, %c0_31, %c0_32] : memref<1x8x8x8xf32, #tpu.memory_space<vmem>>, vector<1x8x8x8xf32>
    %44 = vector.shape_cast %43 : vector<1x8x8x8xf32> to vector<8x8x8xf32>
    %45 = vector.shape_cast %42 : vector<8x8x8xf32> to vector<1x8x8x8xf32>
    tpu.vector_store %arg7[%c0_29, %c0_30, %c0_31, %c0_32], %45 {strides = array<i32>} : memref<1x8x8x8xf32, #tpu.memory_space<vmem>>, vector<1x8x8x8xf32>,
    %cst_33 = arith.constant dense<0.000000e+00> : vector<8xf32>
    %46 = vector.multi_reduction <add>, %41, %cst_33 [0] : vector<64x8xf32> to vector<8xf32>
    %47 = vector.shape_cast %46 : vector<8xf32> to vector<1x8xf32>
    %48 = arith.addf %7, %47 : vector<1x8xf32>
    %49 = arith.mulf %41, %41 : vector<64x8xf32>
    %cst_34 = arith.constant dense<0.000000e+00> : vector<8xf32>
    %50 = vector.multi_reduction <add>, %49, %cst_34 [0] : vector<64x8xf32> to vector<8xf32>
    %51 = vector.shape_cast %50 : vector<8xf32> to vector<1x8xf32>
    %52 = arith.addf %8, %51 : vector<1x8xf32>
    %53 = vector.shape_cast %48 : vector<1x8xf32> to vector<1x1x1x8xf32>
    %54 = vector.shape_cast %53 : vector<1x1x1x8xf32> to vector<1x1x1x8xf32>
    %55 = vector.broadcast %54 : vector<1x1x1x8xf32> to vector<1x1x8x8xf32>
    %c0_35 = arith.constant 0 : index
    %c0_36 = arith.constant 0 : index
    %c0_37 = arith.constant 0 : index
    %c0_38 = arith.constant 0 : index
    %56 = vector.load %arg8[%c0_35, %c0_36, %c0_37, %c0_38] : memref<1x1x8x8xf32, #tpu.memory_space<vmem>>, vector<1x1x8x8xf32>
    tpu.vector_store %arg8[%c0_35, %c0_36, %c0_37, %c0_38], %55 {strides = array<i32>} : memref<1x1x8x8xf32, #tpu.memory_space<vmem>>, vector<1x1x8x8xf32>,
    %57 = vector.shape_cast %52 : vector<1x8xf32> to vector<1x1x1x8xf32>
    %58 = vector.shape_cast %57 : vector<1x1x1x8xf32> to vector<1x1x1x8xf32>
    %59 = vector.broadcast %58 : vector<1x1x1x8xf32> to vector<1x1x8x8xf32>
    %c0_39 = arith.constant 0 : index
    %c0_40 = arith.constant 0 : index
    %c0_41 = arith.constant 0 : index
    %c0_42 = arith.constant 0 : index
    %60 = vector.load %arg9[%c0_39, %c0_40, %c0_41, %c0_42] : memref<1x1x8x8xf32, #tpu.memory_space<vmem>>, vector<1x1x8x8xf32>
    tpu.vector_store %arg9[%c0_39, %c0_40, %c0_41, %c0_42], %59 {strides = array<i32>} : memref<1x1x8x8xf32, #tpu.memory_space<vmem>>, vector<1x1x8x8xf32>,
    return
  }
  func.func @transform_0(%arg0: i32, %arg1: i32) -> (i32, i32, i32, i32) {
    %c0_i32 = arith.constant 0 : i32
    %c0_i32_0 = arith.constant 0 : i32
    %c0_i32_1 = arith.constant 0 : i32
    %c0_i32_2 = arith.constant 0 : i32
    return %arg0, %c0_i32, %c0_i32_0, %c0_i32_1 : i32, i32, i32, i32
  }
  func.func @transform_1(%arg0: i32, %arg1: i32) -> (i32, i32) {
    %c0_i32 = arith.constant 0 : i32
    %c0_i32_0 = arith.constant 0 : i32
    %c0_i32_1 = arith.constant 0 : i32
    return %c0_i32, %c0_i32_0 : i32, i32
  }
  func.func @transform_2(%arg0: i32, %arg1: i32) -> (i32, i32) {
    %c0_i32 = arith.constant 0 : i32
    %c0_i32_0 = arith.constant 0 : i32
    %c0_i32_1 = arith.constant 0 : i32
    return %c0_i32, %c0_i32_0 : i32, i32
  }
  func.func @transform_3(%arg0: i32, %arg1: i32) -> (i32, i32) {
    %c0_i32 = arith.constant 0 : i32
    %c0_i32_0 = arith.constant 0 : i32
    %c0_i32_1 = arith.constant 0 : i32
    return %c0_i32, %c0_i32_0 : i32, i32
  }
  func.func @transform_4(%arg0: i32, %arg1: i32) -> (i32, i32) {
    %c0_i32 = arith.constant 0 : i32
    %c0_i32_0 = arith.constant 0 : i32
    %c0_i32_1 = arith.constant 0 : i32
    return %c0_i32, %c0_i32_0 : i32, i32
  }
  func.func @transform_5(%arg0: i32, %arg1: i32) -> (i32, i32, i32, i32) {
    %c0_i32 = arith.constant 0 : i32
    %c0_i32_0 = arith.constant 0 : i32
    %c0_i32_1 = arith.constant 0 : i32
    return %arg0, %arg1, %c0_i32, %c0_i32_0 : i32, i32, i32, i32
  }
  func.func @transform_6(%arg0: i32, %arg1: i32) -> (i32, i32, i32, i32) {
    %c0_i32 = arith.constant 0 : i32
    %c0_i32_0 = arith.constant 0 : i32
    %c0_i32_1 = arith.constant 0 : i32
    return %arg0, %arg1, %c0_i32, %c0_i32_0 : i32, i32, i32, i32
  }
  func.func @transform_7(%arg0: i32, %arg1: i32) -> (i32, i32, i32, i32) {
    %c0_i32 = arith.constant 0 : i32
    %c0_i32_0 = arith.constant 0 : i32
    %c0_i32_1 = arith.constant 0 : i32
    return %arg0, %arg1, %c0_i32, %c0_i32_0 : i32, i32, i32, i32
  }
}

module attributes {stable_mosaic.version = 11 : i64} {
  func.func @_bn_add_elu_kernel(%arg0: i32, %arg1: i32, %arg2: memref<1x8x64xf32, #tpu.memory_space<vmem>>, %arg3: memref<1x8x64xf32, #tpu.memory_space<vmem>>, %arg4: memref<1x64xf32, #tpu.memory_space<vmem>>, %arg5: memref<1x64xf32, #tpu.memory_space<vmem>>, %arg6: memref<1x8x64xf32, #tpu.memory_space<vmem>>) attributes {dimension_semantics = [#tpu.dimension_semantics<parallel>, #tpu.dimension_semantics<parallel>], iteration_bounds = array<i64: 2, 1>, scalar_prefetch = 0 : i64, scratch_operands = 0 : i64, tpu.core_type = #tpu.core_type<tc>, window_params = [{transform_indices = @transform_0, window_bounds = array<i64: 1, 8, 64>}, {transform_indices = @transform_1, window_bounds = array<i64: 1, 8, 64>}, {pipeline_mode = #tpu.pipeline_mode<synchronous>, transform_indices = @transform_2, window_bounds = array<i64: 1, 64>}, {pipeline_mode = #tpu.pipeline_mode<synchronous>, transform_indices = @transform_3, window_bounds = array<i64: 1, 64>}, {transform_indices = @transform_4, window_bounds = array<i64: 1, 8, 64>}]} {
    %c0 = arith.constant 0 : index
    %c0_0 = arith.constant 0 : index
    %c0_1 = arith.constant 0 : index
    %0 = vector.load %arg2[%c0, %c0_0, %c0_1] : memref<1x8x64xf32, #tpu.memory_space<vmem>>, vector<1x8x64xf32>
    %c0_2 = arith.constant 0 : index
    %c0_3 = arith.constant 0 : index
    %1 = vector.load %arg4[%c0_2, %c0_3] : memref<1x64xf32, #tpu.memory_space<vmem>>, vector<1x64xf32>
    %2 = vector.shape_cast %1 : vector<1x64xf32> to vector<1x1x64xf32>
    %3 = vector.broadcast %2 : vector<1x1x64xf32> to vector<1x8x64xf32>
    %4 = arith.mulf %0, %3 : vector<1x8x64xf32>
    %c0_4 = arith.constant 0 : index
    %c0_5 = arith.constant 0 : index
    %5 = vector.load %arg5[%c0_4, %c0_5] : memref<1x64xf32, #tpu.memory_space<vmem>>, vector<1x64xf32>
    %6 = vector.shape_cast %5 : vector<1x64xf32> to vector<1x1x64xf32>
    %7 = vector.broadcast %6 : vector<1x1x64xf32> to vector<1x8x64xf32>
    %8 = arith.addf %4, %7 : vector<1x8x64xf32>
    %c0_6 = arith.constant 0 : index
    %c0_7 = arith.constant 0 : index
    %c0_8 = arith.constant 0 : index
    %9 = vector.load %arg3[%c0_6, %c0_7, %c0_8] : memref<1x8x64xf32, #tpu.memory_space<vmem>>, vector<1x8x64xf32>
    %10 = arith.addf %8, %9 : vector<1x8x64xf32>
    %cst = arith.constant 0.000000e+00 : f32
    %11 = vector.broadcast %cst : f32 to vector<1x8x64xf32>
    %12 = arith.cmpf ogt, %10, %11 : vector<1x8x64xf32>
    %cst_9 = arith.constant 0.000000e+00 : f32
    %13 = vector.broadcast %cst_9 : f32 to vector<1x8x64xf32>
    %14 = arith.minimumf %10, %13 : vector<1x8x64xf32>
    %15 = math.exp %14 : vector<1x8x64xf32>
    %cst_10 = arith.constant 1.000000e+00 : f32
    %16 = vector.broadcast %cst_10 : f32 to vector<1x8x64xf32>
    %17 = arith.subf %15, %16 : vector<1x8x64xf32>
    %18 = arith.select %12, %10, %17 : vector<1x8x64xi1>, vector<1x8x64xf32>
    %c0_11 = arith.constant 0 : index
    %c0_12 = arith.constant 0 : index
    %c0_13 = arith.constant 0 : index
    %19 = vector.load %arg6[%c0_11, %c0_12, %c0_13] : memref<1x8x64xf32, #tpu.memory_space<vmem>>, vector<1x8x64xf32>
    tpu.vector_store %arg6[%c0_11, %c0_12, %c0_13], %18 {strides = array<i32>} : memref<1x8x64xf32, #tpu.memory_space<vmem>>, vector<1x8x64xf32>,
    return
  }
  func.func @transform_0(%arg0: i32, %arg1: i32) -> (i32, i32, i32) {
    %c0_i32 = arith.constant 0 : i32
    %c0_i32_0 = arith.constant 0 : i32
    return %arg0, %arg1, %c0_i32 : i32, i32, i32
  }
  func.func @transform_1(%arg0: i32, %arg1: i32) -> (i32, i32, i32) {
    %c0_i32 = arith.constant 0 : i32
    %c0_i32_0 = arith.constant 0 : i32
    return %arg0, %arg1, %c0_i32 : i32, i32, i32
  }
  func.func @transform_2(%arg0: i32, %arg1: i32) -> (i32, i32) {
    %c0_i32 = arith.constant 0 : i32
    %c0_i32_0 = arith.constant 0 : i32
    %c0_i32_1 = arith.constant 0 : i32
    return %c0_i32, %c0_i32_0 : i32, i32
  }
  func.func @transform_3(%arg0: i32, %arg1: i32) -> (i32, i32) {
    %c0_i32 = arith.constant 0 : i32
    %c0_i32_0 = arith.constant 0 : i32
    %c0_i32_1 = arith.constant 0 : i32
    return %c0_i32, %c0_i32_0 : i32, i32
  }
  func.func @transform_4(%arg0: i32, %arg1: i32) -> (i32, i32, i32) {
    %c0_i32 = arith.constant 0 : i32
    %c0_i32_0 = arith.constant 0 : i32
    return %arg0, %arg1, %c0_i32 : i32, i32, i32
  }
}

</mosaic_0001>

<bundles_post_ra>
// kernel: tile.13
= control target key start
LH: loop header
LB: loop body
LE: loop exit
PB: predicated region body
PF: predicated region fallthrough
CT: control target
= control target key end

     0   :  { %s22_s0 = inlined_call_operand.vmem [shape: f32[8], index: 0, kind: input, shape index: {}]   ;;  %s23_s1 = inlined_call_operand.vmem [shape: f32[8,8], index: 1, kind: output, shape index: {}]  }
   0x1   :  { %v4_v0 = vld [vmem:[%s22_s0] ss:$0 sm:$0xff] }
   0x2   :  { %5 = vst [vmem:[%s23_s1] sm:$0xff] %v4_v0 }

// kernel: tile.14
= control target key start
LH: loop header
LB: loop body
LE: loop exit
PB: predicated region body
PF: predicated region fallthrough
CT: control target
= control target key end

     0   :  { %s103_s10 = smov 56   ;;  %s104_s11 = smov 40   ;;  %vm4_vm0 = vcmask 64512   ;;  %s157_s0 = inlined_call_operand.vmem [shape: f32[8,8], index: 0, kind: input, shape index: {}]   ;;  %s158_s1 = inlined_call_operand.hbm [shape: f32[1,64], index: 1, kind: output, shape index: {}]  }
   0x1   :  { %v64_v0 = vld [vmem:[%s157_s0 + $0x7] sm:$0x1]   ;;  %v66_v1 = vld [vmem:[%s157_s0 + $0x5] sm:$0x1]   ;;  %v65_v2 = vld [vmem:[%s157_s0 + $0x6] sm:$0x1]  }
   0x2   :  { %8 = vrot.lane.b32.xlu0 %v64_v0, %s103_s10  ;;  %20 = vrot.lane.b32.xlu1 %v66_v1, %s104_s11  ;;  %v67_v3 = vld [vmem:[%s157_s0 + $0x4] sm:$0x1]   ;;  %v3_v4 = vld [vmem:[%s157_s0] sm:$0x1]  }
   0x3   :  { %2 = vsyncpa [#allocation1], 0  ;;  %s105_s18 = smov 48   ;;  %s106_s19 = smov 32   ;;  %5 = vst.msk [vmem:[#allocation2] sm:$0x1] %vm4_vm0, %v3_v4  }
   0x4   :  { %v68_v5 = vld [vmem:[%s157_s0 + $0x3] sm:$0x1]   ;;  %v69_v6 = vld [vmem:[%s157_s0 + $0x2] sm:$0x1]   ;;  %s107_s24 = smov 24   ;;  %s108_s25 = smov 16  }
   0x5   :  { %v70_v7 = vld [vmem:[%s157_s0 + $0x1] sm:$0x1]   ;;  %s109_s0 = smov 8   ;;  %vm10_vm1 = vcmask 523712   ;;  %vm16_vm2 = vcmask 458112   ;;  %vm22_vm3 = vcmask 392512  }
   0x6   :  { %14 = vrot.lane.b32.xlu0 %v65_v2, %s105_s18  ;;  %26 = vrot.lane.b32.xlu1 %v67_v3, %s106_s19  ;;  %vm28_vm4 = vcmask 326912   ;;  %vm34_vm5 = vcmask 261312   ;;  %vm40_vm6 = vcmask 195712   ;;  %vm46_vm7 = vcmask 130112   ;;  %s110_s28 = smov [#allocation0]  }
   0x7   :  { %s58_s29 = sshll.u32 %s110_s28, 4  ;;  %s59_s29 = int_to_ptr.vmem [resolvable:$true] %s58_s29 }
   0x8   :  { %s79_s30 = scalar_lea.vmem %s59_s29, 16  ;;  %s83_s2 = scalar_lea.vmem %s59_s29, 32 }
   0x9   :  { %p80_p0 = scmp.ne.s32.totalorder %s59_s29, %s79_s30  ;;  %p84_p1 = scmp.lt.s32.totalorder %s59_s29, %s59_s29 }
   0xa   :  { %32 = vrot.lane.b32.xlu0 %v68_v5, %s107_s24  ;;  %38 = vrot.lane.b32.xlu1 %v69_v6, %s108_s25  ;;  %p85_p2 = scmp.lt.s32.totalorder %s83_s2, %s79_s30 }
   0xc   :  { %p86_p3 = por %p85_p2, %p84_p1 }
   0xe   :  { %44 = vrot.lane.b32.xlu0 %v70_v7, %s109_s0  ;;  %p87_p4 = pnand %p86_p3, %p80_p0 }
  0x74   :  { %v9_v8 = vpop.permute.xlu0 %8   ;;  %v21_v9 = vpop.permute.xlu1 %20  }
  0x75   :  { %11 = vst.msk [vmem:[#allocation2] sm:$0x1] %vm10_vm1, %v9_v8  }
  0x78   :  { %v15_v10 = vpop.permute.xlu0 %14   ;;  %v27_v11 = vpop.permute.xlu1 %26  }
  0x79   :  { %17 = vst.msk [vmem:[#allocation2] sm:$0x1] %vm16_vm2, %v15_v10  }
  0x7a   :  { %23 = vst.msk [vmem:[#allocation2] sm:$0x1] %vm22_vm3, %v21_v9  }
  0x7b   :  { %29 = vst.msk [vmem:[#allocation2] sm:$0x1] %vm28_vm4, %v27_v11  }
  0x7c   :  { %v33_v12 = vpop.permute.xlu0 %32   ;;  %v39_v13 = vpop.permute.xlu1 %38  }
  0x7d   :  { %35 = vst.msk [vmem:[#allocation2] sm:$0x1] %vm34_vm5, %v33_v12  }
  0x7e   :  { %41 = vst.msk [vmem:[#allocation2] sm:$0x1] %vm40_vm6, %v39_v13  }
  0x80   :  { %v45_v14 = vpop.permute.xlu0 %44  }
  0x81   :  { %47 = vst.msk [vmem:[#allocation2] sm:$0x1] %vm46_vm7, %v45_v14  }
  0x88   :  { %v51_v15 = vld [vmem:[#allocation2] sm:$0x1] }
  0x89   :  { %53 = vst [vmem:[#allocation0] sm:$0x1] %v51_v15 }
  0x8a   :  { %90 = shalt.err (!%p87_p4)
}
  0x8b   :  { %s91_s5 = scalar_lea.hbm %s158_s1, 16 }
  0x8c   :  { %p92_p5 = scmp.ne.s32.totalorder %s158_s1, %s91_s5  ;;  %p95_p6 = scmp.lt.u32.totalorder %s91_s5, %s158_s1 }
  0x8e   :  { %p97_p7 = pnand %p95_p6, %p92_p5 }
  0x90   :  { %100 = shalt.err (!%p97_p7)
}
  0x91   :  { %61 = dma.vmem_to_hbm [thread:$0]  %s59_s29, 16, %s158_s1, [#allocation1]  }
  0x92   :  { %101 = dma.done.wait [#allocation1], 16  }
  0x93   :  { %102 = vsyncadd [#allocation1], 4294967280 }
  0x94   :  { %63 = vsyncpa [#allocation1], 1 }

// kernel: down_transition_forward.7
= control target key start
LH: loop header
LB: loop body
LE: loop exit
PB: predicated region body
PF: predicated region fallthrough
CT: control target
= control target key end

     0   :  { %s1098_s0 = inlined_call_operand.hbm [shape: f32[2,8,64], index: 0, kind: input, shape index: {}]   ;;  %s1099_s1 = inlined_call_operand.hbm [shape: f32[2,8,64], index: 1, kind: input, shape index: {}]   ;;  %s1100_s2 = inlined_call_operand.hbm [shape: f32[1,64], index: 2, kind: input, shape index: {}]   ;;  %s1101_s3 = inlined_call_operand.hbm [shape: f32[1,64], index: 3, kind: input, shape index: {}]   ;;  %s1102_s4 = inlined_call_operand.hbm [shape: f32[2,8,64], index: 4, kind: output, shape index: {}]  }
   0x1   :  { %1108 = sst [smem:[#allocation17_spill]] %s1100_s2 }
   0x2   :  { %1109 = sst [smem:[#allocation18_spill]] %s1101_s3 }
   0x3   :  { %9 = vsyncpa [#allocation3], 0 }
   0x4   :  { %11 = vsyncpa [#allocation3 + $0x1], 0 }
   0x5   :  { %12 = vsyncpa [#allocation6], 0 }
   0x6   :  { %14 = vsyncpa [#allocation6 + $0x1], 0 }
   0x7   :  { %15 = vsyncpa [#allocation9], 0 }
   0x8   :  { %16 = vsyncpa [#allocation4], 0 }
   0x9   :  { %18 = vsyncpa [#allocation4 + $0x1], 0  ;;  %s815_s15 = smov 0   ;;  %s817_s16 = smov 0  }
   0xa   :  { %s819_s17 = smov 0   ;;  %s821_s18 = smov 0  }
   0xb   :  { %s823_s19 = smov 0   ;;  %s825_s20 = smov 0  }
   0xc LB: > { %s846_s21 = sadd.s32 4294967295, %s783_s20   ;;  %s461_s22 = sadd.s32 4294967294, %s783_s20   ;;  %s783_s20 = sphi %s825_s20, %s24_s20   ;;  %s779_s19 = sphi %s823_s19, %s1134_s19   ;;  %s775_s18 = sphi %s821_s18, %s1133_s18   ;;  %s771_s17 = sphi %s819_s17, %s1132_s17   ;;  %s767_s16 = sphi %s817_s16, %s1131_s16   ;;  %s763_s15 = sphi %s815_s15, %s1130_s15  }
   0xd   : > { %p58_p0 = scmp.ne.s32.totalorder %s767_s16, %s763_s15  ;;  %p1103_p1 = scmp.eq.s32.totalorder %s846_s21, 0 }
   0xe   : > { %p160_p3 = scmp.eq.s32.totalorder %s461_s22, 1  ;;  %p462_p5 = scmp.ge.s32.totalorder %s783_s20, 1 }
   0xf   : > { %p855_p4 = por %p1103_p1, %p58_p0  ;;  %p167_p7 = scmp.lt.s32.totalorder %s783_s20, 3 }
  0x10   : > { %p860_p6 = por %p160_p3, %p58_p0  ;;  %s785_s26 = smov [#allocation7]  }
  0x11   : > { %s1110_s23 = scalar_select %p855_p4, 1, 0 }
  0x12   : > { %s1111_s24 = scalar_select %p860_p6, 1, 0 }
  0x13   : > { %p865_p8 = pnand %p462_p5, %p167_p7  ;;  %s180_s27 = sshll.u32 %s785_s26, 4  ;;  %s181_s27 = int_to_ptr.vmem [resolvable:$true] %s180_s27 }
  0x14   : > { %s786_s28 = smov [#allocation8]   ;;  %s1114_s2 = sld [smem:[#allocation17_spill]] }
  0x15   : > { %s1112_s25 = scalar_select %p865_p8, 1, 0 }
  0x16   : > { %p497_p10 = pneg %p865_p8  ;;  %s191_s29 = sshll.u32 %s786_s28, 4  ;;  %s878_s29 = int_to_ptr.vmem [resolvable:$true] %s191_s29 }
  0x18   : > { %p874_p11 = pnand %p497_p10, %p1103_p1 }
  0x1a   : > { %s573_s7 = scalar_lea.hbm %s1114_s2, 16  ;;  %p575_p13 = pneg %p874_p11 }
  0x1b   : > { %p574_p12 = scmp.ne.s32.totalorder %s1114_s2, %s573_s7  ;;  %p580_p5 = scmp.lt.u32.totalorder %s573_s7, %s1114_s2 }
  0x1d   : > { %p576_p0 = pnand %p575_p13, %p574_p12 }
  0x1f   : > { %p577_p3 = pneg %p576_p0 }
  0x21   : > { %p582_p7 = pnand %p580_p5, %p577_p3 }
  0x23   : > { %585 = shalt.err (!%p582_p7)
}
  0x24   : > { %s586_s12 = scalar_lea.vmem %s181_s27, 16  ;;  %s593_s13 = scalar_lea.vmem %s181_s27, 32 }
  0x25   : > { %p587_p10 = scmp.ne.s32.totalorder %s181_s27, %s586_s12  ;;  %p594_p2 = scmp.lt.s32.totalorder %s181_s27, %s181_s27 }
  0x26   : > { %p595_p6 = scmp.lt.s32.totalorder %s593_s13, %s586_s12 }
  0x27   : > { %p589_p9 = pnand %p587_p10, %p575_p13 }
  0x28   : > { %p596_p4 = por %p595_p6, %p594_p2 }
  0x29   : > { %p590_p1 = pneg %p589_p9 }
  0x2b   : > { %p597_p8 = pnand %p596_p4, %p590_p1 }
  0x2d   : > { %600 = shalt.err (!%p597_p8)
}
  0x2e   : > { %500 = dma.hbm_to_vmem [thread:$0]  (!%p874_p11), %s1114_s2, 16, %s181_s27, [#allocation6]  }
  0x2f   : > { %s1115_s3 = sld [smem:[#allocation18_spill]] }
  0x35   : > { %s601_s5 = scalar_lea.hbm %s1115_s3, 16 }
  0x36   : > { %p602_p9 = scmp.ne.s32.totalorder %s1115_s3, %s601_s5  ;;  %p608_p4 = scmp.lt.u32.totalorder %s601_s5, %s1115_s3 }
  0x38   : > { %p604_p2 = pnand %p602_p9, %p575_p13 }
  0x3a   : > { %p605_p1 = pneg %p604_p2 }
  0x3c   : > { %p610_p6 = pnand %p608_p4, %p605_p1 }
  0x3e   : > { %613 = shalt.err (!%p610_p6)
}
  0x3f   : > { %s614_s27 = scalar_lea.vmem %s878_s29, 16  ;;  %s621_s10 = scalar_lea.vmem %s878_s29, 32 }
  0x40   : > { %p615_p8 = scmp.ne.s32.totalorder %s878_s29, %s614_s27  ;;  %p622_p3 = scmp.lt.s32.totalorder %s878_s29, %s878_s29 }
  0x41   : > { %p623_p5 = scmp.lt.s32.totalorder %s621_s10, %s614_s27 }
  0x42   : > { %p617_p12 = pnand %p615_p8, %p575_p13 }
  0x43   : > { %p624_p7 = por %p623_p5, %p622_p3 }
  0x44   : > { %p618_p0 = pneg %p617_p12 }
  0x46   : > { %p625_p10 = pnand %p624_p7, %p618_p0 }
  0x48   : > { %628 = shalt.err (!%p625_p10)
}
  0x49   : > { %503 = dma.hbm_to_vmem [thread:$0]  (!%p874_p11), %s1115_s3, 16, %s878_s29, [#allocation9]  }
  0x4a   : > { %s36_s13 = sadd.s32 1, %s779_s19  ;;  %s45_s14 = sadd.s32 1, %s771_s17 }
  0x4b   : > { %p38_p13 = scmp.ge.s32.totalorder %s36_s13, 2  ;;  %p52_p9 = scmp.ne.s32.totalorder %s771_s17, %s767_s16 }
  0x4c   : > { %p53_p2 = scmp.eq.s32.totalorder %s783_s20, 0  ;;  %p517_p1 = scmp.lt.s32.totalorder %s783_s20, 2 }
  0x4d   : > { %s1136_s13 = smov (%p38_p13, %s36_s13), 0  ;;  %p1117_p6 = scmp.eq.s32.totalorder %s846_s21, 1 }
  0x4e   : > { %1116 = sst [smem:[#allocation16_spill]] %s1136_s13  ;;  %p54_p4 = por %p53_p2, %p52_p9 }
  0x4f   : > { %p938_p8 = por %p1117_p6, %p52_p9  ;;  %s40_s22 = ssub.s32 %s779_s19, %s1136_s13 }
  0x50   : > { %s202_s26 = sand.u32 1, %s771_s17   ;;  %p43_p12 = scmp.eq.s32.totalorder %s40_s22, 0 }
  0x51   : > { %s1118_s30 = scalar_select %p938_p8, 1, 0 }
  0x52   : > { %s945_s29 = sshll.u32 %s202_s26, 3  ;;  %s467_s28 = sshll.u32 %s779_s19, 7 }
  0x53   : > { %s949_s5 = scalar_select %p43_p12, %s771_s17, %s45_s14  }
  0x54   : > { %s954_s8 = scalar_lea.hbm %s1098_s0, %s467_s28  ;;  %s206_s9 = scalar_lea.vmem [#allocation2], %s945_s29 }
  0x55   : > { %s214_s27 = sshll.u32 %s206_s9, 4  ;;  %p959_p11 = pnand %p517_p1, %p54_p4  ;;  %s963_s27 = int_to_ptr.vmem [resolvable:$true] %s214_s27 }
  0x56   : > { %s968_s14 = scalar_lea.hbm %s1099_s1, %s467_s28  ;;  %s203_s22 = scalar_lea.sflag [#allocation3], %s202_s26 }
  0x57   : > { %s629_s6 = scalar_lea.hbm %s954_s8, 128  ;;  %p631_p3 = pneg %p959_p11 }
  0x58   : > { %p630_p0 = scmp.ne.s32.totalorder %s954_s8, %s629_s6  ;;  %s634_s2 = scalar_lea.hbm %s1098_s0, 256 }
  0x59   : > { %p635_p10 = scmp.lt.u32.totalorder %s954_s8, %s1098_s0  ;;  %p636_p13 = scmp.lt.u32.totalorder %s634_s2, %s629_s6 }
  0x5a   : > { %p632_p5 = pnand %p631_p3, %p630_p0  ;;  %p638_p2 = scmp.lt.u32.totalorder %s629_s6, %s954_s8 }
  0x5b   : > { %p637_p9 = por %p636_p13, %p635_p10 }
  0x5c   : > { %p633_p7 = pneg %p632_p5 }
  0x5d   : > { %p639_p1 = por %p638_p2, %p637_p9 }
  0x5f   : > { %p640_p4 = pnand %p639_p1, %p633_p7 }
  0x61   : > { %643 = shalt.err (!%p640_p4)
}
  0x62   : > { %s644_s26 = scalar_lea.vmem %s963_s27, 128  ;;  %s787_s28 = smov [#allocation2]  }
  0x63   : > { %p645_p6 = scmp.ne.s32.totalorder %s963_s27, %s644_s26  ;;  %s649_s11 = sshll.u32 %s787_s28, 4  ;;  %s650_s11 = int_to_ptr.vmem [resolvable:$false] %s649_s11 }
  0x64   : > { %s651_s3 = scalar_lea.vmem %s650_s11, 256  ;;  %p652_p5 = scmp.lt.s32.totalorder %s963_s27, %s650_s11 }
  0x65   : > { %p647_p12 = pnand %p645_p6, %p631_p3  ;;  %p653_p10 = scmp.lt.s32.totalorder %s651_s3, %s644_s26 }
  0x67   : > { %p648_p0 = pneg %p647_p12  ;;  %p654_p13 = por %p653_p10, %p652_p5 }
  0x69   : > { %p655_p9 = pnand %p654_p13, %p648_p0 }
  0x6b   : > { %658 = shalt.err (!%p655_p9)
}
  0x6c   : > { %507 = dma.hbm_to_vmem [thread:$0]  (!%p959_p11), %s954_s8, 128, %s963_s27, %s203_s22  }
  0x6d   : > { %s221_s2 = sand.u32 1, %s783_s20   ;;  %s225_s13 = scalar_lea.vmem [#allocation5], %s945_s29 }
  0x6e   : > { %s233_s12 = sshll.u32 %s225_s13, 4  ;;  %s222_s6 = scalar_lea.sflag [#allocation6], %s221_s2  ;;  %s234_s12 = int_to_ptr.vmem [resolvable:$true] %s233_s12 }
  0x6f   : > { %s659_s7 = scalar_lea.hbm %s968_s14, 128  ;;  %s664_s28 = scalar_lea.hbm %s1099_s1, 256 }
  0x70   : > { %p660_p7 = scmp.ne.s32.totalorder %s968_s14, %s659_s7  ;;  %p665_p4 = scmp.lt.u32.totalorder %s968_s14, %s1099_s1 }
  0x71   : > { %p666_p6 = scmp.lt.u32.totalorder %s664_s28, %s659_s7  ;;  %p668_p0 = scmp.lt.u32.totalorder %s659_s7, %s968_s14 }
  0x72   : > { %p662_p2 = pnand %p660_p7, %p631_p3 }
  0x73   : > { %p667_p12 = por %p666_p6, %p665_p4 }
  0x74   : > { %p663_p1 = pneg %p662_p2 }
  0x75   : > { %p669_p5 = por %p668_p0, %p667_p12 }
  0x77   : > { %p670_p10 = pnand %p669_p5, %p663_p1 }
  0x79   : > { %673 = shalt.err (!%p670_p10)
}
  0x7a   : > { %s674_s29 = scalar_lea.vmem %s234_s12, 128  ;;  %s788_s8 = smov [#allocation5]  }
  0x7b   : > { %p675_p13 = scmp.ne.s32.totalorder %s234_s12, %s674_s29  ;;  %s679_s27 = sshll.u32 %s788_s8, 4  ;;  %s680_s27 = int_to_ptr.vmem [resolvable:$false] %s679_s27 }
  0x7c   : > { %s681_s22 = scalar_lea.vmem %s680_s27, 256  ;;  %p682_p2 = scmp.lt.s32.totalorder %s234_s12, %s680_s27 }
  0x7d   : > { %p677_p9 = pnand %p675_p13, %p631_p3  ;;  %p683_p8 = scmp.lt.s32.totalorder %s681_s22, %s674_s29 }
  0x7f   : > { %p678_p7 = pneg %p677_p9  ;;  %p684_p4 = por %p683_p8, %p682_p2 }
  0x81   : > { %p685_p6 = pnand %p684_p4, %p678_p7 }
  0x83   : > { %688 = shalt.err (!%p685_p6)
}
  0x84   : > { %510 = dma.hbm_to_vmem [thread:$0]  (!%p959_p11), %s968_s14, 128, %s234_s12, %s222_s6  }
  0x85   : > { %p1120_p1 = scmp.ne.s32.totalorder %s1112_s25, 0 }
  0x86   : > { %s1019_s2 = sand.u32 (!%p1120_p1), 1, %s767_s16   ;;  %p1121_p8 = scmp.ne.s32.totalorder (!%p1120_p1), %s1110_s23, 0 }
  0x87   : > { %242 = sbr.rel (%p1120_p1) target bundleno = 193 (0xc1), region = 36  ;;  %s1022_s13 = sshll.u32 (!%p1120_p1), %s1019_s2, 3 }
  0x88   : > { %s245_s7 = scalar_lea.sflag (!%p1120_p1), [#allocation3], %s1019_s2  ;;  %s248_s9 = scalar_lea.vmem (!%p1120_p1), [#allocation2], %s1022_s13 }
  0x8e   : > { %742 = dma.done.wait (%p1121_p8), %s245_s7, 128  }
  0x8f   : > { %744 = vsyncadd (%p1121_p8), %s245_s7, 4294967168  ;;  %s253_s25 = sand.u32 1, %s846_s21   ;;  %s257_s14 = scalar_lea.vmem [#allocation5], %s1022_s13 }
  0x90   : > { %s254_s10 = scalar_lea.sflag [#allocation6], %s253_s25 }
  0x91   : > { %746 = dma.done.wait (%p1121_p8), %s254_s10, 128  }
  0x92   : > { %748 = vsyncadd (%p1121_p8), %s254_s10, 4294967168  ;;  %p1122_p11 = scmp.eq.s32.totalorder %s846_s21, 0 }
  0x94   : > { %750 = dma.done.wait (%p1122_p11), [#allocation6], 16   ;;  %p1123_p3 = pmov %p1122_p11 }
  0x96   : > { %752 = vsyncadd (%p1123_p3), [#allocation6], 4294967280  ;;  %p1124_p12 = pmov %p1123_p3 }
  0x97   : > { %p1125_p0 = pmov %p1123_p3 }
  0x98   : > { %754 = dma.done.wait (%p1124_p12), [#allocation9], 16  }
  0x99   : > { %756 = vsyncadd (%p1125_p0), [#allocation9], 4294967280  ;;  %v295_v0 = vld [vmem:[%s248_s9] sm:$0xff]  ;;  %v312_v4 = vld [vmem:[%s257_s14] sm:$0xff]  ;;  %s294_s23 = scalar_lea.vmem [#allocation10], %s1022_s13  ;;  %s480_s6 = sshll.u32 %s775_s18, 7 }
  0x9a   : > { %v476_v1 = vld [vmem:[#allocation7] ss:$0 sm:$0xff]  ;;  %v477_v2 = vld [vmem:[#allocation8] ss:$0 sm:$0xff]  ;;  %s337_s12 = sshll.u32 %s294_s23, 4  ;;  %vm320_vm1 = vcmask 523264   ;;  %s1051_s28 = scalar_lea.hbm %s1102_s4, %s480_s6  ;;  %s1046_s12 = int_to_ptr.vmem [resolvable:$true] %s337_s12 }
  0x9b   : > { %v303_v3 = vmul.f32 %v476_v1, %v295_v0  ;;  %s323_s11 = scalar_lea.sflag [#allocation4], %s1019_s2  ;;  %s689_s3 = scalar_lea.vmem %s1046_s12, 128 }
  0x9c   : > { %p690_p5 = scmp.ne.s32.totalorder %s1046_s12, %s689_s3  ;;  %p1126_p10 = scmp.ne.s32.totalorder %s1118_s30, 0 }
  0x9d   : > { %v311_v5 = vadd.f32 %v477_v2, %v303_v3  ;;  %s789_s18 = smov [#allocation10]  }
  0x9e   : > { %p691_p13 = pnand %p690_p5, %p1126_p10  ;;  %s693_s29 = sshll.u32 %s789_s18, 4  ;;  %s694_s29 = int_to_ptr.vmem [resolvable:$false] %s693_s29 }
  0x9f   : > { %v313_v6 = vadd.f32 %v312_v4, %v311_v5  ;;  %s695_s8 = scalar_lea.vmem %s694_s29, 256  ;;  %p696_p7 = scmp.lt.s32.totalorder %s1046_s12, %s694_s29 }
  0xa0   : > { %p692_p9 = pneg %p691_p13  ;;  %p697_p2 = scmp.lt.s32.totalorder %s695_s8, %s689_s3 }
  0xa1   : > { %v315_v7 = vmin.f32 %v313_v6, 0.0  ;;  %vm314_vm0 = vcmp.gt.f32.partialorder %v313_v6, 0.0 }
  0xa2   : > { %p698_p4 = por %p697_p2, %p696_p7 }
  0xa3   : > { %v316_v8 = vmul.f32 1.442695, %v315_v7 }
  0xa4   : > { %p699_p6 = pnand %p698_p4, %p692_p9 }
  0xa5   : > { %571 = vpow2.f32 %v316_v8 }
  0xaf   : > { %v572_v9 = vpop.eup %571 }
  0xb0   : > { %v478_v10 = vadd.f32 -1.0, %v572_v9 }
  0xb2   : > { %v319_v11 = vsel %vm314_vm0, %v313_v6, %v478_v10 }
  0xb3   : > { %321 = vst.msk [vmem:[%s294_s23] sm:$0xff] %vm320_vm1, %v319_v11 }
  0xb4   : > { %702 = shalt.err (!%p699_p6)
}
  0xb5   : > { %s703_s27 = scalar_lea.hbm %s1051_s28, 128  ;;  %s707_s13 = scalar_lea.hbm %s1102_s4, 256 }
  0xb6   : > { %p704_p1 = scmp.ne.s32.totalorder %s1051_s28, %s703_s27  ;;  %p708_p3 = scmp.lt.u32.totalorder %s1051_s28, %s1102_s4 }
  0xb7   : > { %p709_p12 = scmp.lt.u32.totalorder %s707_s13, %s703_s27  ;;  %p711_p5 = scmp.lt.u32.totalorder %s703_s27, %s1051_s28 }
  0xb8   : > { %p705_p8 = pnand %p704_p1, %p1126_p10 }
  0xb9   : > { %p710_p0 = por %p709_p12, %p708_p3 }
  0xba   : > { %p706_p11 = pneg %p705_p8 }
  0xbb   : > { %p712_p13 = por %p711_p5, %p710_p0 }
  0xbd   : > { %p713_p9 = pnand %p712_p13, %p706_p11 }
  0xbf   : > { %716 = shalt.err (!%p713_p9)
}
  0xc0   : > { %495 = dma.vmem_to_hbm [thread:$0]  (%p1126_p10), %s1046_s12, 128, %s1051_s28, %s323_s11  }
  0xc1 PF: > { %s349_s25 = sand.u32 1, %s763_s15   ;;  %p1127_p7 = scmp.ne.s32.totalorder %s1111_s24, 0 }
  0xc2   : > { %p1128_p2 = scmp.ge.s32.totalorder %s783_s20, 2  ;;  %s350_s10 = scalar_lea.sflag [#allocation4], %s349_s25 }
  0xc4   : > { %p512_p4 = pnand %p1128_p2, %p1127_p7 }
  0xc6   : > { %758 = dma.done.wait (!%p512_p4), %s350_s10, 128  }
  0xc7   : > { %760 = vsyncadd (!%p512_p4), %s350_s10, 4294967168  ;;  %s24_s20 = sadd.s32 1, %s783_s20   ;;  %s1129_s30 = sld [smem:[#allocation16_spill]] }
  0xc8   : > { %p21_p6 = scmp.ge.s32.totalorder %s24_s20, 4   ;;  %s1130_s15 = smov %s767_s16 }
  0xc9   : > { %s1131_s16 = smov %s771_s17  ;;  %s1132_s17 = smov %s949_s5 }
  0xca   : > { %s1133_s18 = smov %s779_s19  ;;  %23 = sbr.rel (!%p21_p6) target bundleno = 12 (0xc), region = 102 }
  0xcd   : > { %s1134_s19 = smov %s1129_s30 }
  0xd1   :  { %355 = vsyncpa [#allocation3], 1 }
  0xd2   :  { %357 = vsyncpa [#allocation3 + $0x1], 1 }
  0xd3   :  { %358 = vsyncpa [#allocation6], 1 }
  0xd4   :  { %360 = vsyncpa [#allocation6 + $0x1], 1 }
  0xd5   :  { %361 = vsyncpa [#allocation9], 1 }
  0xd6   :  { %362 = vsyncpa [#allocation4], 1 }
  0xd7   :  { %364 = vsyncpa [#allocation4 + $0x1], 1 }

// kernel: down_transition_forward.4
= control target key start
LH: loop header
LB: loop body
LE: loop exit
PB: predicated region body
PF: predicated region fallthrough
CT: control target
= control target key end

     0   :  { %11 = vsyncpa [#allocation3], 0  ;;  %s2287_s0 = inlined_call_operand.hbm [shape: f32[2,36,9,4], index: 0, kind: input, shape index: {}]   ;;  %s2288_s1 = inlined_call_operand.hbm [shape: f32[36,8], index: 1, kind: input, shape index: {}]   ;;  %s2289_s2 = inlined_call_operand.hbm [shape: f32[1,8], index: 2, kind: input, shape index: {}]   ;;  %s2290_s3 = inlined_call_operand.hbm [shape: f32[2,8,8,8], index: 3, kind: output, shape index: {0}]   ;;  %s2291_s4 = inlined_call_operand.hbm [shape: f32[2,1,8,8], index: 4, kind: output, shape index: {1}]   ;;  %s2292_s5 = inlined_call_operand.hbm [shape: f32[2,1,8,8], index: 5, kind: output, shape index: {2}]  }
   0x1   :  { %13 = vsyncpa [#allocation3 + $0x1], 0 }
   0x2   :  { %14 = vsyncpa [#allocation6], 0 }
   0x3   :  { %15 = vsyncpa [#allocation4], 0 }
   0x4   :  { %17 = vsyncpa [#allocation4 + $0x1], 0 }
   0x5   :  { %18 = vsyncpa [#allocation10], 0 }
   0x6   :  { %20 = vsyncpa [#allocation10 + $0x1], 0  ;;  %s1701_s18 = smov 0   ;;  %s1703_s19 = smov 0  }
   0x7   :  { %s1705_s20 = smov 0   ;;  %s1707_s21 = smov 0  }
   0x8   :  { %s1709_s22 = smov 0   ;;  %s1711_s23 = smov 0  }
   0x9 LB: > { %s1732_s24 = sadd.s32 4294967295, %s1652_s23   ;;  %s2294_s25 = sadd.s32 4294967294, %s1652_s23   ;;  %s1652_s23 = sphi %s1711_s23, %s26_s23   ;;  %s1648_s22 = sphi %s1709_s22, %s2319_s22   ;;  %s1644_s21 = sphi %s1707_s21, %s2318_s21   ;;  %s1640_s20 = sphi %s1705_s20, %s2317_s20   ;;  %s1636_s19 = sphi %s1703_s19, %s2316_s19   ;;  %s1632_s18 = sphi %s1701_s18, %s2315_s18  }
   0xa   : > { %p58_p0 = scmp.ne.s32.totalorder %s1636_s19, %s1632_s18  ;;  %p2293_p1 = scmp.eq.s32.totalorder %s1732_s24, 0 }
   0xb   : > { %p132_p3 = scmp.eq.s32.totalorder %s2294_s25, 1  ;;  %p1177_p5 = scmp.ge.s32.totalorder %s1652_s23, 1 }
   0xc   : > { %p1743_p4 = por %p2293_p1, %p58_p0  ;;  %p195_p7 = scmp.lt.s32.totalorder %s1652_s23, 3 }
   0xd   : > { %p1748_p6 = por %p132_p3, %p58_p0  ;;  %s1654_s29 = smov [#allocation5]  }
   0xe   : > { %s2299_s26 = scalar_select %p1743_p4, 1, 0 }
   0xf   : > { %s2300_s27 = scalar_select %p1748_p6, 1, 0 }
  0x10   : > { %p1753_p8 = pnand %p1177_p5, %p195_p7  ;;  %s207_s30 = sshll.u32 %s1654_s29, 4  ;;  %s1757_s30 = int_to_ptr.vmem [resolvable:$true] %s207_s30 }
  0x11   : > { %s1655_s7 = smov [#allocation7]   ;;  %s1420_s11 = scalar_lea.hbm %s2288_s1, 640 }
  0x12   : > { %p1332_p9 = pneg %p1753_p8  ;;  %s221_s8 = sshll.u32 %s1655_s7, 4  ;;  %s1768_s8 = int_to_ptr.vmem [resolvable:$true] %s221_s8 }
  0x13   : > { %p1421_p12 = scmp.ne.s32.totalorder %s2288_s1, %s1420_s11  ;;  %p1427_p5 = scmp.lt.u32.totalorder %s1420_s11, %s2288_s1 }
  0x14   : > { %p1764_p11 = pnand %p1332_p9, %p2293_p1 }
  0x16   : > { %p1422_p13 = pneg %p1764_p11 }
  0x18   : > { %p1423_p0 = pnand %p1422_p13, %p1421_p12 }
  0x1a   : > { %p1424_p3 = pneg %p1423_p0 }
  0x1c   : > { %p1429_p7 = pnand %p1427_p5, %p1424_p3 }
  0x1e   : > { %1432 = shalt.err (!%p1429_p7)
}
  0x1f   : > { %s1433_s16 = scalar_lea.vmem %s1757_s30, 640  ;;  %p1441_p2 = scmp.lt.s32.totalorder %s1757_s30, %s1757_s30 }
  0x20   : > { %p1434_p9 = scmp.ne.s32.totalorder %s1757_s30, %s1433_s16  ;;  %p1442_p12 = scmp.lt.s32.totalorder %s1433_s16, %s1433_s16 }
  0x22   : > { %p1436_p10 = pnand %p1434_p9, %p1422_p13  ;;  %p1443_p0 = por %p1442_p12, %p1441_p2 }
  0x24   : > { %p1437_p1 = pneg %p1436_p10 }
  0x26   : > { %p1444_p6 = pnand %p1443_p0, %p1437_p1 }
  0x28   : > { %1447 = shalt.err (!%p1444_p6)
}
  0x29   : > { %s2295_s17 = smov 128   ;;  %s2296_s29 = smov 8  }
  0x2a   : > { %1335 = dma.hbm_to_vmem [thread:$0]  (!%p1764_p11), %s2288_s1, 640, %s1757_s30, [#allocation6], %s2295_s17, %s2295_s17, %s2296_s29  }
  0x2b   : > { %s1448_s12 = scalar_lea.hbm %s2289_s2, 16 }
  0x2c   : > { %p1449_p1 = scmp.ne.s32.totalorder %s2289_s2, %s1448_s12  ;;  %p1455_p10 = scmp.lt.u32.totalorder %s1448_s12, %s2289_s2 }
  0x2e   : > { %p1451_p2 = pnand %p1449_p1, %p1422_p13 }
  0x30   : > { %p1452_p6 = pneg %p1451_p2 }
  0x32   : > { %p1457_p3 = pnand %p1455_p10, %p1452_p6 }
  0x34   : > { %1460 = shalt.err (!%p1457_p3)
}
  0x35   : > { %s1461_s30 = scalar_lea.vmem %s1768_s8, 16  ;;  %s1468_s7 = scalar_lea.vmem %s1768_s8, 32 }
  0x36   : > { %p1462_p5 = scmp.ne.s32.totalorder %s1768_s8, %s1461_s30  ;;  %p1469_p12 = scmp.lt.s32.totalorder %s1768_s8, %s1768_s8 }
  0x37   : > { %p1470_p0 = scmp.lt.s32.totalorder %s1468_s7, %s1461_s30 }
  0x38   : > { %p1464_p7 = pnand %p1462_p5, %p1422_p13 }
  0x39   : > { %p1471_p1 = por %p1470_p0, %p1469_p12 }
  0x3a   : > { %p1465_p9 = pneg %p1464_p7 }
  0x3c   : > { %p1472_p2 = pnand %p1471_p1, %p1465_p9 }
  0x3e   : > { %1475 = shalt.err (!%p1472_p2)
}
  0x3f   : > { %1338 = dma.hbm_to_vmem [thread:$0]  (!%p1764_p11), %s2289_s2, 16, %s1768_s8, [#allocation6]  }
  0x40   : > { %s38_s11 = sadd.s32 1, %s1648_s22  ;;  %s45_s12 = sadd.s32 1, %s1640_s20 }
  0x41   : > { %p40_p13 = scmp.ge.s32.totalorder %s38_s11, 2  ;;  %p52_p6 = scmp.ne.s32.totalorder %s1640_s20, %s1636_s19 }
  0x42   : > { %p53_p10 = scmp.eq.s32.totalorder %s1652_s23, 0  ;;  %p1355_p3 = scmp.lt.s32.totalorder %s1652_s23, 2 }
  0x43   : > { %s2321_s11 = smov (%p40_p13, %s38_s11), 0  ;;  %p2303_p7 = scmp.eq.s32.totalorder %s1732_s24, 1 }
  0x44   : > { %p54_p5 = por %p53_p10, %p52_p6  ;;  %s42_s13 = ssub.s32 %s1648_s22, %s2321_s11 }
  0x45   : > { %p1836_p9 = por %p2303_p7, %p52_p6  ;;  %s232_s14 = sand.u32 1, %s1640_s20  }
  0x46   : > { %p43_p12 = scmp.eq.s32.totalorder %s42_s13, 0  ;;  %s1313_s8 = smul.u32 576, %s232_s14 }
  0x47   : > { %s2304_s6 = scalar_select %p1836_p9, 1, 0 }
  0x48   : > { %p1843_p11 = pnand %p1355_p3, %p54_p5  ;;  %s1314_s30 = smul.u32 9216, %s1648_s22 }
  0x49   : > { %s1848_s16 = scalar_select %p43_p12, %s1640_s20, %s45_s12  }
  0x4a   : > { %s236_s7 = scalar_lea.vmem [#allocation2], %s1313_s8  ;;  %s1854_s17 = scalar_lea.hbm %s2287_s0, %s1314_s30 }
  0x4b   : > { %s243_s9 = sshll.u32 %s236_s7, 4  ;;  %s1858_s13 = scalar_lea.sflag [#allocation3], %s232_s14  ;;  %s1856_s9 = int_to_ptr.vmem [resolvable:$true] %s243_s9 }
  0x4c   : > { %s1476_s29 = scalar_lea.hbm %s1854_s17, 9216  ;;  %p1478_p1 = pneg %p1843_p11 }
  0x4d   : > { %p1477_p0 = scmp.ne.s32.totalorder %s1854_s17, %s1476_s29  ;;  %s1481_s8 = scalar_lea.hbm %s2287_s0, 18432 }
  0x4e   : > { %p1482_p6 = scmp.lt.u32.totalorder %s1854_s17, %s2287_s0  ;;  %p1483_p10 = scmp.lt.u32.totalorder %s1481_s8, %s1476_s29 }
  0x4f   : > { %p1479_p2 = pnand %p1478_p1, %p1477_p0  ;;  %p1485_p5 = scmp.lt.u32.totalorder %s1476_s29, %s1854_s17 }
  0x50   : > { %p1484_p3 = por %p1483_p10, %p1482_p6 }
  0x51   : > { %p1480_p13 = pneg %p1479_p2 }
  0x52   : > { %p1486_p7 = por %p1485_p5, %p1484_p3 }
  0x54   : > { %p1487_p12 = pnand %p1486_p7, %p1480_p13 }
  0x56   : > { %1490 = shalt.err (!%p1487_p12)
}
  0x57   : > { %s1491_s14 = scalar_lea.vmem %s1856_s9, 9216  ;;  %s1658_s10 = smov [#allocation2]  }
  0x58   : > { %p1492_p0 = scmp.ne.s32.totalorder %s1856_s9, %s1491_s14  ;;  %s1496_s12 = sshll.u32 %s1658_s10, 4  ;;  %s1497_s12 = int_to_ptr.vmem [resolvable:$false] %s1496_s12 }
  0x59   : > { %s1498_s25 = scalar_lea.vmem %s1497_s12, 18432  ;;  %p1499_p4 = scmp.lt.s32.totalorder %s1856_s9, %s1497_s12 }
  0x5a   : > { %p1494_p2 = pnand %p1492_p0, %p1478_p1  ;;  %p1500_p6 = scmp.lt.s32.totalorder %s1498_s25, %s1491_s14 }
  0x5c   : > { %p1495_p9 = pneg %p1494_p2  ;;  %p1501_p10 = por %p1500_p6, %p1499_p4 }
  0x5e   : > { %p1502_p3 = pnand %p1501_p10, %p1495_p9 }
  0x60   : > { %1505 = shalt.err (!%p1502_p3)
}
  0x61   : > { %s2306_s29 = smov 8   ;;  %s2307_s8 = smov 128  }
  0x62   : > { %1342 = dma.hbm_to_vmem [thread:$0]  (!%p1843_p11), %s1854_s17, 9216, %s1856_s9, %s1858_s13, %s2307_s8, %s2307_s8, %s2306_s29  }
  0x63   : > { %255 = sbr.rel (%p1753_p8) target bundleno = 632 (0x278), region = 32  ;;  %s1892_s30 = sand.u32 (!%p1753_p8), 1, %s1636_s19  }
  0x64   : > { %s1315_s7 = smul.u32 (!%p1753_p8), 576, %s1892_s30  ;;  %s258_s14 = scalar_lea.sflag (!%p1753_p8), [#allocation3], %s1892_s30 }
  0x65   : > { %p2308_p4 = scmp.ne.s32.totalorder (!%p1753_p8), %s2299_s26, 0 }
  0x66   : > { %s1896_s10 = scalar_lea.vmem (!%p1753_p8), [#allocation2], %s1315_s7 }
  0x6a   : > { %1615 = dma.done.wait (%p2308_p4), %s258_s14, 9216  }
  0x6b   : > { %1617 = vsyncadd (%p2308_p4), %s258_s14, 4294958080  ;;  %p2309_p9 = scmp.eq.s32.totalorder %s1732_s24, 0 }
  0x6d   : > { %1619 = dma.done.wait (%p2309_p9), [#allocation6], 656   ;;  %p2310_p8 = pmov %p2309_p9 }
  0x6e   : > { %v335_v0 = vld [vmem:[%s1896_s10 + $0x1] sm:$0xff]  ;;  %v1188_v1 = vld [vmem:[%s1896_s10 + $0x90] sm:$0xff]  ;;  %s1659_s28 = smov 8   ;;  %s1660_s26 = smov 4   ;;  %v311_v20 = vld [vmem:[#allocation5 + $0x18] sm:$0xff]  ;;  %vm762_vm0 = vcmask 1043456  }
  0x6f   : > { %1621 = vsyncadd (%p2310_p8), [#allocation6], 4294966640  ;;  %443 = vrot.lane.b32.xlu1 %v335_v0, %s1659_s28  ;;  %411 = vrot.lane.b32.xlu0 %v1188_v1, %s1660_s26  ;;  %v336_v2 = vld [vmem:[%s1896_s10 + $0x11] sm:$0xff]  ;;  %v1189_v3 = vld [vmem:[%s1896_s10 + $0xa0] sm:$0xff]  ;;  %s1661_s17 = smov 12   ;;  %s1662_s15 = smov 16  }
  0x70   : > { %v1197_v4 = vld [vmem:[%s1896_s10 + $0x130] sm:$0xff]  ;;  %v1196_v5 = vld [vmem:[%s1896_s10 + $0x120] sm:$0xff]  ;;  %s1663_s9 = smov 20   ;;  %v309_v15 = vld [vmem:[#allocation5 + $0x8] sm:$0xff]  ;;  %s1664_s13 = smov 24   ;;  %vm659_vm1 = vcmask 31744  }
  0x71   : > { %v1190_v6 = vld [vmem:[%s1896_s10 + $0xb0] sm:$0xff]  ;;  %v1212_v8 = vld [vmem:[%s1896_s10 + $0x121] sm:$0xff]  ;;  %s1665_s12 = smov 28   ;;  %s1666_s25 = smov 32   ;;  %vm668_vm2 = vcmask 64512   ;;  %vm677_vm3 = vcmask 97280  }
  0x72   : > { %v1204_v7 = vld [vmem:[%s1896_s10 + $0x1b0] sm:$0xff]  ;;  %v1205_v9 = vld [vmem:[%s1896_s10 + $0x1c0] sm:$0xff]  ;;  %vm686_vm4 = vcmask 130048   ;;  %vm695_vm5 = vcmask 162816   ;;  %vm704_vm6 = vcmask 195584   ;;  %vm713_vm7 = vcmask 228352  }
  0x73   : > { %445 = vrot.lane.b32.xlu1 %v336_v2, %s1659_s28  ;;  %413 = vrot.lane.b32.xlu0 %v1189_v3, %s1660_s26  ;;  %v337_v10 = vld [vmem:[%s1896_s10 + $0x21] sm:$0xff]  ;;  %v1931_v12 = vld [vmem:[%s1896_s10 + $0x10] sm:$0xff]  ;;  %vm722_vm8 = vcmask 261120   ;;  %vm737_vm9 = vcmask 293888   ;;  %s1185_s29 = sshll.u32 %s1892_s30, 6  ;;  %s1263_s7 = sshll.u32 %s1644_s21, 10 }
  0x74   : > { %v1191_v11 = vld [vmem:[%s1896_s10 + $0xc0] sm:$0xff]  ;;  %v1213_v13 = vld [vmem:[%s1896_s10 + $0x131] sm:$0xff]  ;;  %s2125_s8 = scalar_lea.vmem [#allocation8], %s1185_s29  ;;  %p2311_p1 = scmp.ne.s32.totalorder %s2304_s6, 0 }
  0x75   : > { %v308_v14 = vld [vmem:[#allocation5] sm:$0xff]  ;;  %v338_v18 = vld [vmem:[%s1896_s10 + $0x31] sm:$0xff]  ;;  %s959_s14 = sshll.u32 %s2125_s8, 4  ;;  %s2158_s14 = int_to_ptr.vmem [resolvable:$true] %s959_s14 }
  0x76   : > { %v1299_v16 = vpack.c.bf16 %v309_v15, %v308_v14  ;;  %v1198_v17 = vld [vmem:[%s1896_s10 + $0x140] sm:$0xff]  ;;  %v310_v19 = vld [vmem:[#allocation5 + $0x10] sm:$0xff] }
  0x77   : > { %477 = vrot.lane.b32.xlu1 %v1197_v4, %s1661_s17  ;;  %475 = vrot.lane.b32.xlu0 %v1196_v5, %s1661_s17  ;;  %v1303_v21 = vpack.c.bf16 %v311_v20, %v310_v19  ;;  %v1942_v22 = vld [vmem:[%s1896_s10 + $0x20] sm:$0xff]  ;;  %v1206_v23 = vld [vmem:[%s1896_s10 + $0x1d0] sm:$0xff] }
  0x78   : > { %1300 = vmatprep.subr.bf16.mxu0 %v1299_v16  ;;  %1307 = vmatprep.subr.bf16.mxu1 %v1299_v16  ;;  %v1199_v24 = vld [vmem:[%s1896_s10 + $0x150] sm:$0xff]  ;;  %v312_v25 = vld [vmem:[#allocation5 + $0x20] sm:$0xf] }
  0x79   : > { %1302 = vmatpush3.bf16.msra.mxu0 %v1299_v16  ;;  %1310 = vmatpush3.bf16.msra.mxu1 %v1299_v16  ;;  %v1207_v26 = vld [vmem:[%s1896_s10 + $0x1e0] sm:$0xff]  ;;  %v1192_v27 = vld [vmem:[%s1896_s10 + $0xd0] sm:$0xff] }
  0x7a   : > { %1304 = vmatprep.subr.bf16.mxu0 %v1303_v21  ;;  %1308 = vmatprep.subr.bf16.mxu1 %v1303_v21  ;;  %v1214_v28 = vld [vmem:[%s1896_s10 + $0x141] sm:$0xff]  ;;  %v1965_v31 = vld [vmem:[%s1896_s10 + $0x30] sm:$0xff] }
  0x7b   : > { %415 = vrot.lane.b32.xlu1 %v1190_v6, %s1660_s26  ;;  %507 = vrot.lane.b32.xlu0 %v1204_v7, %s1662_s15  ;;  %v339_v29 = vld [vmem:[%s1896_s10 + $0x41] sm:$0xff]  ;;  %v1215_v32 = vld [vmem:[%s1896_s10 + $0x151] sm:$0xff] }
  0x7c   : > { %v1193_v30 = vld [vmem:[%s1896_s10 + $0xe0] sm:$0xff]  ;;  %v340_v34 = vld [vmem:[%s1896_s10 + $0x51] sm:$0xff] }
  0x7d   : > { %1306 = vmatpush3.bf16.msra.mxu0 %v1303_v21  ;;  %1311 = vmatpush3.bf16.msra.mxu1 %v1303_v21  ;;  %v1200_v33 = vld [vmem:[%s1896_s10 + $0x160] sm:$0xff]  ;;  %v1208_v36 = vld [vmem:[%s1896_s10 + $0x1f0] sm:$0xff] }
  0x7e   : > { %1285 = vmatprep.subr.msk.mxu0 %vm762_vm0, %v312_v25  ;;  %1309 = vmatprep.subr.msk.mxu1 %vm762_vm0, %v312_v25  ;;  %v1976_v35 = vld [vmem:[%s1896_s10 + $0x40] sm:$0xff]  ;;  %v1201_v37 = vld [vmem:[%s1896_s10 + $0x170] sm:$0xff] }
  0x7f   : > { %539 = vrot.lane.b32.xlu1 %v1212_v8, %s1663_s9  ;;  %509 = vrot.lane.b32.xlu0 %v1205_v9, %s1662_s15  ;;  %v1209_v38 = vld [vmem:[%s1896_s10 + $0x200] sm:$0xff]  ;;  %v1194_v39 = vld [vmem:[%s1896_s10 + $0xf0] sm:$0xff] }
  0x80   : > { %v1216_v40 = vld [vmem:[%s1896_s10 + $0x161] sm:$0xff]  ;;  %v1999_v43 = vld [vmem:[%s1896_s10 + $0x50] sm:$0xff] }
  0x81   : > { %1286 = vmatpush3.msk.msra.mxu0 %vm762_vm0, %v312_v25  ;;  %1312 = vmatpush3.msk.msra.mxu1 %vm762_vm0, %v312_v25  ;;  %v341_v41 = vld [vmem:[%s1896_s10 + $0x61] sm:$0xff]  ;;  %v1217_v44 = vld [vmem:[%s1896_s10 + $0x171] sm:$0xff] }
  0x82   : > { %v1195_v42 = vld [vmem:[%s1896_s10 + $0x100] sm:$0xff]  ;;  %v342_v46 = vld [vmem:[%s1896_s10 + $0x71] sm:$0xff] }
  0x83   : > { %447 = vrot.lane.b32.xlu1 %v337_v10, %s1659_s28  ;;  %417 = vrot.lane.b32.xlu0 %v1191_v11, %s1660_s26  ;;  %v1202_v45 = vld [vmem:[%s1896_s10 + $0x180] sm:$0xff]  ;;  %v1210_v48 = vld [vmem:[%s1896_s10 + $0x210] sm:$0xff] }
  0x84   : > { %v2010_v47 = vld [vmem:[%s1896_s10 + $0x60] sm:$0xff]  ;;  %v1203_v49 = vld [vmem:[%s1896_s10 + $0x190] sm:$0xff] }
  0x85   : > { %v1218_v50 = vld [vmem:[%s1896_s10 + $0x181] sm:$0xff]  ;;  %v1219_v52 = vld [vmem:[%s1896_s10 + $0x191] sm:$0xff] }
  0x86   : > { %v1211_v51 = vld [vmem:[%s1896_s10 + $0x220] sm:$0xff]  ;;  %v2030_v54 = vld [vmem:[%s1896_s10 + $0x70] sm:$0xff] }
  0x87   : > { %571 = vrot.lane.b32.xlu1 %v1931_v12, %s1664_s13  ;;  %541 = vrot.lane.b32.xlu0 %v1213_v13, %s1663_s9  ;;  %v1227_v53 = vld [vmem:[%s1896_s10 + $0x80] sm:$0xff]  ;;  %v1235_v57 = vld [vmem:[%s1896_s10 + $0x110] sm:$0xff] }
  0x88   : > { %v1243_v60 = vld [vmem:[%s1896_s10 + $0x81] sm:$0xff] }
  0x89   : > { %v316_v9 = vld [vmem:[%s1896_s10] sm:$0xff] }
  0x8b   : > { %479 = vrot.lane.b32.xlu1 %v1198_v17, %s1661_s17  ;;  %449 = vrot.lane.b32.xlu0 %v338_v18, %s1659_s28 }
  0x8f   : > { %603 = vrot.lane.b32.xlu1 %v1189_v3, %s1665_s12  ;;  %573 = vrot.lane.b32.xlu0 %v1942_v22, %s1664_s13 }
  0x93   : > { %511 = vrot.lane.b32.xlu1 %v1206_v23, %s1662_s15  ;;  %481 = vrot.lane.b32.xlu0 %v1199_v24, %s1661_s17 }
  0x97   : > { %635 = vrot.lane.b32.xlu1 %v336_v2, %s1666_s25  ;;  %605 = vrot.lane.b32.xlu0 %v1190_v6, %s1665_s12 }
  0x9b   : > { %513 = vrot.lane.b32.xlu1 %v1207_v26, %s1662_s15  ;;  %419 = vrot.lane.b32.xlu0 %v1192_v27, %s1660_s26 }
  0x9f   : > { %637 = vrot.lane.b32.xlu1 %v337_v10, %s1666_s25  ;;  %543 = vrot.lane.b32.xlu0 %v1214_v28, %s1663_s9 }
  0xa3   : > { %451 = vrot.lane.b32.xlu1 %v339_v29, %s1659_s28  ;;  %421 = vrot.lane.b32.xlu0 %v1193_v30, %s1660_s26 }
  0xa7   : > { %575 = vrot.lane.b32.xlu1 %v1965_v31, %s1664_s13  ;;  %545 = vrot.lane.b32.xlu0 %v1215_v32, %s1663_s9 }
  0xab   : > { %483 = vrot.lane.b32.xlu1 %v1200_v33, %s1661_s17  ;;  %453 = vrot.lane.b32.xlu0 %v340_v34, %s1659_s28 }
  0xaf   : > { %607 = vrot.lane.b32.xlu1 %v1191_v11, %s1665_s12  ;;  %577 = vrot.lane.b32.xlu0 %v1976_v35, %s1664_s13 }
  0xb3   : > { %515 = vrot.lane.b32.xlu1 %v1208_v36, %s1662_s15  ;;  %485 = vrot.lane.b32.xlu0 %v1201_v37, %s1661_s17 }
  0xb7   : > { %639 = vrot.lane.b32.xlu1 %v338_v18, %s1666_s25  ;;  %609 = vrot.lane.b32.xlu0 %v1192_v27, %s1665_s12 }
  0xbb   : > { %517 = vrot.lane.b32.xlu1 %v1209_v38, %s1662_s15  ;;  %423 = vrot.lane.b32.xlu0 %v1194_v39, %s1660_s26 }
  0xbf   : > { %641 = vrot.lane.b32.xlu1 %v339_v29, %s1666_s25  ;;  %547 = vrot.lane.b32.xlu0 %v1216_v40, %s1663_s9 }
  0xc3   : > { %455 = vrot.lane.b32.xlu1 %v341_v41, %s1659_s28  ;;  %425 = vrot.lane.b32.xlu0 %v1195_v42, %s1660_s26 }
  0xc7   : > { %579 = vrot.lane.b32.xlu1 %v1999_v43, %s1664_s13  ;;  %549 = vrot.lane.b32.xlu0 %v1217_v44, %s1663_s9 }
  0xcb   : > { %487 = vrot.lane.b32.xlu1 %v1202_v45, %s1661_s17  ;;  %457 = vrot.lane.b32.xlu0 %v342_v46, %s1659_s28 }
  0xcf   : > { %611 = vrot.lane.b32.xlu1 %v1193_v30, %s1665_s12  ;;  %581 = vrot.lane.b32.xlu0 %v2010_v47, %s1664_s13 }
  0xd3   : > { %519 = vrot.lane.b32.xlu1 %v1210_v48, %s1662_s15  ;;  %489 = vrot.lane.b32.xlu0 %v1203_v49, %s1661_s17  ;;  %s2156_s17 = scalar_lea.hbm %s2290_s3, %s1263_s7 }
  0xd7   : > { %643 = vrot.lane.b32.xlu1 %v340_v34, %s1666_s25  ;;  %613 = vrot.lane.b32.xlu0 %v1194_v39, %s1665_s12 }
  0xdb   : > { %551 = vrot.lane.b32.xlu1 %v1218_v50, %s1663_s9  ;;  %521 = vrot.lane.b32.xlu0 %v1211_v51, %s1662_s15  ;;  %s934_s15 = scalar_lea.sflag [#allocation4], %s1892_s30 }
  0xdf   : > { %553 = vrot.lane.b32.xlu1 %v1219_v52, %s1663_s9  ;;  %645 = vrot.lane.b32.xlu0 %v341_v41, %s1666_s25  ;;  %s1506_s9 = scalar_lea.vmem %s2158_s14, 1024 }
  0xe0   : > { %p1507_p11 = scmp.ne.s32.totalorder %s2158_s14, %s1506_s9 }
  0xe1   : > { %v444_v55 = vpop.permute.xlu1 %443  ;;  %v412_v56 = vpop.permute.xlu0 %411 }
  0xe2   : > { %v660_v10 = vsel %vm659_vm1, %v316_v9, %v412_v56  ;;  %p1508_p13 = pnand %p1507_p11, %p2311_p1 }
  0xe3   : > { %585 = vrot.lane.b32.xlu1 %v1227_v53, %s1664_s13  ;;  %583 = vrot.lane.b32.xlu0 %v2030_v54, %s1664_s13  ;;  %v669_v14 = vsel %vm668_vm2, %v660_v10, %v444_v55  ;;  %s1667_s13 = smov [#allocation8]  }
  0xe4   : > { %p1509_p5 = pneg %p1508_p13 }
  0xe5   : > { %v446_v58 = vpop.permute.xlu1 %445  ;;  %v414_v59 = vpop.permute.xlu0 %413 }
  0xe6   : > { %v661_v21 = vsel %vm659_vm1, %v1931_v12, %v414_v59 }
  0xe7   : > { %617 = vrot.lane.b32.xlu1 %v1235_v57, %s1665_s12  ;;  %615 = vrot.lane.b32.xlu0 %v1195_v42, %s1665_s12  ;;  %v670_v27 = vsel %vm668_vm2, %v661_v21, %v446_v58  ;;  %s1510_s12 = sshll.u32 %s1667_s13, 4  ;;  %s1511_s12 = int_to_ptr.vmem [resolvable:$false] %s1510_s12 }
  0xe8   : > { %p1513_p7 = scmp.lt.s32.totalorder %s2158_s14, %s1511_s12 }
  0xe9   : > { %v478_v61 = vpop.permute.xlu1 %477  ;;  %v476_v62 = vpop.permute.xlu0 %475 }
  0xea   : > { %v678_v15 = vsel %vm677_vm3, %v669_v14, %v476_v62  ;;  %v679_v28 = vsel %vm677_vm3, %v670_v27, %v478_v61 }
  0xeb   : > { %649 = vrot.lane.b32.xlu1 %v1243_v60, %s1666_s25  ;;  %647 = vrot.lane.b32.xlu0 %v342_v46, %s1666_s25  ;;  %s1512_s25 = scalar_lea.vmem %s1511_s12, 2048 }
  0xec   : > { %p1514_p12 = scmp.lt.s32.totalorder %s1512_s25, %s1506_s9 }
  0xed   : > { %v416_v63 = vpop.permute.xlu1 %415  ;;  %v508_v0 = vpop.permute.xlu0 %507 }
  0xee   : > { %v687_v18 = vsel %vm686_vm4, %v678_v15, %v508_v0  ;;  %v662_v49 = vsel %vm659_vm1, %v1942_v22, %v416_v63  ;;  %p1515_p0 = por %p1514_p12, %p1513_p7 }
  0xf0   : > { %p1516_p2 = pnand %p1515_p0, %p1509_p5 }
  0xf1   : > { %v540_v1 = vpop.permute.xlu1 %539  ;;  %v510_v2 = vpop.permute.xlu0 %509 }
  0xf2   : > { %v696_v19 = vsel %vm695_vm5, %v687_v18, %v540_v1  ;;  %v688_v32 = vsel %vm686_vm4, %v679_v28, %v510_v2 }
  0xf5   : > { %v448_v3 = vpop.permute.xlu1 %447  ;;  %v2041_v4 = vpop.permute.xlu0 %417 }
  0xf6   : > { %v671_v50 = vsel %vm668_vm2, %v662_v49, %v448_v3  ;;  %v663_v22 = vsel %vm659_vm1, %v1965_v31, %v2041_v4 }
  0xf9   : > { %v572_v5 = vpop.permute.xlu1 %571  ;;  %v542_v6 = vpop.permute.xlu0 %541 }
  0xfa   : > { %v705_v20 = vsel %vm704_vm6, %v696_v19, %v572_v5  ;;  %v697_v33 = vsel %vm695_vm5, %v688_v32, %v542_v6 }
  0xfd   : > { %v480_v7 = vpop.permute.xlu1 %479  ;;  %v450_v8 = vpop.permute.xlu0 %449 }
  0xfe   : > { %v680_v51 = vsel %vm677_vm3, %v671_v50, %v480_v7  ;;  %v672_v62 = vsel %vm668_vm2, %v663_v22, %v450_v8 }
 0x101   : > { %v604_v11 = vpop.permute.xlu1 %603  ;;  %v574_v13 = vpop.permute.xlu0 %573 }
 0x102   : > { %v714_v23 = vsel %vm713_vm7, %v705_v20, %v604_v11  ;;  %v706_v12 = vsel %vm704_vm6, %v697_v33, %v574_v13 }
 0x105   : > { %v512_v16 = vpop.permute.xlu1 %511  ;;  %v482_v17 = vpop.permute.xlu0 %481 }
 0x106   : > { %v689_v55 = vsel %vm686_vm4, %v680_v51, %v512_v16  ;;  %v681_v63 = vsel %vm677_vm3, %v672_v62, %v482_v17 }
 0x109   : > { %v636_v24 = vpop.permute.xlu1 %635  ;;  %v606_v25 = vpop.permute.xlu0 %605 }
 0x10a   : > { %v723_v26 = vsel %vm722_vm8, %v714_v23, %v636_v24  ;;  %v715_v34 = vsel %vm713_vm7, %v706_v12, %v606_v25 }
 0x10b   : > { %1287 = vmatprep.mubr.msk.f32.mxu0 %vm737_vm9, %v723_v26 }
 0x10d   : > { %v514_v29 = vpop.permute.xlu1 %513  ;;  %v420_v30 = vpop.permute.xlu0 %419 }
 0x10e   : > { %v690_v2 = vsel %vm686_vm4, %v681_v63, %v514_v29  ;;  %v664_v17 = vsel %vm659_vm1, %v1976_v35, %v420_v30  ;;  %v1244_v63 = vld [vmem:[#allocation7] ss:$0 sm:$0xff] }
 0x111   : > { %v638_v36 = vpop.permute.xlu1 %637  ;;  %v544_v37 = vpop.permute.xlu0 %543 }
 0x112   : > { %v724_v38 = vsel %vm722_vm8, %v715_v34, %v638_v36  ;;  %v698_v56 = vsel %vm695_vm5, %v689_v55, %v544_v37 }
 0x113   : > { %1288 = vmatmul.mubr.msk.f32.vlgmr.msra.gmra.mrb[0].mxu0 %vm737_vm9, %v724_v38 }
 0x115   : > { %v452_v39 = vpop.permute.xlu1 %451  ;;  %v422_v40 = vpop.permute.xlu0 %421 }
 0x116   : > { %v673_v18 = vsel %vm668_vm2, %v664_v17, %v452_v39  ;;  %v665_v35 = vsel %vm659_vm1, %v1999_v43, %v422_v40 }
 0x119   : > { %v576_v41 = vpop.permute.xlu1 %575  ;;  %v546_v42 = vpop.permute.xlu0 %545 }
 0x11a   : > { %v707_v57 = vsel %vm704_vm6, %v698_v56, %v576_v41  ;;  %v699_v3 = vsel %vm695_vm5, %v690_v2, %v546_v42 }
 0x11d   : > { %v484_v44 = vpop.permute.xlu1 %483  ;;  %v454_v45 = vpop.permute.xlu0 %453 }
 0x11e   : > { %v682_v19 = vsel %vm677_vm3, %v673_v18, %v484_v44  ;;  %v674_v30 = vsel %vm668_vm2, %v665_v35, %v454_v45 }
 0x121   : > { %v608_v46 = vpop.permute.xlu1 %607  ;;  %v578_v48 = vpop.permute.xlu0 %577 }
 0x122   : > { %v716_v58 = vsel %vm713_vm7, %v707_v57, %v608_v46  ;;  %v708_v5 = vsel %vm704_vm6, %v699_v3, %v578_v48 }
 0x125   : > { %v516_v52 = vpop.permute.xlu1 %515  ;;  %v486_v53 = vpop.permute.xlu0 %485 }
 0x126   : > { %v691_v23 = vsel %vm686_vm4, %v682_v19, %v516_v52  ;;  %v683_v32 = vsel %vm677_vm3, %v674_v30, %v486_v53 }
 0x129   : > { %v640_v59 = vpop.permute.xlu1 %639  ;;  %v610_v60 = vpop.permute.xlu0 %609 }
 0x12a   : > { %v725_v61 = vsel %vm722_vm8, %v716_v58, %v640_v59  ;;  %v717_v6 = vsel %vm713_vm7, %v708_v5, %v610_v60 }
 0x12b   : > { %1290 = vmatprep.mubr.msk.f32.mxu0 %vm737_vm9, %v725_v61 }
 0x12d   : > { %v518_v0 = vpop.permute.xlu1 %517  ;;  %v424_v1 = vpop.permute.xlu0 %423 }
 0x12e   : > { %v692_v34 = vsel %vm686_vm4, %v683_v32, %v518_v0  ;;  %v666_v44 = vsel %vm659_vm1, %v2010_v47, %v424_v1 }
 0x131   : > { %v642_v7 = vpop.permute.xlu1 %641  ;;  %v548_v9 = vpop.permute.xlu0 %547 }
 0x132   : > { %v726_v31 = vsel %vm722_vm8, %v717_v6, %v642_v7  ;;  %v700_v24 = vsel %vm695_vm5, %v691_v23, %v548_v9 }
 0x133   : > { %1291 = vmatmul.mubr.msk.f32.gmra.mrb[2].mxu0 %vm737_vm9, %v726_v31 }
 0x135   : > { %v456_v4 = vpop.permute.xlu1 %455  ;;  %v426_v8 = vpop.permute.xlu0 %425 }
 0x136   : > { %v667_v45 = vsel %vm659_vm1, %v2030_v54, %v426_v8  ;;  %v675_v46 = vsel %vm668_vm2, %v666_v44, %v456_v4 }
 0x139   : > { %v580_v10 = vpop.permute.xlu1 %579  ;;  %v550_v11 = vpop.permute.xlu0 %549 }
 0x13a   : > { %v709_v25 = vsel %vm704_vm6, %v700_v24, %v580_v10  ;;  %v701_v36 = vsel %vm695_vm5, %v692_v34, %v550_v11 }
 0x13d   : > { %v488_v13 = vpop.permute.xlu1 %487  ;;  %v458_v14 = vpop.permute.xlu0 %457 }
 0x13e   : > { %v676_v48 = vsel %vm668_vm2, %v667_v45, %v458_v14  ;;  %v684_v49 = vsel %vm677_vm3, %v675_v46, %v488_v13 }
 0x141   : > { %v612_v15 = vpop.permute.xlu1 %611  ;;  %v582_v16 = vpop.permute.xlu0 %581 }
 0x142   : > { %v718_v26 = vsel %vm713_vm7, %v709_v25, %v612_v15  ;;  %v710_v37 = vsel %vm704_vm6, %v701_v36, %v582_v16 }
 0x145   : > { %v520_v20 = vpop.permute.xlu1 %519  ;;  %v490_v21 = vpop.permute.xlu0 %489 }
 0x146   : > { %v685_v50 = vsel %vm677_vm3, %v676_v48, %v490_v21  ;;  %v693_v53 = vsel %vm686_vm4, %v684_v49, %v520_v20 }
 0x149   : > { %v644_v27 = vpop.permute.xlu1 %643  ;;  %v614_v28 = vpop.permute.xlu0 %613 }
 0x14a   : > { %v727_v29 = vsel %vm722_vm8, %v718_v26, %v644_v27  ;;  %v719_v38 = vsel %vm713_vm7, %v710_v37, %v614_v28 }
 0x14b   : > { %1293 = vmatprep.mubr.msk.f32.mxu1 %vm737_vm9, %v727_v29 }
 0x14d   : > { %v552_v33 = vpop.permute.xlu1 %551  ;;  %v522_v12 = vpop.permute.xlu0 %521 }
 0x14e   : > { %v694_v55 = vsel %vm686_vm4, %v685_v50, %v522_v12  ;;  %v702_v47 = vsel %vm695_vm5, %v693_v53, %v552_v33 }
 0x151   : > { %v554_v39 = vpop.permute.xlu1 %553  ;;  %v646_v41 = vpop.permute.xlu0 %645 }
 0x152   : > { %v728_v43 = vsel %vm722_vm8, %v719_v38, %v646_v41  ;;  %v703_v56 = vsel %vm695_vm5, %v694_v55, %v554_v39 }
 0x153   : > { %1294 = vmatmul.mubr.msk.f32.vlgmr.msra.gmra.mrb[0].mxu1 %vm737_vm9, %v728_v43 }
 0x155   : > { %v586_v40 = vpop.permute.xlu1 %585  ;;  %v584_v42 = vpop.permute.xlu0 %583 }
 0x156   : > { %v712_v54 = vsel %vm704_vm6, %v703_v56, %v586_v40  ;;  %v711_v57 = vsel %vm704_vm6, %v702_v47, %v584_v42 }
 0x159   : > { %v618_v51 = vpop.permute.xlu1 %617  ;;  %v616_v52 = vpop.permute.xlu0 %615 }
 0x15a   : > { %v721_v58 = vsel %vm713_vm7, %v712_v54, %v618_v51  ;;  %v720_v59 = vsel %vm713_vm7, %v711_v57, %v616_v52 }
 0x15d   : > { %v650_v60 = vpop.permute.xlu1 %649  ;;  %v648_v61 = vpop.permute.xlu0 %647 }
 0x15e   : > { %v730_v22 = vsel %vm722_vm8, %v721_v58, %v650_v60  ;;  %v729_v62 = vsel %vm722_vm8, %v720_v59, %v648_v61 }
 0x15f   : > { %1296 = vmatprep.mubr.msk.f32.mxu1 %vm737_vm9, %v729_v62 }
 0x160   : > { %1297 = vmatmul.mubr.msk.f32.gmra.mrb[2].mxu1 %vm737_vm9, %v730_v22 }
 0x1e6   : > { %v1289_v0 = vpop.f32.mrb[0].mxu0 }
 0x1e7   : > { %v838_v1 = vadd.f32 %v1289_v0, %v1244_v63  ;;  %v832_v2 = vpop.f32.mrb[1].mxu0 }
 0x1e8   : > { %v833_v3 = vadd.f32 %v1244_v63, %v832_v2 }
 0x1e9   : > { %872 = vst.msk [vmem:[%s2125_s8 + $0x8] sm:$0xff] %vm668_vm2, %v838_v1  ;;  %v880_v5 = vsel %vm668_vm2, %v838_v1, 0.0  ;;  %v902_v6 = vmul.f32 %v838_v1, %v838_v1 }
 0x1ea   : > { %871 = vst.msk [vmem:[%s2125_s8] sm:$0xff] %vm668_vm2, %v833_v3  ;;  %v879_v7 = vsel %vm668_vm2, %v833_v3, 0.0  ;;  %v901_v9 = vmul.f32 %v833_v3, %v833_v3 }
 0x1eb   : > { %v910_v31 = vsel %vm668_vm2, %v902_v6, 0.0  ;;  %v881_v4 = vadd.f32 %v880_v5, %v879_v7 }
 0x1ec   : > { %v909_v8 = vsel %vm668_vm2, %v901_v9, 0.0 }
 0x1ed   : > { %v911_v10 = vadd.f32 %v910_v31, %v909_v8 }
 0x206   : > { %v1292_v11 = vpop.f32.mrb[2].mxu0 }
 0x207   : > { %v848_v13 = vadd.f32 %v1292_v11, %v1244_v63  ;;  %v842_v14 = vpop.f32.mrb[3].mxu0 }
 0x208   : > { %v843_v15 = vadd.f32 %v1244_v63, %v842_v14 }
 0x209   : > { %874 = vst.msk [vmem:[%s2125_s8 + $0x18] sm:$0xff] %vm668_vm2, %v848_v13  ;;  %v904_v16 = vmul.f32 %v848_v13, %v848_v13  ;;  %v884_v20 = vsel %vm668_vm2, %v848_v13, 0.0 }
 0x20a   : > { %873 = vst.msk [vmem:[%s2125_s8 + $0x10] sm:$0xff] %vm668_vm2, %v843_v15  ;;  %v882_v17 = vsel %vm668_vm2, %v843_v15, 0.0  ;;  %v903_v18 = vmul.f32 %v843_v15, %v843_v15 }
 0x20b   : > { %v883_v19 = vadd.f32 %v882_v17, %v881_v4  ;;  %v914_v25 = vsel %vm668_vm2, %v904_v16, 0.0 }
 0x20c   : > { %v912_v21 = vsel %vm668_vm2, %v903_v18, 0.0 }
 0x20d   : > { %v913_v23 = vadd.f32 %v912_v21, %v911_v10  ;;  %v885_v24 = vadd.f32 %v884_v20, %v883_v19 }
 0x20f   : > { %v915_v26 = vadd.f32 %v914_v25, %v913_v23 }
 0x226   : > { %v1295_v27 = vpop.f32.mrb[0].mxu1 }
 0x227   : > { %v858_v28 = vadd.f32 %v1295_v27, %v1244_v63  ;;  %v852_v29 = vpop.f32.mrb[1].mxu1 }
 0x228   : > { %v853_v35 = vadd.f32 %v1244_v63, %v852_v29 }
 0x229   : > { %876 = vst.msk [vmem:[%s2125_s8 + $0x28] sm:$0xff] %vm668_vm2, %v858_v28  ;;  %v906_v30 = vmul.f32 %v858_v28, %v858_v28  ;;  %v888_v34 = vsel %vm668_vm2, %v858_v28, 0.0 }
 0x22a   : > { %875 = vst.msk [vmem:[%s2125_s8 + $0x20] sm:$0xff] %vm668_vm2, %v853_v35  ;;  %v886_v32 = vsel %vm668_vm2, %v853_v35, 0.0  ;;  %v905_v33 = vmul.f32 %v853_v35, %v853_v35 }
 0x22b   : > { %v887_v12 = vadd.f32 %v886_v32, %v885_v24  ;;  %v918_v39 = vsel %vm668_vm2, %v906_v30, 0.0 }
 0x22c   : > { %v916_v36 = vsel %vm668_vm2, %v905_v33, 0.0 }
 0x22d   : > { %v917_v37 = vadd.f32 %v916_v36, %v915_v26  ;;  %v889_v38 = vadd.f32 %v888_v34, %v887_v12 }
 0x22f   : > { %v919_v41 = vadd.f32 %v918_v39, %v917_v37 }
 0x233   : > { %v1298_v43 = vpop.f32.mrb[2].mxu1 }
 0x234   : > { %v868_v40 = vadd.f32 %v1298_v43, %v1244_v63  ;;  %v862_v42 = vpop.f32.mrb[3].mxu1 }
 0x235   : > { %v863_v44 = vadd.f32 %v1244_v63, %v862_v42 }
 0x236   : > { %878 = vst.msk [vmem:[%s2125_s8 + $0x38] sm:$0xff] %vm668_vm2, %v868_v40  ;;  %v908_v45 = vmul.f32 %v868_v40, %v868_v40 }
 0x237   : > { %877 = vst.msk [vmem:[%s2125_s8 + $0x30] sm:$0xff] %vm668_vm2, %v863_v44  ;;  %v890_v46 = vsel %vm668_vm2, %v863_v44, 0.0  ;;  %v907_v48 = vmul.f32 %v863_v44, %v863_v44 }
 0x238   : > { %v891_v49 = vadd.f32 %v890_v46, %v889_v38 }
 0x239   : > { %1519 = shalt.err (!%p1516_p2)
}
 0x23a   : > { %s1520_s29 = scalar_lea.hbm %s2156_s17, 1024  ;;  %s1524_s10 = scalar_lea.hbm %s2290_s3, 2048 }
 0x23b   : > { %p1521_p6 = scmp.ne.s32.totalorder %s2156_s17, %s1520_s29  ;;  %p1525_p4 = scmp.lt.u32.totalorder %s2156_s17, %s2290_s3 }
 0x23c   : > { %p1526_p9 = scmp.lt.u32.totalorder %s1524_s10, %s1520_s29  ;;  %p1528_p11 = scmp.lt.u32.totalorder %s1520_s29, %s2156_s17 }
 0x23d   : > { %p1522_p10 = pnand %p1521_p6, %p2311_p1 }
 0x23e   : > { %p1527_p8 = por %p1526_p9, %p1525_p4 }
 0x23f   : > { %p1523_p3 = pneg %p1522_p10 }
 0x240   : > { %p1529_p13 = por %p1528_p11, %p1527_p8 }
 0x242   : > { %p1530_p5 = pnand %p1529_p13, %p1523_p3 }
 0x244   : > { %1533 = shalt.err (!%p1530_p5)
}
 0x245   : > { %s1668_s9 = smov 128   ;;  %v892_v50 = vsel %vm668_vm2, %v868_v40, 0.0  ;;  %v920_v51 = vsel %vm668_vm2, %v907_v48, 0.0  ;;  %v922_v55 = vsel %vm668_vm2, %v908_v45, 0.0  ;;  %s1186_s12 = sshll.u32 %s1892_s30, 3 }
 0x246   : > { %1326 = dma.vmem_to_hbm [thread:$0]  (%p2311_p1), %s2158_s14, 1024, %s2156_s17, %s934_s15, %s1668_s9, %s1668_s9, %s1659_s28   ;;  %v893_v52 = vadd.f32 %v892_v50, %v891_v49  ;;  %v921_v53 = vadd.f32 %v920_v51, %v919_v41 }
 0x247   : > { %s938_s25 = sand.u32 1, %s1732_s24   ;;  %s1259_s28 = sshll.u32 %s1644_s21, 7 }
 0x248   : > { %v894_v47 = vrot.slane %v893_v52, 4  ;;  %v923_v56 = vadd.f32 %v922_v55, %v921_v53  ;;  %s298_s14 = scalar_lea.vmem [#allocation9], %s1186_s12  ;;  %s2196_s15 = scalar_lea.vmem [#allocation11], %s1186_s12 }
 0x249   : > { %s976_s17 = sshll.u32 %s298_s14, 4  ;;  %s990_s29 = sshll.u32 %s2196_s15, 4  ;;  %s2204_s17 = int_to_ptr.vmem [resolvable:$true] %s976_s17  ;;  %s2212_s29 = int_to_ptr.vmem [resolvable:$true] %s990_s29 }
 0x24a   : > { %v895_v54 = vadd.f32 %v894_v47, %v893_v52  ;;  %v924_v57 = vrot.slane %v923_v56, 4  ;;  %s2202_s7 = scalar_lea.hbm %s2291_s4, %s1259_s28  ;;  %s2210_s10 = scalar_lea.hbm %s2292_s5, %s1259_s28 }
 0x24b   : > { %s2214_s26 = scalar_lea.sflag [#allocation10], %s938_s25  ;;  %s1534_s13 = scalar_lea.vmem %s2204_s17, 128 }
 0x24c   : > { %v896_v58 = vrot.slane %v895_v54, 2  ;;  %v925_v59 = vadd.f32 %v924_v57, %v923_v56  ;;  %p1535_p7 = scmp.ne.s32.totalorder %s2204_s17, %s1534_s13  ;;  %s1669_s9 = smov [#allocation9]  }
 0x24d   : > { %s1538_s12 = sshll.u32 %s1669_s9, 4  ;;  %s1539_s12 = int_to_ptr.vmem [resolvable:$false] %s1538_s12 }
 0x24e   : > { %v897_v60 = vadd.f32 %v896_v58, %v895_v54  ;;  %v926_v61 = vrot.slane %v925_v59, 2  ;;  %p1536_p12 = pnand %p1535_p7, %p2311_p1  ;;  %s1540_s30 = scalar_lea.vmem %s1539_s12, 256 }
 0x24f   : > { %p1541_p2 = scmp.lt.s32.totalorder %s2204_s17, %s1539_s12  ;;  %p1542_p6 = scmp.lt.s32.totalorder %s1540_s30, %s1534_s13 }
 0x250   : > { %v898_v22 = vrot.slane %v897_v60, 1  ;;  %v927_v62 = vadd.f32 %v926_v61, %v925_v59  ;;  %p1537_p0 = pneg %p1536_p12 }
 0x251   : > { %p1543_p10 = por %p1542_p6, %p1541_p2 }
 0x252   : > { %v928_v63 = vrot.slane %v927_v62, 1  ;;  %v899_v0 = vadd.f32 %v898_v22, %v897_v60 }
 0x253   : > { %p1544_p3 = pnand %p1543_p10, %p1537_p0 }
 0x254   : > { %v929_v1 = vadd.f32 %v928_v63, %v927_v62  ;;  %931 = vst.msk [vmem:[%s298_s14] sm:$0xff] %vm668_vm2, %v899_v0 }
 0x255   : > { %1547 = shalt.err (!%p1544_p3)
}
 0x256   : > { %s1548_s25 = scalar_lea.hbm %s2202_s7, 128  ;;  %s1552_s8 = scalar_lea.hbm %s2291_s4, 256 }
 0x257   : > { %p1549_p4 = scmp.ne.s32.totalorder %s2202_s7, %s1548_s25  ;;  %p1553_p11 = scmp.lt.u32.totalorder %s2202_s7, %s2291_s4 }
 0x258   : > { %p1554_p13 = scmp.lt.u32.totalorder %s1552_s8, %s1548_s25  ;;  %p1556_p7 = scmp.lt.u32.totalorder %s1548_s25, %s2202_s7 }
 0x259   : > { %p1550_p9 = pnand %p1549_p4, %p2311_p1 }
 0x25a   : > { %p1555_p5 = por %p1554_p13, %p1553_p11 }
 0x25b   : > { %p1551_p8 = pneg %p1550_p9 }
 0x25c   : > { %p1557_p12 = por %p1556_p7, %p1555_p5 }
 0x25e   : > { %p1558_p0 = pnand %p1557_p12, %p1551_p8 }
 0x260   : > { %1561 = shalt.err (!%p1558_p0)
}
 0x261   : > { %1327 = dma.vmem_to_hbm [thread:$0]  (%p2311_p1), %s2204_s17, 128, %s2202_s7, %s2214_s26   ;;  %932 = vst.msk [vmem:[%s2196_s15] sm:$0xff] %vm668_vm2, %v929_v1 }
 0x262   : > { %s1562_s13 = scalar_lea.vmem %s2212_s29, 128  ;;  %s1670_s9 = smov [#allocation11]  }
 0x263   : > { %p1563_p2 = scmp.ne.s32.totalorder %s2212_s29, %s1562_s13  ;;  %s1566_s12 = sshll.u32 %s1670_s9, 4  ;;  %s1567_s12 = int_to_ptr.vmem [resolvable:$false] %s1566_s12 }
 0x264   : > { %s1568_s30 = scalar_lea.vmem %s1567_s12, 256  ;;  %p1569_p3 = scmp.lt.s32.totalorder %s2212_s29, %s1567_s12 }
 0x265   : > { %p1564_p6 = pnand %p1563_p2, %p2311_p1  ;;  %p1570_p4 = scmp.lt.s32.totalorder %s1568_s30, %s1562_s13 }
 0x267   : > { %p1565_p10 = pneg %p1564_p6  ;;  %p1571_p9 = por %p1570_p4, %p1569_p3 }
 0x269   : > { %p1572_p8 = pnand %p1571_p9, %p1565_p10 }
 0x26b   : > { %1575 = shalt.err (!%p1572_p8)
}
 0x26c   : > { %s1576_s17 = scalar_lea.hbm %s2210_s10, 128  ;;  %s1580_s25 = scalar_lea.hbm %s2292_s5, 256 }
 0x26d   : > { %p1577_p11 = scmp.ne.s32.totalorder %s2210_s10, %s1576_s17  ;;  %p1581_p7 = scmp.lt.u32.totalorder %s2210_s10, %s2292_s5 }
 0x26e   : > { %p1582_p12 = scmp.lt.u32.totalorder %s1580_s25, %s1576_s17  ;;  %p1584_p2 = scmp.lt.u32.totalorder %s1576_s17, %s2210_s10 }
 0x26f   : > { %p1578_p13 = pnand %p1577_p11, %p2311_p1 }
 0x270   : > { %p1583_p0 = por %p1582_p12, %p1581_p7 }
 0x271   : > { %p1579_p5 = pneg %p1578_p13 }
 0x272   : > { %p1585_p6 = por %p1584_p2, %p1583_p0 }
 0x274   : > { %p1586_p10 = pnand %p1585_p6, %p1579_p5 }
 0x276   : > { %1589 = shalt.err (!%p1586_p10)
}
 0x277   : > { %1328 = dma.vmem_to_hbm [thread:$0]  (%p2311_p1), %s2212_s29, 128, %s2210_s10, %s2214_s26  }
 0x278 PF: > { %s1002_s8 = sand.u32 1, %s1632_s18   ;;  %p2312_p3 = scmp.ne.s32.totalorder %s2300_s27, 0 }
 0x279   : > { %p2313_p4 = scmp.ge.s32.totalorder %s1652_s23, 2  ;;  %s1003_s21 = scalar_lea.sflag [#allocation4], %s1002_s8 }
 0x27b   : > { %p1344_p9 = pnand %p2313_p4, %p2312_p3 }
 0x27d   : > { %1623 = dma.done.wait (!%p1344_p9), %s1003_s21, 1024  }
 0x27e   : > { %1625 = vsyncadd (!%p1344_p9), %s1003_s21, 4294966272  ;;  %s2314_s24 = sadd.s32 4294967294, %s1652_s23  }
 0x27f   : > { %s1011_s13 = sand.u32 1, %s2314_s24  }
 0x280   : > { %s1012_s9 = scalar_lea.sflag [#allocation10], %s1011_s13 }
 0x281   : > { %1627 = dma.done.wait (!%p1344_p9), %s1012_s9, 256  }
 0x282   : > { %1629 = vsyncadd (!%p1344_p9), %s1012_s9, 4294967040  ;;  %s26_s23 = sadd.s32 1, %s1652_s23   ;;  %s2315_s18 = smov %s1636_s19 }
 0x283   : > { %p23_p1 = scmp.ge.s32.totalorder %s26_s23, 4   ;;  %s2316_s19 = smov %s1640_s20 }
 0x284   : > { %s2317_s20 = smov %s1848_s16  ;;  %s2318_s21 = smov %s1648_s22 }
 0x285   : > { %s2319_s22 = smov %s2321_s11  ;;  %25 = sbr.rel (!%p23_p1) target bundleno = 9 (0x9), region = 123 }
 0x28c   :  { %1026 = vsyncpa [#allocation3], 1 }
 0x28d   :  { %1028 = vsyncpa [#allocation3 + $0x1], 1 }
 0x28e   :  { %1029 = vsyncpa [#allocation6], 1 }
 0x28f   :  { %1030 = vsyncpa [#allocation4], 1 }
 0x290   :  { %1032 = vsyncpa [#allocation4 + $0x1], 1 }
 0x291   :  { %1033 = vsyncpa [#allocation10], 1 }
 0x292   :  { %1035 = vsyncpa [#allocation10 + $0x1], 1 }

// kernel: down_transition_forward.5
= control target key start
LH: loop header
LB: loop body
LE: loop exit
PB: predicated region body
PF: predicated region fallthrough
CT: control target
= control target key end

     0   :  { %s2684_s0 = inlined_call_operand.hbm [shape: f32[2,8,8,8], index: 0, kind: input, shape index: {}]   ;;  %s2685_s1 = inlined_call_operand.hbm [shape: f32[72,8], index: 1, kind: input, shape index: {}]   ;;  %s2686_s2 = inlined_call_operand.hbm [shape: f32[1,8], index: 2, kind: input, shape index: {}]   ;;  %s2687_s3 = inlined_call_operand.hbm [shape: f32[1,8], index: 3, kind: input, shape index: {}]   ;;  %s2688_s4 = inlined_call_operand.hbm [shape: f32[1,8], index: 4, kind: input, shape index: {}]   ;;  %s2689_s5 = inlined_call_operand.hbm [shape: f32[2,8,8,8], index: 5, kind: output, shape index: {0}]   ;;  %s2690_s6 = inlined_call_operand.hbm [shape: f32[2,1,8,8], index: 6, kind: output, shape index: {1}]   ;;  %s2691_s7 = inlined_call_operand.hbm [shape: f32[2,1,8,8], index: 7, kind: output, shape index: {2}]  }
   0x1   :  { %2699 = sst [smem:[#allocation23_spill]] %s2691_s7 }
   0x2   :  { %13 = vsyncpa [#allocation4], 0 }
   0x3   :  { %15 = vsyncpa [#allocation4 + $0x1], 0 }
   0x4   :  { %16 = vsyncpa [#allocation7], 0 }
   0x5   :  { %17 = vsyncpa [#allocation10], 0 }
   0x6   :  { %18 = vsyncpa [#allocation5], 0 }
   0x7   :  { %20 = vsyncpa [#allocation5 + $0x1], 0 }
   0x8   :  { %21 = vsyncpa [#allocation14], 0 }
   0x9   :  { %23 = vsyncpa [#allocation14 + $0x1], 0  ;;  %s2049_s24 = smov 0   ;;  %s2051_s25 = smov 0  }
   0xa   :  { %s2053_s26 = smov 0   ;;  %s2055_s27 = smov 0  }
   0xb   :  { %s2057_s28 = smov 0   ;;  %s2059_s29 = smov 0  }
   0xc LB: > { %2700 = sst [smem:[#allocation21_spill]] %s1967_s24  ;;  %s2080_s30 = sadd.s32 4294967295, %s1987_s29   ;;  %s1987_s29 = sphi %s2059_s29, %s29_s29   ;;  %s1983_s28 = sphi %s2057_s28, %s2726_s28   ;;  %s1979_s27 = sphi %s2055_s27, %s2725_s27   ;;  %s1975_s26 = sphi %s2053_s26, %s2724_s26   ;;  %s1971_s25 = sphi %s2051_s25, %s2723_s25   ;;  %s1967_s24 = sphi %s2049_s24, %s2722_s24  }
   0xd   : > { %s2693_s8 = sadd.s32 4294967294, %s1987_s29   ;;  %p61_p0 = scmp.ne.s32.totalorder %s1971_s25, %s1967_s24 }
   0xe   : > { %p2692_p1 = scmp.eq.s32.totalorder %s2080_s30, 0  ;;  %p177_p3 = scmp.eq.s32.totalorder %s2693_s8, 1 }
   0xf   : > { %p1385_p5 = scmp.ge.s32.totalorder %s1987_s29, 1  ;;  %p240_p7 = scmp.lt.s32.totalorder %s1987_s29, 3 }
  0x10   : > { %p2091_p4 = por %p2692_p1, %p61_p0  ;;  %p2096_p6 = por %p177_p3, %p61_p0 }
  0x11   : > { %p2101_p8 = pnand %p1385_p5, %p240_p7  ;;  %s1989_s12 = smov [#allocation6]  }
  0x12   : > { %s2701_s9 = scalar_select %p2091_p4, 1, 0 }
  0x13   : > { %s2702_s10 = scalar_select %p2096_p6, 1, 0 }
  0x14   : > { %s2704_s11 = scalar_select %p2101_p8, 1, 0 }
  0x15   : > { %2703 = sst [smem:[#allocation22_spill]] %s2702_s10  ;;  %s252_s13 = sshll.u32 %s1989_s12, 4  ;;  %s2105_s13 = int_to_ptr.vmem [resolvable:$true] %s252_s13 }
  0x16   : > { %p1578_p9 = pneg %p2101_p8  ;;  %s1990_s15 = smov [#allocation9]  }
  0x17   : > { %s277_s16 = sshll.u32 %s1990_s15, 4  ;;  %s1991_s17 = smov [#allocation8]   ;;  %s2116_s16 = int_to_ptr.vmem [resolvable:$true] %s277_s16 }
  0x18   : > { %p2112_p11 = pnand %p1578_p9, %p2692_p1  ;;  %s2118_s18 = sshll.u32 %s1991_s17, 4  ;;  %s267_s18 = int_to_ptr.vmem [resolvable:$true] %s2118_s18 }
  0x19   : > { %s1695_s21 = scalar_lea.hbm %s2685_s1, 1152 }
  0x1a   : > { %p1696_p12 = scmp.ne.s32.totalorder %s2685_s1, %s1695_s21  ;;  %p2128_p13 = pneg %p2112_p11 }
  0x1b   : > { %p1702_p5 = scmp.lt.u32.totalorder %s1695_s21, %s2685_s1 }
  0x1c   : > { %p1698_p0 = pnand %p2128_p13, %p1696_p12 }
  0x1e   : > { %p1699_p3 = pneg %p1698_p0 }
  0x20   : > { %p1704_p7 = pnand %p1702_p5, %p1699_p3 }
  0x22   : > { %1707 = shalt.err (!%p1704_p7)
}
  0x23   : > { %s1708_s19 = scalar_lea.vmem %s2105_s13, 1152  ;;  %p1716_p2 = scmp.lt.s32.totalorder %s2105_s13, %s2105_s13 }
  0x24   : > { %p1709_p9 = scmp.ne.s32.totalorder %s2105_s13, %s1708_s19  ;;  %p1717_p6 = scmp.lt.s32.totalorder %s1708_s19, %s1708_s19 }
  0x26   : > { %p1711_p10 = pnand %p1709_p9, %p2128_p13  ;;  %p1718_p12 = por %p1717_p6, %p1716_p2 }
  0x28   : > { %p1712_p1 = pneg %p1711_p10 }
  0x2a   : > { %p1719_p0 = pnand %p1718_p12, %p1712_p1 }
  0x2c   : > { %1722 = shalt.err (!%p1719_p0)
}
  0x2d   : > { %s1992_s20 = smov 128   ;;  %s1993_s21 = smov 8  }
  0x2e   : > { %1581 = dma.hbm_to_vmem [thread:$0]  (!%p2112_p11), %s2685_s1, 1152, %s2105_s13, [#allocation7], %s1992_s20, %s1992_s20, %s1993_s21  }
  0x2f   : > { %s1723_s19 = scalar_lea.hbm %s2687_s3, 16 }
  0x30   : > { %p1724_p1 = scmp.ne.s32.totalorder %s2687_s3, %s1723_s19  ;;  %p1730_p10 = scmp.lt.u32.totalorder %s1723_s19, %s2687_s3 }
  0x32   : > { %p1726_p2 = pnand %p1724_p1, %p2128_p13 }
  0x34   : > { %p1727_p6 = pneg %p1726_p2 }
  0x36   : > { %p1732_p3 = pnand %p1730_p10, %p1727_p6 }
  0x38   : > { %1735 = shalt.err (!%p1732_p3)
}
  0x39   : > { %s1736_s13 = scalar_lea.vmem %s2116_s16, 16  ;;  %s1743_s8 = scalar_lea.vmem %s2116_s16, 32 }
  0x3a   : > { %p1737_p5 = scmp.ne.s32.totalorder %s2116_s16, %s1736_s13  ;;  %p1744_p12 = scmp.lt.s32.totalorder %s2116_s16, %s2116_s16 }
  0x3b   : > { %p1745_p0 = scmp.lt.s32.totalorder %s1743_s8, %s1736_s13 }
  0x3c   : > { %p1739_p7 = pnand %p1737_p5, %p2128_p13 }
  0x3d   : > { %p1746_p1 = por %p1745_p0, %p1744_p12 }
  0x3e   : > { %p1740_p9 = pneg %p1739_p7 }
  0x40   : > { %p1747_p2 = pnand %p1746_p1, %p1740_p9 }
  0x42   : > { %1750 = shalt.err (!%p1747_p2)
}
  0x43   : > { %1587 = dma.hbm_to_vmem [thread:$0]  (!%p2112_p11), %s2687_s3, 16, %s2116_s16, [#allocation10]  }
  0x44   : > { %s1751_s23 = scalar_lea.hbm %s2686_s2, 16 }
  0x45   : > { %p1752_p6 = scmp.ne.s32.totalorder %s2686_s2, %s1751_s23  ;;  %p1758_p5 = scmp.lt.u32.totalorder %s1751_s23, %s2686_s2 }
  0x47   : > { %p1754_p10 = pnand %p1752_p6, %p2128_p13 }
  0x49   : > { %p1755_p3 = pneg %p1754_p10 }
  0x4b   : > { %p1760_p7 = pnand %p1758_p5, %p1755_p3 }
  0x4d   : > { %1763 = shalt.err (!%p1760_p7)
}
  0x4e   : > { %s1764_s8 = scalar_lea.vmem %s267_s18, 16  ;;  %s1771_s16 = scalar_lea.vmem %s267_s18, 32 }
  0x4f   : > { %p1765_p9 = scmp.ne.s32.totalorder %s267_s18, %s1764_s8  ;;  %p1772_p1 = scmp.lt.s32.totalorder %s267_s18, %s267_s18 }
  0x50   : > { %p1773_p2 = scmp.lt.s32.totalorder %s1771_s16, %s1764_s8 }
  0x51   : > { %p1767_p12 = pnand %p1765_p9, %p2128_p13 }
  0x52   : > { %p1774_p4 = por %p1773_p2, %p1772_p1 }
  0x53   : > { %p1768_p0 = pneg %p1767_p12 }
  0x55   : > { %p1775_p8 = pnand %p1774_p4, %p1768_p0 }
  0x57   : > { %1778 = shalt.err (!%p1775_p8)
}
  0x58   : > { %1584 = dma.hbm_to_vmem [thread:$0]  (!%p2112_p11), %s2686_s2, 16, %s267_s18, [#allocation7]  }
  0x59   : > { %s1994_s10 = smov [#allocation11]   ;;  %s1779_s17 = scalar_lea.hbm %s2688_s4, 16 }
  0x5a   : > { %s288_s22 = sshll.u32 %s1994_s10, 4  ;;  %p1780_p6 = scmp.ne.s32.totalorder %s2688_s4, %s1779_s17  ;;  %s289_s22 = int_to_ptr.vmem [resolvable:$true] %s288_s22 }
  0x5b   : > { %p1786_p10 = scmp.lt.u32.totalorder %s1779_s17, %s2688_s4 }
  0x5c   : > { %p1782_p4 = pnand %p1780_p6, %p2128_p13 }
  0x5e   : > { %p1783_p8 = pneg %p1782_p4 }
  0x60   : > { %p1788_p3 = pnand %p1786_p10, %p1783_p8 }
  0x62   : > { %1791 = shalt.err (!%p1788_p3)
}
  0x63   : > { %s1792_s18 = scalar_lea.vmem %s289_s22, 16  ;;  %s1799_s7 = scalar_lea.vmem %s289_s22, 32 }
  0x64   : > { %p1793_p5 = scmp.ne.s32.totalorder %s289_s22, %s1792_s18  ;;  %p1800_p12 = scmp.lt.s32.totalorder %s289_s22, %s289_s22 }
  0x65   : > { %p1801_p0 = scmp.lt.s32.totalorder %s1799_s7, %s1792_s18 }
  0x66   : > { %p1795_p7 = pnand %p1793_p5, %p2128_p13 }
  0x67   : > { %p1802_p1 = por %p1801_p0, %p1800_p12 }
  0x68   : > { %p1796_p9 = pneg %p1795_p7 }
  0x6a   : > { %p1803_p2 = pnand %p1802_p1, %p1796_p9 }
  0x6c   : > { %1806 = shalt.err (!%p1803_p2)
}
  0x6d   : > { %1590 = dma.hbm_to_vmem [thread:$0]  (!%p2112_p11), %s2688_s4, 16, %s289_s22, [#allocation10]  }
  0x6e   : > { %s41_s12 = sadd.s32 1, %s1983_s28  ;;  %s48_s23 = sadd.s32 1, %s1975_s26 }
  0x6f   : > { %p43_p13 = scmp.ge.s32.totalorder %s41_s12, 2  ;;  %p55_p6 = scmp.ne.s32.totalorder %s1975_s26, %s1971_s25 }
  0x70   : > { %p56_p4 = scmp.eq.s32.totalorder %s1987_s29, 0  ;;  %p1609_p8 = scmp.lt.s32.totalorder %s1987_s29, 2 }
  0x71   : > { %s2728_s12 = smov (%p43_p13, %s41_s12), 0  ;;  %p2707_p3 = scmp.eq.s32.totalorder %s2080_s30, 1 }
  0x72   : > { %p57_p10 = por %p56_p4, %p55_p6  ;;  %s45_s15 = ssub.s32 %s1983_s28, %s2728_s12 }
  0x73   : > { %p2223_p5 = por %p2707_p3, %p55_p6  ;;  %s299_s17 = sand.u32 1, %s1975_s26  }
  0x74   : > { %p46_p7 = scmp.eq.s32.totalorder %s45_s15, 0  ;;  %s1391_s22 = sshll.u32 %s299_s17, 6 }
  0x75   : > { %s1479_s19 = sshll.u32 %s1983_s28, 10  ;;  %s303_s7 = scalar_lea.vmem [#allocation3], %s1391_s22 }
  0x76   : > { %s2232_s13 = scalar_select %p46_p7, %s1975_s26, %s48_s23  }
  0x77   : > { %s2237_s18 = scalar_lea.hbm %s2684_s0, %s1479_s19  ;;  %s310_s24 = sshll.u32 %s303_s7, 4  ;;  %s2245_s24 = int_to_ptr.vmem [resolvable:$true] %s310_s24 }
  0x78   : > { %p2241_p11 = pnand %p1609_p8, %p57_p10  ;;  %s2247_s23 = scalar_lea.sflag [#allocation4], %s299_s17 }
  0x79   : > { %s1807_s15 = scalar_lea.hbm %s2237_s18, 1024  ;;  %s1812_s8 = scalar_lea.hbm %s2684_s0, 2048 }
  0x7a   : > { %p1808_p9 = scmp.ne.s32.totalorder %s2237_s18, %s1807_s15  ;;  %p1809_p12 = pneg %p2241_p11 }
  0x7b   : > { %p1813_p2 = scmp.lt.u32.totalorder %s2237_s18, %s2684_s0  ;;  %p1814_p13 = scmp.lt.u32.totalorder %s1812_s8, %s1807_s15 }
  0x7c   : > { %p1810_p0 = pnand %p1809_p12, %p1808_p9  ;;  %p1816_p4 = scmp.lt.u32.totalorder %s1807_s15, %s2237_s18 }
  0x7d   : > { %p1815_p6 = por %p1814_p13, %p1813_p2 }
  0x7e   : > { %p1811_p1 = pneg %p1810_p0 }
  0x7f   : > { %p1817_p8 = por %p1816_p4, %p1815_p6 }
  0x81   : > { %p1818_p10 = pnand %p1817_p8, %p1811_p1 }
  0x83   : > { %1821 = shalt.err (!%p1818_p10)
}
  0x84   : > { %s1822_s17 = scalar_lea.vmem %s2245_s24, 1024  ;;  %s1995_s22 = smov [#allocation3]  }
  0x85   : > { %p1823_p3 = scmp.ne.s32.totalorder %s2245_s24, %s1822_s17  ;;  %s1827_s19 = sshll.u32 %s1995_s22, 4  ;;  %s1828_s19 = int_to_ptr.vmem [resolvable:$false] %s1827_s19 }
  0x86   : > { %s1829_s16 = scalar_lea.vmem %s1828_s19, 2048  ;;  %p1830_p0 = scmp.lt.s32.totalorder %s2245_s24, %s1828_s19 }
  0x87   : > { %p1825_p7 = pnand %p1823_p3, %p1809_p12  ;;  %p1831_p2 = scmp.lt.s32.totalorder %s1829_s16, %s1822_s17 }
  0x89   : > { %p1826_p9 = pneg %p1825_p7  ;;  %p1832_p13 = por %p1831_p2, %p1830_p0 }
  0x8b   : > { %p1833_p6 = pnand %p1832_p13, %p1826_p9 }
  0x8d   : > { %1836 = shalt.err (!%p1833_p6)
}
  0x8e   : > { %1594 = dma.hbm_to_vmem [thread:$0]  (!%p2241_p11), %s2237_s18, 1024, %s2245_s24, %s2247_s23, %s1992_s20, %s1992_s20, %s1993_s21  }
  0x8f   : > { %p2710_p12 = scmp.ne.s32.totalorder %s2704_s11, 0 }
  0x90   : > { %s2281_s15 = sand.u32 (!%p2710_p12), 1, %s1971_s25   ;;  %p2711_p1 = scmp.ne.s32.totalorder (!%p2710_p12), %s2701_s9, 0 }
  0x91   : > { %322 = sbr.rel (%p2710_p12) target bundleno = 711 (0x2c7), region = 40  ;;  %s1395_s8 = sshll.u32 (!%p2710_p12), %s2281_s15, 6 }
  0x92   : > { %s325_s7 = scalar_lea.sflag (!%p2710_p12), [#allocation4], %s2281_s15  ;;  %s2287_s10 = scalar_lea.vmem (!%p2710_p12), [#allocation3], %s1395_s8 }
  0x98   : > { %1946 = dma.done.wait (%p2711_p1), %s325_s7, 1024  }
  0x99   : > { %1948 = vsyncadd (%p2711_p1), %s325_s7, 4294966272  ;;  %p2712_p11 = scmp.eq.s32.totalorder %s2080_s30, 0 }
  0x9b   : > { %1950 = dma.done.wait (%p2712_p11), [#allocation7], 1168   ;;  %p2713_p4 = pmov %p2712_p11 }
  0x9d   : > { %1952 = vsyncadd (%p2713_p4), [#allocation7], 4294966128  ;;  %p2714_p8 = pmov %p2713_p4 }
  0x9e   : > { %p2715_p10 = pmov %p2713_p4 }
  0x9f   : > { %1954 = dma.done.wait (%p2714_p8), [#allocation10], 32  }
  0xa0   : > { %1956 = vsyncadd (%p2715_p10), [#allocation10], 4294967264  ;;  %vm390_vm0 = vcmask 64512   ;;  %vm393_vm1 = vcmask 57344   ;;  %v1996_v0 = vmov 0.0   ;;  %v422_v1 = vld [vmem:[%s2287_s10] sm:$0xff] }
  0xa1   : > { %392 = vst.msk [vmem:[#allocation2 + $0x8] sm:$0xff] %vm390_vm0, %v1996_v0  ;;  %391 = vst.msk [vmem:[#allocation2] sm:$0xff] %vm390_vm0, %v1996_v0  ;;  %v1403_v2 = vld [vmem:[#allocation9] ss:$0 sm:$0xff]  ;;  %v1404_v3 = vld [vmem:[#allocation11] ss:$0 sm:$0xff] }
  0xa2   : > { %394 = vst.msk [vmem:[#allocation2 + $0x10] sm:$0x1] %vm393_vm1, %v1996_v0  ;;  %397 = vst.msk [vmem:[#allocation2 + $0x28] sm:$0x1] %vm393_vm1, %v1996_v0  ;;  %v437_v6 = vmul.f32 %v1403_v2, %v422_v1  ;;  %v423_v7 = vld [vmem:[%s2287_s10 + $0x8] sm:$0xff]  ;;  %s1997_s9 = smov 16  }
  0xa3   : > { %395 = vst.msk [vmem:[#allocation2 + $0x18] sm:$0xff] %vm390_vm0, %v1996_v0  ;;  %396 = vst.msk [vmem:[#allocation2 + $0x20] sm:$0xff] %vm390_vm0, %v1996_v0  ;;  %s1998_s11 = smov 8   ;;  %v438_v8 = vmul.f32 %v1403_v2, %v423_v7  ;;  %v424_v9 = vld [vmem:[%s2287_s10 + $0x10] sm:$0xff]  ;;  %v425_v10 = vld [vmem:[%s2287_s10 + $0x18] sm:$0xff]  ;;  %s1999_s20 = smov 24  }
  0xa4   : > { %398 = vst.msk [vmem:[#allocation2 + $0x30] sm:$0xff] %vm390_vm0, %v1996_v0  ;;  %399 = vst.msk [vmem:[#allocation2 + $0x38] sm:$0xff] %vm390_vm0, %v1996_v0  ;;  %v452_v11 = vadd.f32 %v1404_v3, %v437_v6  ;;  %v439_v12 = vmul.f32 %v1403_v2, %v424_v9  ;;  %v440_v13 = vmul.f32 %v1403_v2, %v425_v10  ;;  %v426_v14 = vld [vmem:[%s2287_s10 + $0x20] sm:$0xff]  ;;  %v427_v15 = vld [vmem:[%s2287_s10 + $0x28] sm:$0xff]  ;;  %s2000_s21 = smov 32   ;;  %s2001_s18 = smov 40  }
  0xa5   : > { %400 = vst.msk [vmem:[#allocation2 + $0x40] sm:$0x1] %vm393_vm1, %v1996_v0  ;;  %403 = vst.msk [vmem:[#allocation2 + $0x58] sm:$0x1] %vm393_vm1, %v1996_v0  ;;  %v428_v16 = vld [vmem:[%s2287_s10 + $0x30] sm:$0xff]  ;;  %v453_v17 = vadd.f32 %v1404_v3, %v438_v8  ;;  %v441_v18 = vmul.f32 %v1403_v2, %v426_v14  ;;  %v442_v19 = vmul.f32 %v1403_v2, %v427_v15  ;;  %v429_v32 = vld [vmem:[%s2287_s10 + $0x38] sm:$0xff] }
  0xa6   : > { %401 = vst.msk [vmem:[#allocation2 + $0x48] sm:$0xff] %vm390_vm0, %v1996_v0  ;;  %402 = vst.msk [vmem:[#allocation2 + $0x50] sm:$0xff] %vm390_vm0, %v1996_v0  ;;  %v468_v20 = vmin.f32 %v452_v11, 0.0  ;;  %v454_v21 = vadd.f32 %v1404_v3, %v439_v12  ;;  %v455_v22 = vadd.f32 %v1404_v3, %v440_v13  ;;  %v443_v26 = vmul.f32 %v1403_v2, %v428_v16  ;;  %v518_v10 = vld [vmem:[#allocation6] sm:$0xff]  ;;  %v520_v15 = vld [vmem:[#allocation6 + $0x10] sm:$0xff]  ;;  %s2002_s24 = smov 48  }
  0xa7   : > { %404 = vst.msk [vmem:[#allocation2 + $0x60] sm:$0xff] %vm390_vm0, %v1996_v0  ;;  %405 = vst.msk [vmem:[#allocation2 + $0x68] sm:$0xff] %vm390_vm0, %v1996_v0  ;;  %v469_v23 = vmin.f32 %v453_v17, 0.0  ;;  %v456_v24 = vadd.f32 %v1404_v3, %v441_v18  ;;  %v457_v25 = vadd.f32 %v1404_v3, %v442_v19  ;;  %v444_v39 = vmul.f32 %v1403_v2, %v429_v32  ;;  %v521_v16 = vld [vmem:[#allocation6 + $0x18] sm:$0xff]  ;;  %v522_v18 = vld [vmem:[#allocation6 + $0x20] sm:$0xff]  ;;  %s2003_s23 = smov 56  }
  0xa8   : > { %406 = vst.msk [vmem:[#allocation2 + $0x70] sm:$0x1] %vm393_vm1, %v1996_v0  ;;  %409 = vst.msk [vmem:[#allocation2 + $0x88] sm:$0x1] %vm393_vm1, %v1996_v0  ;;  %v538_v5 = vld [vmem:[#allocation2 + $0x8] sm:$0xff]  ;;  %v470_v28 = vmin.f32 %v454_v21, 0.0  ;;  %v458_v37 = vadd.f32 %v1404_v3, %v443_v26 }
  0xa9   : > { %407 = vst.msk [vmem:[#allocation2 + $0x78] sm:$0xff] %vm390_vm0, %v1996_v0  ;;  %408 = vst.msk [vmem:[#allocation2 + $0x80] sm:$0xff] %vm390_vm0, %v1996_v0  ;;  %v546_v4 = vld [vmem:[#allocation2 + $0x9] sm:$0xff]  ;;  %616 = vrot.lane.b32.xlu0 %v538_v5, %s1998_s11  ;;  %v476_v27 = vmul.f32 1.442695, %v468_v20  ;;  %v471_v30 = vmin.f32 %v455_v22, 0.0  ;;  %v459_v41 = vadd.f32 %v1404_v3, %v444_v39 }
  0xaa   : > { %410 = vst.msk [vmem:[#allocation2 + $0x90] sm:$0xff] %vm390_vm0, %v1996_v0  ;;  %411 = vst.msk [vmem:[#allocation2 + $0x98] sm:$0xff] %vm390_vm0, %v1996_v0  ;;  %648 = vrot.lane.b32.xlu1 %v546_v4, %s1997_s9  ;;  %v478_v29 = vmul.f32 1.442695, %v469_v23  ;;  %v472_v31 = vmin.f32 %v456_v24, 0.0  ;;  %v473_v34 = vmin.f32 %v457_v25, 0.0 }
  0xab   : > { %412 = vst.msk [vmem:[#allocation2 + $0xa0] sm:$0x1] %vm393_vm1, %v1996_v0  ;;  %415 = vst.msk [vmem:[#allocation2 + $0xb8] sm:$0x1] %vm393_vm1, %v1996_v0  ;;  %1679 = vpow2.f32 %v476_v27  ;;  %v480_v33 = vmul.f32 1.442695, %v470_v28 }
  0xac   : > { %413 = vst.msk [vmem:[#allocation2 + $0xa8] sm:$0xff] %vm390_vm0, %v1996_v0  ;;  %414 = vst.msk [vmem:[#allocation2 + $0xb0] sm:$0xff] %vm390_vm0, %v1996_v0  ;;  %1681 = vpow2.f32 %v478_v29  ;;  %v482_v35 = vmul.f32 1.442695, %v471_v30  ;;  %v484_v36 = vmul.f32 1.442695, %v472_v31 }
  0xad   : > { %416 = vst.msk [vmem:[#allocation2 + $0xc0] sm:$0xff] %vm390_vm0, %v1996_v0  ;;  %417 = vst.msk [vmem:[#allocation2 + $0xc8] sm:$0xff] %vm390_vm0, %v1996_v0  ;;  %1683 = vpow2.f32 %v480_v33  ;;  %v486_v38 = vmul.f32 1.442695, %v473_v34  ;;  %v474_v40 = vmin.f32 %v458_v37, 0.0  ;;  %v475_v43 = vmin.f32 %v459_v41, 0.0 }
  0xae   : > { %418 = vst.msk [vmem:[#allocation2 + $0xd0] sm:$0x1] %vm393_vm1, %v1996_v0  ;;  %421 = vst.msk [vmem:[#allocation2 + $0xe8] sm:$0x1] %vm393_vm1, %v1996_v0  ;;  %1685 = vpow2.f32 %v482_v35  ;;  %vm460_vm2 = vcmp.gt.f32.partialorder %v452_v11, 0.0  ;;  %vm461_vm3 = vcmp.gt.f32.partialorder %v453_v17, 0.0 }
  0xaf   : > { %419 = vst.msk [vmem:[#allocation2 + $0xd8] sm:$0xff] %vm390_vm0, %v1996_v0  ;;  %420 = vst.msk [vmem:[#allocation2 + $0xe0] sm:$0xff] %vm390_vm0, %v1996_v0  ;;  %1687 = vpow2.f32 %v484_v36  ;;  %v488_v42 = vmul.f32 1.442695, %v474_v40  ;;  %v490_v44 = vmul.f32 1.442695, %v475_v43 }
  0xb0   : > { %1689 = vpow2.f32 %v486_v38  ;;  %vm462_vm4 = vcmp.gt.f32.partialorder %v454_v21, 0.0  ;;  %vm463_vm5 = vcmp.gt.f32.partialorder %v455_v22, 0.0  ;;  %vm464_vm6 = vcmp.gt.f32.partialorder %v456_v24, 0.0  ;;  %v523_v19 = vld [vmem:[#allocation6 + $0x28] sm:$0xff]  ;;  %v524_v23 = vld [vmem:[#allocation6 + $0x30] sm:$0xff]  ;;  %v526_v26 = vld [vmem:[#allocation6 + $0x40] sm:$0xff] }
  0xb1   : > { %1691 = vpow2.f32 %v488_v42  ;;  %vm465_vm7 = vcmp.gt.f32.partialorder %v457_v25, 0.0  ;;  %vm466_vm8 = vcmp.gt.f32.partialorder %v458_v37, 0.0  ;;  %vm467_vm9 = vcmp.gt.f32.partialorder %v459_v41, 0.0  ;;  %s2004_s17 = smov 64   ;;  %s2522_s22 = scalar_lea.vmem [#allocation12], %s1395_s8 }
  0xb2   : > { %1693 = vpow2.f32 %v490_v44  ;;  %v1536_v20 = vpack.c.bf16 %v523_v19, %v522_v18  ;;  %vm873_vm10 = vcmask 130048   ;;  %vm882_vm11 = vcmask 195584   ;;  %s1480_s19 = sshll.u32 %s1979_s27, 10  ;;  %s1160_s16 = sshll.u32 %s2522_s22, 4  ;;  %s2555_s16 = int_to_ptr.vmem [resolvable:$true] %s1160_s16 }
  0xb3   : > { %vm891_vm12 = vcmask 261120   ;;  %vm900_vm13 = vcmask 326656   ;;  %vm909_vm14 = vcmask 392192   ;;  %vm918_vm15 = vcmask 457728   ;;  %s2553_s10 = scalar_lea.hbm %s2689_s5, %s1480_s19 }
  0xb4   : > { %vm927_vm1 = vcmask 523264  }
  0xb5   : > { %v1680_v45 = vpop.eup %1679 }
  0xb6   : > { %v1682_v46 = vpop.eup %1681  ;;  %v1405_v47 = vadd.f32 -1.0, %v1680_v45  ;;  %v1444_v44 = vld [vmem:[#allocation2 + $0xdf] sm:$0xff] }
  0xb7   : > { %v1684_v48 = vpop.eup %1683  ;;  %v1406_v49 = vadd.f32 -1.0, %v1682_v46  ;;  %v1452_v45 = vld [vmem:[#allocation2 + $0xe0] sm:$0xff] }
  0xb8   : > { %v1686_v50 = vpop.eup %1685  ;;  %v500_v51 = vsel %vm460_vm2, %v452_v11, %v1405_v47  ;;  %v1407_v52 = vadd.f32 -1.0, %v1684_v48  ;;  %v519_v11 = vld [vmem:[#allocation6 + $0x8] sm:$0xff]  ;;  %v1460_v48 = vld [vmem:[#allocation2 + $0xe1] sm:$0xff]  ;;  %vm942_vm2 = vcmask 588800  }
  0xb9   : > { %v1688_v53 = vpop.eup %1687  ;;  %509 = vst.msk [vmem:[#allocation2 + $0x20] sm:$0xff] %vm390_vm0, %v500_v51  ;;  %v501_v54 = vsel %vm461_vm3, %v453_v17, %v1406_v49  ;;  %v1408_v55 = vadd.f32 -1.0, %v1686_v50  ;;  %v1528_v12 = vpack.c.bf16 %v519_v11, %v518_v10  ;;  %v1532_v17 = vpack.c.bf16 %v521_v16, %v520_v15 }
  0xba   : > { %v1690_v56 = vpop.eup %1689  ;;  %510 = vst.msk [vmem:[#allocation2 + $0x38] sm:$0xff] %vm390_vm0, %v501_v54  ;;  %v502_v57 = vsel %vm462_vm4, %v454_v21, %v1407_v52  ;;  %v1409_v58 = vadd.f32 -1.0, %v1688_v53 }
  0xbb   : > { %511 = vst.msk [vmem:[#allocation2 + $0x50] sm:$0xff] %vm390_vm0, %v502_v57  ;;  %v503_v59 = vsel %vm463_vm5, %v455_v22, %v1408_v55  ;;  %v1410_v60 = vadd.f32 -1.0, %v1690_v56  ;;  %v1692_v61 = vpop.eup %1691  ;;  %1529 = vmatprep.subr.bf16.mxu0 %v1528_v12  ;;  %1544 = vmatprep.subr.bf16.mxu1 %v1528_v12 }
  0xbc   : > { %512 = vst.msk [vmem:[#allocation2 + $0x68] sm:$0xff] %vm390_vm0, %v503_v59  ;;  %v504_v62 = vsel %vm464_vm6, %v456_v24, %v1409_v58  ;;  %v1411_v0 = vadd.f32 -1.0, %v1692_v61  ;;  %v1694_v1 = vpop.eup %1693  ;;  %1531 = vmatpush3.bf16.msra.mxu0 %v1528_v12  ;;  %1549 = vmatpush3.bf16.msra.mxu1 %v1528_v12  ;;  %v525_v24 = vld [vmem:[#allocation6 + $0x38] sm:$0xff] }
  0xbd   : > { %513 = vst.msk [vmem:[#allocation2 + $0x80] sm:$0xff] %vm390_vm0, %v504_v62  ;;  %v505_v63 = vsel %vm465_vm7, %v457_v25, %v1410_v60  ;;  %v1412_v5 = vadd.f32 -1.0, %v1694_v1  ;;  %1533 = vmatprep.subr.bf16.mxu0 %v1532_v17  ;;  %1545 = vmatprep.subr.bf16.mxu1 %v1532_v17  ;;  %v1540_v25 = vpack.c.bf16 %v525_v24, %v524_v23  ;;  %v530_v61 = vld [vmem:[#allocation2 + $0x7] sm:$0xff] }
  0xbe   : > { %514 = vst.msk [vmem:[#allocation2 + $0x98] sm:$0xff] %vm390_vm0, %v505_v63  ;;  %v506_v2 = vsel %vm466_vm8, %v458_v37, %v1411_v0 }
  0xbf   : > { %515 = vst.msk [vmem:[#allocation2 + $0xb0] sm:$0xff] %vm390_vm0, %v506_v2  ;;  %v507_v8 = vsel %vm467_vm9, %v459_v41, %v1412_v5 }
  0xc0   : > { %v547_v3 = vld [vmem:[#allocation2 + $0x21] sm:$0xff]  ;;  %516 = vst.msk [vmem:[#allocation2 + $0xc8] sm:$0xff] %vm390_vm0, %v507_v8  ;;  %1535 = vmatpush3.bf16.msra.mxu0 %v1532_v17  ;;  %1550 = vmatpush3.bf16.msra.mxu1 %v1532_v17 }
  0xc1   : > { %v539_v4 = vld [vmem:[#allocation2 + $0x20] sm:$0xff]  ;;  %650 = vrot.lane.b32.xlu1 %v547_v3, %s1997_s9  ;;  %v2350_v6 = vld [vmem:[#allocation2 + $0x37] sm:$0xff]  ;;  %1537 = vmatprep.subr.bf16.mxu0 %v1536_v20 }
  0xc2   : > { %618 = vrot.lane.b32.xlu0 %v539_v4, %s1998_s11  ;;  %v2352_v7 = vld [vmem:[#allocation2 + $0x1f] sm:$0xff]  ;;  %v541_v14 = vld [vmem:[#allocation2 + $0x50] sm:$0xff]  ;;  %1546 = vmatprep.subr.bf16.mxu1 %v1536_v20 }
  0xc3   : > { %v540_v9 = vld [vmem:[#allocation2 + $0x38] sm:$0xff]  ;;  %v2368_v21 = vld [vmem:[#allocation2 + $0x4f] sm:$0xff]  ;;  %v2376_v27 = vld [vmem:[#allocation2 + $0x67] sm:$0xff] }
  0xc4   : > { %v548_v13 = vld [vmem:[#allocation2 + $0x39] sm:$0xff]  ;;  %v549_v22 = vld [vmem:[#allocation2 + $0x51] sm:$0xff]  ;;  %1539 = vmatpush3.bf16.msra.mxu0 %v1536_v20  ;;  %1551 = vmatpush3.bf16.msra.mxu1 %v1536_v20  ;;  %v1424_v28 = vld [vmem:[#allocation2 + $0x68] sm:$0xff] }
  0xc5   : > { %682 = vrot.lane.b32.xlu1 %v2350_v6, %s1999_s20  ;;  %1541 = vmatprep.subr.bf16.mxu0 %v1540_v25  ;;  %v550_v29 = vld [vmem:[#allocation2 + $0x69] sm:$0xff]  ;;  %v543_v30 = vld [vmem:[#allocation2 + $0x80] sm:$0xff]  ;;  %v2400_v33 = vld [vmem:[#allocation2 + $0x97] sm:$0xff] }
  0xc6   : > { %680 = vrot.lane.b32.xlu0 %v2352_v7, %s1999_s20  ;;  %1547 = vmatprep.subr.bf16.mxu1 %v1540_v25  ;;  %v2392_v31 = vld [vmem:[#allocation2 + $0x7f] sm:$0xff]  ;;  %v545_v36 = vld [vmem:[#allocation2 + $0xb0] sm:$0xff] }
  0xc7   : > { %v551_v32 = vld [vmem:[#allocation2 + $0x81] sm:$0xff]  ;;  %v1426_v34 = vld [vmem:[#allocation2 + $0x98] sm:$0xff]  ;;  %v2416_v37 = vld [vmem:[#allocation2 + $0xaf] sm:$0xff] }
  0xc8   : > { %1543 = vmatpush3.bf16.msra.mxu0 %v1540_v25  ;;  %1552 = vmatpush3.bf16.msra.mxu1 %v1540_v25  ;;  %v552_v35 = vld [vmem:[#allocation2 + $0x99] sm:$0xff]  ;;  %v553_v38 = vld [vmem:[#allocation2 + $0xb1] sm:$0xff]  ;;  %v1420_v39 = vld [vmem:[#allocation2 + $0xc7] sm:$0xff] }
  0xc9   : > { %620 = vrot.lane.b32.xlu1 %v540_v9, %s1998_s11  ;;  %1514 = vmatprep.subr.mxu0 %v526_v26  ;;  %v1428_v40 = vld [vmem:[#allocation2 + $0xc8] sm:$0xff] }
  0xca   : > { %712 = vrot.lane.b32.xlu0 %v539_v4, %s2000_s21  ;;  %1548 = vmatprep.subr.mxu1 %v526_v26  ;;  %v1436_v41 = vld [vmem:[#allocation2 + $0xc9] sm:$0xff] }
  0xcc   : > { %1515 = vmatpush3.msra.mxu0 %v526_v26  ;;  %1553 = vmatpush3.msra.mxu1 %v526_v26 }
  0xcd   : > { %744 = vrot.lane.b32.xlu1 %v547_v3, %s2001_s18 }
  0xce   : > { %714 = vrot.lane.b32.xlu0 %v540_v9, %s2000_s21 }
  0xd1   : > { %652 = vrot.lane.b32.xlu1 %v548_v13, %s1997_s9 }
  0xd2   : > { %622 = vrot.lane.b32.xlu0 %v541_v14, %s1998_s11 }
  0xd5   : > { %776 = vrot.lane.b32.xlu1 %v2350_v6, %s2002_s24 }
  0xd6   : > { %746 = vrot.lane.b32.xlu0 %v548_v13, %s2001_s18 }
  0xd9   : > { %684 = vrot.lane.b32.xlu1 %v2368_v21, %s1999_s20 }
  0xda   : > { %654 = vrot.lane.b32.xlu0 %v549_v22, %s1997_s9 }
  0xdd   : > { %808 = vrot.lane.b32.xlu1 %v540_v9, %s2003_s23 }
  0xde   : > { %778 = vrot.lane.b32.xlu0 %v2368_v21, %s2002_s24 }
  0xe1   : > { %716 = vrot.lane.b32.xlu1 %v541_v14, %s2000_s21 }
  0xe2   : > { %686 = vrot.lane.b32.xlu0 %v2376_v27, %s1999_s20 }
  0xe5   : > { %840 = vrot.lane.b32.xlu1 %v548_v13, %s2004_s17 }
  0xe6   : > { %810 = vrot.lane.b32.xlu0 %v541_v14, %s2003_s23 }
  0xe9   : > { %718 = vrot.lane.b32.xlu1 %v1424_v28, %s2000_s21 }
  0xea   : > { %624 = vrot.lane.b32.xlu0 %v1424_v28, %s1998_s11 }
  0xed   : > { %842 = vrot.lane.b32.xlu1 %v549_v22, %s2004_s17 }
  0xee   : > { %748 = vrot.lane.b32.xlu0 %v549_v22, %s2001_s18 }
  0xf1   : > { %656 = vrot.lane.b32.xlu1 %v550_v29, %s1997_s9 }
  0xf2   : > { %626 = vrot.lane.b32.xlu0 %v543_v30, %s1998_s11 }
  0xf5   : > { %780 = vrot.lane.b32.xlu1 %v2376_v27, %s2002_s24 }
  0xf6   : > { %750 = vrot.lane.b32.xlu0 %v550_v29, %s2001_s18 }
  0xf9   : > { %688 = vrot.lane.b32.xlu1 %v2392_v31, %s1999_s20 }
  0xfa   : > { %658 = vrot.lane.b32.xlu0 %v551_v32, %s1997_s9 }
  0xfd   : > { %812 = vrot.lane.b32.xlu1 %v1424_v28, %s2003_s23 }
  0xfe   : > { %782 = vrot.lane.b32.xlu0 %v2392_v31, %s2002_s24 }
 0x101   : > { %720 = vrot.lane.b32.xlu1 %v543_v30, %s2000_s21 }
 0x102   : > { %690 = vrot.lane.b32.xlu0 %v2400_v33, %s1999_s20 }
 0x105   : > { %844 = vrot.lane.b32.xlu1 %v550_v29, %s2004_s17 }
 0x106   : > { %814 = vrot.lane.b32.xlu0 %v543_v30, %s2003_s23 }
 0x109   : > { %722 = vrot.lane.b32.xlu1 %v1426_v34, %s2000_s21 }
 0x10a   : > { %628 = vrot.lane.b32.xlu0 %v1426_v34, %s1998_s11 }
 0x10d   : > { %846 = vrot.lane.b32.xlu1 %v551_v32, %s2004_s17 }
 0x10e   : > { %752 = vrot.lane.b32.xlu0 %v551_v32, %s2001_s18 }
 0x111   : > { %660 = vrot.lane.b32.xlu1 %v552_v35, %s1997_s9 }
 0x112   : > { %630 = vrot.lane.b32.xlu0 %v545_v36, %s1998_s11 }
 0x115   : > { %784 = vrot.lane.b32.xlu1 %v2400_v33, %s2002_s24 }
 0x116   : > { %754 = vrot.lane.b32.xlu0 %v552_v35, %s2001_s18 }
 0x119   : > { %692 = vrot.lane.b32.xlu1 %v2416_v37, %s1999_s20 }
 0x11a   : > { %662 = vrot.lane.b32.xlu0 %v553_v38, %s1997_s9  ;;  %s1135_s9 = scalar_lea.sflag [#allocation5], %s2281_s15 }
 0x11b   : > { %v617_v43 = vpop.permute.xlu0 %616 }
 0x11c   : > { %v649_v42 = vpop.permute.xlu1 %648  ;;  %v865_v62 = vsel %vm390_vm0, %v530_v61, %v617_v43 }
 0x11d   : > { %816 = vrot.lane.b32.xlu1 %v1426_v34, %s2003_s23  ;;  %v874_v1 = vsel %vm873_vm10, %v865_v62, %v649_v42 }
 0x11e   : > { %786 = vrot.lane.b32.xlu0 %v2416_v37, %s2002_s24 }
 0x121   : > { %724 = vrot.lane.b32.xlu1 %v545_v36, %s2000_s21 }
 0x122   : > { %694 = vrot.lane.b32.xlu0 %v1420_v39, %s1999_s20  ;;  %s1837_s20 = scalar_lea.vmem %s2555_s16, 1024 }
 0x123   : > { %p1838_p3 = scmp.ne.s32.totalorder %s2555_s16, %s1837_s20 }
 0x125   : > { %848 = vrot.lane.b32.xlu1 %v552_v35, %s2004_s17  ;;  %p1839_p7 = pnand %p1838_p3, %p2223_p5 }
 0x126   : > { %818 = vrot.lane.b32.xlu0 %v545_v36, %s2003_s23 }
 0x127   : > { %p1840_p9 = pneg %p1839_p7 }
 0x129   : > { %756 = vrot.lane.b32.xlu1 %v553_v38, %s2001_s18 }
 0x12a   : > { %726 = vrot.lane.b32.xlu0 %v1428_v40, %s2000_s21  ;;  %s2005_s21 = smov [#allocation12]  }
 0x12d   : > { %758 = vrot.lane.b32.xlu1 %v1436_v41, %s2001_s18  ;;  %s1841_s18 = sshll.u32 %s2005_s21, 4  ;;  %s1842_s18 = int_to_ptr.vmem [resolvable:$false] %s1841_s18 }
 0x12e   : > { %850 = vrot.lane.b32.xlu0 %v553_v38, %s2004_s17  ;;  %p1844_p0 = scmp.lt.s32.totalorder %s2555_s16, %s1842_s18 }
 0x131   : > { %790 = vrot.lane.b32.xlu1 %v1444_v44, %s2002_s24 }
 0x132   : > { %788 = vrot.lane.b32.xlu0 %v1420_v39, %s2002_s24  ;;  %s1843_s24 = scalar_lea.vmem %s1842_s18, 2048 }
 0x133   : > { %v651_v46 = vpop.permute.xlu1 %650  ;;  %p1845_p2 = scmp.lt.s32.totalorder %s1843_s24, %s1837_s20 }
 0x134   : > { %v619_v47 = vpop.permute.xlu0 %618 }
 0x135   : > { %822 = vrot.lane.b32.xlu1 %v1452_v45, %s2003_s23  ;;  %v866_v10 = vsel %vm390_vm0, %v2352_v7, %v619_v47  ;;  %p1846_p13 = por %p1845_p2, %p1844_p0 }
 0x136   : > { %820 = vrot.lane.b32.xlu0 %v1428_v40, %s2003_s23  ;;  %v875_v15 = vsel %vm873_vm10, %v866_v10, %v651_v46 }
 0x137   : > { %v683_v49 = vpop.permute.xlu1 %682  ;;  %p1847_p6 = pnand %p1846_p13, %p1840_p9 }
 0x138   : > { %v681_v50 = vpop.permute.xlu0 %680  ;;  %v884_v16 = vsel %vm882_vm11, %v875_v15, %v683_v49 }
 0x139   : > { %854 = vrot.lane.b32.xlu1 %v1460_v48, %s2004_s17  ;;  %v883_v2 = vsel %vm882_vm11, %v874_v1, %v681_v50 }
 0x13a   : > { %852 = vrot.lane.b32.xlu0 %v1436_v41, %s2004_s17 }
 0x13b   : > { %v621_v51 = vpop.permute.xlu1 %620 }
 0x13c   : > { %v713_v52 = vpop.permute.xlu0 %712  ;;  %v867_v38 = vsel %vm390_vm0, %v2350_v6, %v621_v51 }
 0x13d   : > { %v892_v5 = vsel %vm891_vm12, %v883_v2, %v713_v52 }
 0x13f   : > { %v745_v53 = vpop.permute.xlu1 %744 }
 0x140   : > { %v715_v54 = vpop.permute.xlu0 %714  ;;  %v901_v8 = vsel %vm900_vm13, %v892_v5, %v745_v53 }
 0x141   : > { %v893_v19 = vsel %vm891_vm12, %v884_v16, %v715_v54 }
 0x143   : > { %v653_v55 = vpop.permute.xlu1 %652 }
 0x144   : > { %v2438_v56 = vpop.permute.xlu0 %622  ;;  %v876_v39 = vsel %vm873_vm10, %v867_v38, %v653_v55 }
 0x145   : > { %v868_v6 = vsel %vm390_vm0, %v2368_v21, %v2438_v56 }
 0x147   : > { %v777_v57 = vpop.permute.xlu1 %776 }
 0x148   : > { %v747_v58 = vpop.permute.xlu0 %746  ;;  %v910_v9 = vsel %vm909_vm14, %v901_v8, %v777_v57 }
 0x149   : > { %v902_v20 = vsel %vm900_vm13, %v893_v19, %v747_v58 }
 0x14b   : > { %v685_v59 = vpop.permute.xlu1 %684 }
 0x14c   : > { %v655_v60 = vpop.permute.xlu0 %654  ;;  %v885_v40 = vsel %vm882_vm11, %v876_v39, %v685_v59 }
 0x14d   : > { %v877_v50 = vsel %vm873_vm10, %v868_v6, %v655_v60 }
 0x14f   : > { %v809_v63 = vpop.permute.xlu1 %808 }
 0x150   : > { %v779_v0 = vpop.permute.xlu0 %778  ;;  %v919_v11 = vsel %vm918_vm15, %v910_v9, %v809_v63 }
 0x151   : > { %v911_v7 = vsel %vm909_vm14, %v902_v20, %v779_v0 }
 0x153   : > { %v717_v3 = vpop.permute.xlu1 %716 }
 0x154   : > { %v687_v4 = vpop.permute.xlu0 %686  ;;  %v894_v43 = vsel %vm891_vm12, %v885_v40, %v717_v3 }
 0x155   : > { %v886_v51 = vsel %vm882_vm11, %v877_v50, %v687_v4 }
 0x157   : > { %v841_v12 = vpop.permute.xlu1 %840 }
 0x158   : > { %v811_v13 = vpop.permute.xlu0 %810  ;;  %v928_v14 = vsel %vm927_vm1, %v919_v11, %v841_v12 }
 0x159   : > { %1516 = vmatprep.mubr.msk.f32.mxu0 %vm942_vm2, %v928_v14  ;;  %v920_v22 = vsel %vm918_vm15, %v911_v7, %v811_v13 }
 0x15b   : > { %v719_v17 = vpop.permute.xlu1 %718 }
 0x15c   : > { %v625_v18 = vpop.permute.xlu0 %624  ;;  %v895_v54 = vsel %vm891_vm12, %v886_v51, %v719_v17  ;;  %v1461_v51 = vld [vmem:[#allocation8] ss:$0 sm:$0xff] }
 0x15d   : > { %v869_v4 = vsel %vm390_vm0, %v2376_v27, %v625_v18 }
 0x15f   : > { %v843_v23 = vpop.permute.xlu1 %842 }
 0x160   : > { %v749_v24 = vpop.permute.xlu0 %748  ;;  %v929_v25 = vsel %vm927_vm1, %v920_v22, %v843_v23 }
 0x161   : > { %1517 = vmatmul.mubr.msk.f32.vlgmr.msra.gmra.mrb[0].mxu0 %vm942_vm2, %v929_v25  ;;  %v903_v44 = vsel %vm900_vm13, %v894_v43, %v749_v24 }
 0x163   : > { %v657_v26 = vpop.permute.xlu1 %656 }
 0x164   : > { %v627_v28 = vpop.permute.xlu0 %626  ;;  %v878_v5 = vsel %vm873_vm10, %v869_v4, %v657_v26 }
 0x165   : > { %v870_v27 = vsel %vm390_vm0, %v2392_v31, %v627_v28 }
 0x167   : > { %v781_v29 = vpop.permute.xlu1 %780 }
 0x168   : > { %v751_v30 = vpop.permute.xlu0 %750  ;;  %v912_v45 = vsel %vm909_vm14, %v903_v44, %v781_v29 }
 0x169   : > { %v904_v55 = vsel %vm900_vm13, %v895_v54, %v751_v30 }
 0x16b   : > { %v689_v32 = vpop.permute.xlu1 %688 }
 0x16c   : > { %v659_v34 = vpop.permute.xlu0 %658  ;;  %v887_v8 = vsel %vm882_vm11, %v878_v5, %v689_v32 }
 0x16d   : > { %v879_v18 = vsel %vm873_vm10, %v870_v27, %v659_v34 }
 0x16f   : > { %v813_v35 = vpop.permute.xlu1 %812 }
 0x170   : > { %v783_v36 = vpop.permute.xlu0 %782  ;;  %v921_v46 = vsel %vm918_vm15, %v912_v45, %v813_v35 }
 0x171   : > { %v913_v57 = vsel %vm909_vm14, %v904_v55, %v783_v36 }
 0x173   : > { %v721_v41 = vpop.permute.xlu1 %720 }
 0x174   : > { %v691_v42 = vpop.permute.xlu0 %690  ;;  %v896_v11 = vsel %vm891_vm12, %v887_v8, %v721_v41 }
 0x175   : > { %v888_v19 = vsel %vm882_vm11, %v879_v18, %v691_v42 }
 0x177   : > { %v845_v47 = vpop.permute.xlu1 %844 }
 0x178   : > { %v815_v48 = vpop.permute.xlu0 %814  ;;  %v930_v49 = vsel %vm927_vm1, %v921_v46, %v845_v47 }
 0x179   : > { %1519 = vmatprep.mubr.msk.f32.mxu0 %vm942_vm2, %v930_v49  ;;  %v922_v58 = vsel %vm918_vm15, %v913_v57, %v815_v48 }
 0x17b   : > { %v723_v52 = vpop.permute.xlu1 %722 }
 0x17c   : > { %v629_v53 = vpop.permute.xlu0 %628  ;;  %v897_v22 = vsel %vm891_vm12, %v888_v19, %v723_v52 }
 0x17d   : > { %v871_v32 = vsel %vm390_vm0, %v2400_v33, %v629_v53 }
 0x17f   : > { %v847_v59 = vpop.permute.xlu1 %846 }
 0x180   : > { %v753_v61 = vpop.permute.xlu0 %752  ;;  %v931_v21 = vsel %vm927_vm1, %v922_v58, %v847_v59 }
 0x181   : > { %1520 = vmatmul.mubr.msk.f32.gmra.mrb[2].mxu0 %vm942_vm2, %v931_v21  ;;  %v905_v12 = vsel %vm900_vm13, %v896_v11, %v753_v61 }
 0x183   : > { %v661_v56 = vpop.permute.xlu1 %660 }
 0x184   : > { %v631_v60 = vpop.permute.xlu0 %630  ;;  %v880_v35 = vsel %vm873_vm10, %v871_v32, %v661_v56 }
 0x185   : > { %v872_v34 = vsel %vm390_vm0, %v2416_v37, %v631_v60 }
 0x187   : > { %v785_v62 = vpop.permute.xlu1 %784 }
 0x188   : > { %v755_v63 = vpop.permute.xlu0 %754  ;;  %v914_v13 = vsel %vm909_vm14, %v905_v12, %v785_v62 }
 0x189   : > { %v906_v23 = vsel %vm900_vm13, %v897_v22, %v755_v63 }
 0x18b   : > { %v693_v0 = vpop.permute.xlu1 %692 }
 0x18c   : > { %v663_v1 = vpop.permute.xlu0 %662  ;;  %v889_v38 = vsel %vm882_vm11, %v880_v35, %v693_v0 }
 0x18d   : > { %v881_v36 = vsel %vm873_vm10, %v872_v34, %v663_v1 }
 0x18f   : > { %v817_v2 = vpop.permute.xlu1 %816 }
 0x190   : > { %v787_v3 = vpop.permute.xlu0 %786  ;;  %v923_v14 = vsel %vm918_vm15, %v914_v13, %v817_v2 }
 0x191   : > { %v915_v24 = vsel %vm909_vm14, %v906_v23, %v787_v3 }
 0x193   : > { %v725_v9 = vpop.permute.xlu1 %724 }
 0x194   : > { %v695_v10 = vpop.permute.xlu0 %694  ;;  %v898_v42 = vsel %vm891_vm12, %v889_v38, %v725_v9 }
 0x195   : > { %v890_v39 = vsel %vm882_vm11, %v881_v36, %v695_v10 }
 0x197   : > { %v849_v15 = vpop.permute.xlu1 %848 }
 0x198   : > { %v819_v16 = vpop.permute.xlu0 %818  ;;  %v932_v17 = vsel %vm927_vm1, %v923_v14, %v849_v15 }
 0x199   : > { %1522 = vmatprep.mubr.msk.f32.mxu1 %vm942_vm2, %v932_v17  ;;  %v924_v25 = vsel %vm918_vm15, %v915_v24, %v819_v16 }
 0x19b   : > { %v757_v20 = vpop.permute.xlu1 %756 }
 0x19c   : > { %v727_v7 = vpop.permute.xlu0 %726  ;;  %v907_v44 = vsel %vm900_vm13, %v898_v42, %v757_v20 }
 0x19d   : > { %v899_v43 = vsel %vm891_vm12, %v890_v39, %v727_v7 }
 0x19f   : > { %v759_v26 = vpop.permute.xlu1 %758 }
 0x1a0   : > { %v851_v29 = vpop.permute.xlu0 %850  ;;  %v908_v33 = vsel %vm900_vm13, %v899_v43, %v759_v26 }
 0x1a1   : > { %v933_v31 = vsel %vm927_vm1, %v924_v25, %v851_v29 }
 0x1a2   : > { %1523 = vmatmul.mubr.msk.f32.vlgmr.msra.gmra.mrb[0].mxu1 %vm942_vm2, %v933_v31 }
 0x1a3   : > { %v791_v28 = vpop.permute.xlu1 %790 }
 0x1a4   : > { %v789_v30 = vpop.permute.xlu0 %788  ;;  %v917_v37 = vsel %vm909_vm14, %v908_v33, %v791_v28 }
 0x1a5   : > { %v916_v45 = vsel %vm909_vm14, %v907_v44, %v789_v30 }
 0x1a7   : > { %v823_v40 = vpop.permute.xlu1 %822 }
 0x1a8   : > { %v821_v41 = vpop.permute.xlu0 %820  ;;  %v926_v46 = vsel %vm918_vm15, %v917_v37, %v823_v40 }
 0x1a9   : > { %v925_v47 = vsel %vm918_vm15, %v916_v45, %v821_v41 }
 0x1ab   : > { %v855_v48 = vpop.permute.xlu1 %854 }
 0x1ac   : > { %v853_v49 = vpop.permute.xlu0 %852  ;;  %v935_v6 = vsel %vm927_vm1, %v926_v46, %v855_v48 }
 0x1ad   : > { %v934_v50 = vsel %vm927_vm1, %v925_v47, %v853_v49 }
 0x1ae   : > { %1525 = vmatprep.mubr.msk.f32.mxu1 %vm942_vm2, %v934_v50 }
 0x1af   : > { %1526 = vmatmul.mubr.msk.f32.gmra.mrb[2].mxu1 %vm942_vm2, %v935_v6 }
 0x234   : > { %v1518_v52 = vpop.f32.mrb[0].mxu0 }
 0x235   : > { %v1039_v53 = vadd.f32 %v1518_v52, %v1461_v51  ;;  %v1033_v54 = vpop.f32.mrb[1].mxu0 }
 0x236   : > { %v1034_v55 = vadd.f32 %v1461_v51, %v1033_v54 }
 0x237   : > { %1073 = vst.msk [vmem:[%s2522_s22 + $0x8] sm:$0xff] %vm390_vm0, %v1039_v53  ;;  %v1081_v57 = vsel %vm390_vm0, %v1039_v53, 0.0  ;;  %v1103_v58 = vmul.f32 %v1039_v53, %v1039_v53 }
 0x238   : > { %1072 = vst.msk [vmem:[%s2522_s22] sm:$0xff] %vm390_vm0, %v1034_v55  ;;  %v1080_v59 = vsel %vm390_vm0, %v1034_v55, 0.0  ;;  %v1102_v61 = vmul.f32 %v1034_v55, %v1034_v55 }
 0x239   : > { %v1111_v21 = vsel %vm390_vm0, %v1103_v58, 0.0  ;;  %v1082_v56 = vadd.f32 %v1081_v57, %v1080_v59 }
 0x23a   : > { %v1110_v60 = vsel %vm390_vm0, %v1102_v61, 0.0 }
 0x23b   : > { %v1112_v62 = vadd.f32 %v1111_v21, %v1110_v60 }
 0x254   : > { %v1521_v63 = vpop.f32.mrb[2].mxu0 }
 0x255   : > { %v1049_v0 = vadd.f32 %v1521_v63, %v1461_v51  ;;  %v1043_v1 = vpop.f32.mrb[3].mxu0 }
 0x256   : > { %v1044_v2 = vadd.f32 %v1461_v51, %v1043_v1 }
 0x257   : > { %1075 = vst.msk [vmem:[%s2522_s22 + $0x18] sm:$0xff] %vm390_vm0, %v1049_v0  ;;  %v1105_v3 = vmul.f32 %v1049_v0, %v1049_v0  ;;  %v1085_v9 = vsel %vm390_vm0, %v1049_v0, 0.0 }
 0x258   : > { %1074 = vst.msk [vmem:[%s2522_s22 + $0x10] sm:$0xff] %vm390_vm0, %v1044_v2  ;;  %v1083_v4 = vsel %vm390_vm0, %v1044_v2, 0.0  ;;  %v1104_v5 = vmul.f32 %v1044_v2, %v1044_v2 }
 0x259   : > { %v1084_v8 = vadd.f32 %v1083_v4, %v1082_v56  ;;  %v1115_v13 = vsel %vm390_vm0, %v1105_v3, 0.0 }
 0x25a   : > { %v1113_v10 = vsel %vm390_vm0, %v1104_v5, 0.0 }
 0x25b   : > { %v1114_v11 = vadd.f32 %v1113_v10, %v1112_v62  ;;  %v1086_v12 = vadd.f32 %v1085_v9, %v1084_v8 }
 0x25d   : > { %v1116_v14 = vadd.f32 %v1115_v13, %v1114_v11 }
 0x275   : > { %v1524_v15 = vpop.f32.mrb[0].mxu1 }
 0x276   : > { %v1059_v16 = vadd.f32 %v1524_v15, %v1461_v51  ;;  %v1053_v17 = vpop.f32.mrb[1].mxu1 }
 0x277   : > { %v1054_v27 = vadd.f32 %v1461_v51, %v1053_v17 }
 0x278   : > { %1077 = vst.msk [vmem:[%s2522_s22 + $0x28] sm:$0xff] %vm390_vm0, %v1059_v16  ;;  %v1107_v18 = vmul.f32 %v1059_v16, %v1059_v16  ;;  %v1089_v22 = vsel %vm390_vm0, %v1059_v16, 0.0 }
 0x279   : > { %1076 = vst.msk [vmem:[%s2522_s22 + $0x20] sm:$0xff] %vm390_vm0, %v1054_v27  ;;  %v1087_v19 = vsel %vm390_vm0, %v1054_v27, 0.0  ;;  %v1106_v20 = vmul.f32 %v1054_v27, %v1054_v27 }
 0x27a   : > { %v1088_v7 = vadd.f32 %v1087_v19, %v1086_v12  ;;  %v1119_v26 = vsel %vm390_vm0, %v1107_v18, 0.0 }
 0x27b   : > { %v1117_v23 = vsel %vm390_vm0, %v1106_v20, 0.0 }
 0x27c   : > { %v1118_v24 = vadd.f32 %v1117_v23, %v1116_v14  ;;  %v1090_v25 = vadd.f32 %v1089_v22, %v1088_v7 }
 0x27e   : > { %v1120_v29 = vadd.f32 %v1119_v26, %v1118_v24 }
 0x282   : > { %v1527_v31 = vpop.f32.mrb[2].mxu1 }
 0x283   : > { %v1069_v28 = vadd.f32 %v1527_v31, %v1461_v51  ;;  %v1063_v30 = vpop.f32.mrb[3].mxu1 }
 0x284   : > { %v1064_v32 = vadd.f32 %v1461_v51, %v1063_v30 }
 0x285   : > { %1079 = vst.msk [vmem:[%s2522_s22 + $0x38] sm:$0xff] %vm390_vm0, %v1069_v28  ;;  %v1109_v34 = vmul.f32 %v1069_v28, %v1069_v28 }
 0x286   : > { %1078 = vst.msk [vmem:[%s2522_s22 + $0x30] sm:$0xff] %vm390_vm0, %v1064_v32  ;;  %v1091_v35 = vsel %vm390_vm0, %v1064_v32, 0.0  ;;  %v1108_v36 = vmul.f32 %v1064_v32, %v1064_v32 }
 0x287   : > { %v1092_v38 = vadd.f32 %v1091_v35, %v1090_v25 }
 0x288   : > { %1850 = shalt.err (!%p1847_p6)
}
 0x289   : > { %s1851_s23 = scalar_lea.hbm %s2553_s10, 1024  ;;  %s1855_s19 = scalar_lea.hbm %s2689_s5, 2048 }
 0x28a   : > { %p1852_p12 = scmp.ne.s32.totalorder %s2553_s10, %s1851_s23  ;;  %p1856_p4 = scmp.lt.u32.totalorder %s2553_s10, %s2689_s5 }
 0x28b   : > { %p1857_p8 = scmp.lt.u32.totalorder %s1855_s19, %s1851_s23  ;;  %p1859_p3 = scmp.lt.u32.totalorder %s1851_s23, %s2553_s10 }
 0x28c   : > { %p1853_p1 = pnand %p1852_p12, %p2223_p5 }
 0x28d   : > { %p1858_p10 = por %p1857_p8, %p1856_p4 }
 0x28e   : > { %p1854_p11 = pneg %p1853_p1 }
 0x28f   : > { %p1860_p7 = por %p1859_p3, %p1858_p10 }
 0x291   : > { %p1861_p9 = pnand %p1860_p7, %p1854_p11 }
 0x293   : > { %1864 = shalt.err (!%p1861_p9)
}
 0x294   : > { %s2006_s20 = smov 128   ;;  %v1093_v39 = vsel %vm390_vm0, %v1069_v28, 0.0  ;;  %v1121_v40 = vsel %vm390_vm0, %v1108_v36, 0.0  ;;  %v1123_v43 = vsel %vm390_vm0, %v1109_v34, 0.0  ;;  %s1401_s21 = sshll.u32 %s2281_s15, 3 }
 0x295   : > { %1572 = dma.vmem_to_hbm [thread:$0]  (%p2223_p5), %s2555_s16, 1024, %s2553_s10, %s1135_s9, %s2006_s20, %s2006_s20, %s1998_s11   ;;  %v1094_v41 = vadd.f32 %v1093_v39, %v1092_v38  ;;  %v1122_v42 = vadd.f32 %v1121_v40, %v1120_v29 }
 0x296   : > { %s1139_s18 = sand.u32 1, %s2080_s30   ;;  %s1475_s11 = sshll.u32 %s1979_s27, 7 }
 0x297   : > { %v1095_v44 = vrot.slane %v1094_v41, 4  ;;  %v1124_v33 = vadd.f32 %v1123_v43, %v1122_v42  ;;  %s377_s16 = scalar_lea.vmem [#allocation13], %s1401_s21  ;;  %s2593_s9 = scalar_lea.vmem [#allocation15], %s1401_s21 }
 0x298   : > { %s1177_s10 = sshll.u32 %s377_s16, 4  ;;  %s1191_s24 = sshll.u32 %s2593_s9, 4  ;;  %s2601_s10 = int_to_ptr.vmem [resolvable:$true] %s1177_s10  ;;  %s2609_s24 = int_to_ptr.vmem [resolvable:$true] %s1191_s24 }
 0x299   : > { %v1096_v37 = vadd.f32 %v1095_v44, %v1094_v41  ;;  %v1125_v45 = vrot.slane %v1124_v33, 4  ;;  %s2599_s17 = scalar_lea.hbm %s2690_s6, %s1475_s11  ;;  %s2716_s22 = sld [smem:[#allocation23_spill]] }
 0x29a   : > { %s2611_s8 = scalar_lea.sflag [#allocation14], %s1139_s18  ;;  %s1865_s7 = scalar_lea.vmem %s2601_s10, 128 }
 0x29b   : > { %v1097_v46 = vrot.slane %v1096_v37, 2  ;;  %v1126_v47 = vadd.f32 %v1125_v45, %v1124_v33  ;;  %p1866_p0 = scmp.ne.s32.totalorder %s2601_s10, %s1865_s7  ;;  %s2007_s20 = smov [#allocation13]  }
 0x29c   : > { %s1869_s21 = sshll.u32 %s2007_s20, 4  ;;  %s1870_s21 = int_to_ptr.vmem [resolvable:$false] %s1869_s21 }
 0x29d   : > { %v1098_v48 = vadd.f32 %v1097_v46, %v1096_v37  ;;  %v1127_v49 = vrot.slane %v1126_v47, 2  ;;  %p1867_p2 = pnand %p1866_p0, %p2223_p5  ;;  %s1871_s15 = scalar_lea.vmem %s1870_s21, 256 }
 0x29e   : > { %p1872_p6 = scmp.lt.s32.totalorder %s2601_s10, %s1870_s21  ;;  %p1873_p12 = scmp.lt.s32.totalorder %s1871_s15, %s1865_s7 }
 0x29f   : > { %v1099_v6 = vrot.slane %v1098_v48, 1  ;;  %v1128_v50 = vadd.f32 %v1127_v49, %v1126_v47  ;;  %s2607_s19 = scalar_lea.hbm %s2716_s22, %s1475_s11  ;;  %p1868_p13 = pneg %p1867_p2 }
 0x2a0   : > { %p1874_p1 = por %p1873_p12, %p1872_p6 }
 0x2a1   : > { %v1129_v51 = vrot.slane %v1128_v50, 1  ;;  %v1100_v52 = vadd.f32 %v1099_v6, %v1098_v48 }
 0x2a2   : > { %p1875_p11 = pnand %p1874_p1, %p1868_p13 }
 0x2a3   : > { %v1130_v53 = vadd.f32 %v1129_v51, %v1128_v50  ;;  %1132 = vst.msk [vmem:[%s377_s16] sm:$0xff] %vm390_vm0, %v1100_v52 }
 0x2a4   : > { %1878 = shalt.err (!%p1875_p11)
}
 0x2a5   : > { %s1879_s18 = scalar_lea.hbm %s2599_s17, 128  ;;  %s1883_s23 = scalar_lea.hbm %s2690_s6, 256 }
 0x2a6   : > { %p1880_p4 = scmp.ne.s32.totalorder %s2599_s17, %s1879_s18  ;;  %p1884_p3 = scmp.lt.u32.totalorder %s2599_s17, %s2690_s6 }
 0x2a7   : > { %p1885_p7 = scmp.lt.u32.totalorder %s1883_s23, %s1879_s18  ;;  %p1887_p0 = scmp.lt.u32.totalorder %s1879_s18, %s2599_s17 }
 0x2a8   : > { %p1881_p8 = pnand %p1880_p4, %p2223_p5 }
 0x2a9   : > { %p1886_p9 = por %p1885_p7, %p1884_p3 }
 0x2aa   : > { %p1882_p10 = pneg %p1881_p8 }
 0x2ab   : > { %p1888_p2 = por %p1887_p0, %p1886_p9 }
 0x2ad   : > { %p1889_p13 = pnand %p1888_p2, %p1882_p10 }
 0x2af   : > { %1892 = shalt.err (!%p1889_p13)
}
 0x2b0   : > { %1573 = dma.vmem_to_hbm [thread:$0]  (%p2223_p5), %s2601_s10, 128, %s2599_s17, %s2611_s8   ;;  %1133 = vst.msk [vmem:[%s2593_s9] sm:$0xff] %vm390_vm0, %v1130_v53 }
 0x2b1   : > { %s1893_s7 = scalar_lea.vmem %s2609_s24, 128  ;;  %s2008_s20 = smov [#allocation15]  }
 0x2b2   : > { %p1894_p6 = scmp.ne.s32.totalorder %s2609_s24, %s1893_s7  ;;  %s1897_s21 = sshll.u32 %s2008_s20, 4  ;;  %s1898_s21 = int_to_ptr.vmem [resolvable:$false] %s1897_s21 }
 0x2b3   : > { %s1899_s15 = scalar_lea.vmem %s1898_s21, 256  ;;  %p1900_p11 = scmp.lt.s32.totalorder %s2609_s24, %s1898_s21 }
 0x2b4   : > { %p1895_p12 = pnand %p1894_p6, %p2223_p5  ;;  %p1901_p4 = scmp.lt.s32.totalorder %s1899_s15, %s1893_s7 }
 0x2b6   : > { %p1896_p1 = pneg %p1895_p12  ;;  %p1902_p8 = por %p1901_p4, %p1900_p11 }
 0x2b8   : > { %p1903_p10 = pnand %p1902_p8, %p1896_p1 }
 0x2ba   : > { %1906 = shalt.err (!%p1903_p10)
}
 0x2bb   : > { %s1907_s10 = scalar_lea.hbm %s2607_s19, 128  ;;  %s1911_s18 = scalar_lea.hbm %s2716_s22, 256 }
 0x2bc   : > { %p1908_p3 = scmp.ne.s32.totalorder %s2607_s19, %s1907_s10  ;;  %p1912_p0 = scmp.lt.u32.totalorder %s2607_s19, %s2716_s22 }
 0x2bd   : > { %p1913_p2 = scmp.lt.u32.totalorder %s1911_s18, %s1907_s10  ;;  %p1915_p6 = scmp.lt.u32.totalorder %s1907_s10, %s2607_s19 }
 0x2be   : > { %p1909_p7 = pnand %p1908_p3, %p2223_p5 }
 0x2bf   : > { %p1914_p13 = por %p1913_p2, %p1912_p0 }
 0x2c0   : > { %p1910_p9 = pneg %p1909_p7 }
 0x2c1   : > { %p1916_p12 = por %p1915_p6, %p1914_p13 }
 0x2c3   : > { %p1917_p1 = pnand %p1916_p12, %p1910_p9 }
 0x2c5   : > { %1920 = shalt.err (!%p1917_p1)
}
 0x2c6   : > { %1574 = dma.vmem_to_hbm [thread:$0]  (%p2223_p5), %s2609_s24, 128, %s2607_s19, %s2611_s8  }
 0x2c7 PF: > { %s2717_s23 = sld [smem:[#allocation21_spill]]  ;;  %s2718_s27 = sld [smem:[#allocation22_spill]] }
 0x2c8   : > { %p2720_p4 = scmp.ge.s32.totalorder %s1987_s29, 2 }
 0x2cd   : > { %s1203_s30 = sand.u32 1, %s2717_s23   ;;  %p2719_p11 = scmp.ne.s32.totalorder %s2718_s27, 0 }
 0x2ce   : > { %s1204_s7 = scalar_lea.sflag [#allocation5], %s1203_s30 }
 0x2cf   : > { %p1596_p8 = pnand %p2720_p4, %p2719_p11 }
 0x2d1   : > { %1958 = dma.done.wait (!%p1596_p8), %s1204_s7, 1024  }
 0x2d2   : > { %1960 = vsyncadd (!%p1596_p8), %s1204_s7, 4294966272  ;;  %s2721_s20 = sadd.s32 4294967294, %s1987_s29  }
 0x2d3   : > { %s1212_s21 = sand.u32 1, %s2721_s20  }
 0x2d4   : > { %s1213_s15 = scalar_lea.sflag [#allocation14], %s1212_s21 }
 0x2d5   : > { %1962 = dma.done.wait (!%p1596_p8), %s1213_s15, 256  }
 0x2d6   : > { %1964 = vsyncadd (!%p1596_p8), %s1213_s15, 4294967040  ;;  %s29_s29 = sadd.s32 1, %s1987_s29   ;;  %s2722_s24 = smov %s1971_s25 }
 0x2d7   : > { %p26_p5 = scmp.ge.s32.totalorder %s29_s29, 4   ;;  %s2723_s25 = smov %s1975_s26 }
 0x2d8   : > { %s2724_s26 = smov %s2232_s13  ;;  %s2725_s27 = smov %s1983_s28 }
 0x2d9   : > { %s2726_s28 = smov %s2728_s12  ;;  %28 = sbr.rel (!%p26_p5) target bundleno = 12 (0xc), region = 141 }
 0x2e0   :  { %1227 = vsyncpa [#allocation4], 1 }
 0x2e1   :  { %1229 = vsyncpa [#allocation4 + $0x1], 1 }
 0x2e2   :  { %1230 = vsyncpa [#allocation7], 1 }
 0x2e3   :  { %1231 = vsyncpa [#allocation10], 1 }
 0x2e4   :  { %1232 = vsyncpa [#allocation5], 1 }
 0x2e5   :  { %1234 = vsyncpa [#allocation5 + $0x1], 1 }
 0x2e6   :  { %1235 = vsyncpa [#allocation14], 1 }
 0x2e7   :  { %1237 = vsyncpa [#allocation14 + $0x1], 1 }

</bundles_post_ra>
